<compile_context>
chip_gen: v7x
topology: tpu7x:2x2x1
jax: 0.10.0
libtpu: 0.0.40
codegen_flags: <defaults>
</compile_context>

<pallas_src>
import functools

import numpy as np
import jax
import jax.numpy as jnp
from jax.experimental import pallas as pl
from jax.experimental.pallas import tpu as pltpu

BN_EPS = 1e-5

# Non-zero taps of a 3x3 mask-'B' convolution (the other 4 taps are exactly 0).
_TAPS_B3 = ((0, 0), (0, 1), (0, 2), (1, 0), (1, 1))
# Non-zero taps of a 7x7 mask-'A' convolution: rows 0..2 full + row 3 cols 0..2.
_TAPS_A7 = tuple((kh, kw) for kh in range(7) for kw in range(7)
                 if kh < 3 or (kh == 3 and kw < 3))          # 24 taps

# Left halo width (in W, the sublane axis) of the activation scratch.  8 keeps
# the per-layer interior writeback sublane-aligned; only column _PAD_L-1 is
# ever read, columns 0.._PAD_L-2 are pure alignment padding.
_PAD_L = 8


def _round_up(v, m):
    return (v + m - 1) // m * m


# ---------------------------------------------------------------------------
# Fused whole-network Pallas kernel (one batch tile per grid step)
# ---------------------------------------------------------------------------
def _pixelcnn_fused_kernel(pa_ref, wa_ref, sa_ref, wb_ref, sb_ref,
                           w1_ref, s1_ref, w2_ref, b2_ref, o_ref, act_ref,
                           *, bt, h, w, c_pad, n_blocks):
    # pa_ref : (bt*h*w, ka_pad)            bf16  im2col patches (24 mask-A taps)
    # wa_ref : (ka_pad, c_pad)             bf16  mask-A weights (BN scale folded)
    # sa_ref : (1, c_pad)                  f32   mask-A folded BN shift
    # wb_ref : (n_blocks, 5*c_pad, c_pad)  bf16  mask-B fused tap weights
    # sb_ref : (n_blocks, 1, c_pad)        f32   mask-B folded BN shifts
    # w1_ref : (c_pad, mid)                bf16  head 1x1 conv weights (BN folded)
    # s1_ref : (1, mid)                    f32   head folded BN shift (incl. bias)
    # w2_ref : (mid, out_c_pad)            bf16  final 1x1 conv weights
    # b2_ref : (1, out_c_pad)              f32   final conv bias
    # o_ref  : (bt*h*w, out_c_pad)         f32   logits for this batch tile
    # act_ref: (bt, h+1, w+1+_PAD_L, c_pad) bf16 zero-haloed VMEM activations
    m = bt * h * w

    # Zero only the halo cells that the 3x3 taps actually read (top row +
    # left/right columns).  Done every grid step (cheap) so the kernel stays
    # correct when the 'parallel' batch axis is sharded across TensorCores:
    # each core owns its own scratch and may never run program_id == 0.
    zcol = jnp.zeros((bt, h + 1, 1, c_pad), dtype=act_ref.dtype)
    act_ref[:, :, _PAD_L - 1:_PAD_L, :] = zcol
    act_ref[:, :, _PAD_L + w:_PAD_L + w + 1, :] = zcol
    act_ref[:, 0:1, _PAD_L:_PAD_L + w, :] = jnp.zeros(
        (bt, 1, w, c_pad), dtype=act_ref.dtype)

    # ---- MaskA: 7x7 masked conv as an im2col GEMM (bf16 MXU / f32 acc) + BN + ReLU
    y = jnp.dot(pa_ref[...], wa_ref[...], preferred_element_type=jnp.float32)
    y = jnp.maximum(y + sa_ref[...], 0.0)                       # (m, c_pad) f32
    act_ref[:, 1:1 + h, _PAD_L:_PAD_L + w, :] = (
        y.reshape(bt, h, w, c_pad).astype(act_ref.dtype))

    # ---- 15x MaskB: 3x3 masked conv + BN + ReLU, VMEM-resident activations.
    # The 5 non-masked taps are fused into ONE GEMM per layer (K = 5*c_pad),
    # so accumulation stays inside the MXU f32 accumulator.
    @pl.loop(0, n_blocks)
    def _(l):
        patches = [
            act_ref[:, kh:kh + h, _PAD_L - 1 + kw:_PAD_L - 1 + kw + w, :]
            .reshape(m, c_pad)
            for (kh, kw) in _TAPS_B3
        ]
        p = jnp.concatenate(patches, axis=-1)                   # (m, 5*c_pad) bf16
        d = jnp.dot(p, wb_ref[l], preferred_element_type=jnp.float32)
        yb = jnp.maximum(d + sb_ref[l], 0.0)                    # (m, c_pad) f32
        act_ref[:, 1:1 + h, _PAD_L:_PAD_L + w, :] = (
            yb.reshape(bt, h, w, c_pad).astype(act_ref.dtype))

    # ---- output head: (leading ReLU is a no-op on already-ReLU'd activations)
    #      1x1 conv (+BN) -> ReLU -> 1x1 conv, fused; (m, mid) never leaves VMEM.
    yf = act_ref[:, 1:1 + h, _PAD_L:_PAD_L + w, :].reshape(m, c_pad)   # bf16, >= 0
    t1 = jnp.dot(yf, w1_ref[...], preferred_element_type=jnp.float32)
    t1 = jnp.maximum(t1 + s1_ref[...], 0.0)
    t2 = jnp.dot(t1.astype(jnp.bfloat16), w2_ref[...],
                 preferred_element_type=jnp.float32)
    o_ref[...] = (t2 + b2_ref[...]).astype(o_ref.dtype)


# ---------------------------------------------------------------------------
# Tiling helper
# ---------------------------------------------------------------------------
def _pick_batch_tile(B, hw, target_m=512):
    """Largest divisor of B with bt*hw ~ target_m, capped at B//2 so the grid
    has >= 2 steps (lets the 'parallel' axis shard across v7x's 2 TensorCores)."""
    bt_cap = max(1, B // 2)
    bt = max(1, min(bt_cap, max(1, target_m // hw)))
    while B % bt:
        bt -= 1
    return bt


# ---------------------------------------------------------------------------
# Deterministic parameter construction (shapes match the PyTorch module)
# ---------------------------------------------------------------------------
def _masked_weight(key, mask_type, cout, cin, k):
    """MaskedConv2d weight, mask applied, returned in HWIO layout."""
    fan_in = cin * k * k
    w = jax.random.normal(key, (cout, cin, k, k), jnp.float32) / np.sqrt(fan_in)
    m = np.ones((cout, cin, k, k), np.float32)
    m[:, :, k // 2, k // 2 + (1 if mask_type == 'B' else 0):] = 0.0
    m[:, :, k // 2 + 1:, :] = 0.0
    w = w * jnp.asarray(m)
    return jnp.transpose(w, (2, 3, 1, 0))        # OIHW -> HWIO


def _bn_params(key, c):
    kg, kb, km, kv = jax.random.split(key, 4)
    gamma = 1.0 + 0.1 * jax.random.normal(kg, (c,), jnp.float32)
    beta = 0.1 * jax.random.normal(kb, (c,), jnp.float32)
    mean = 0.1 * jax.random.normal(km, (c,), jnp.float32)
    var = 1.0 + 0.1 * jax.random.uniform(kv, (c,), jnp.float32)
    return gamma, beta, mean, var


def _fold_bn(gamma, beta, mean, var, conv_bias=None):
    scale = gamma / jnp.sqrt(var + BN_EPS)
    shift = beta - scale * mean
    if conv_bias is not None:
        shift = shift + scale * conv_bias
    return scale, shift


def init_pixelcnn_params(key, n_channel=3, h=32, discrete_channel=64):
    twoh = 2 * h
    mid = 1024                                    # hard-coded in the PyTorch module
    out_c = n_channel * discrete_channel
    keys = iter(jax.random.split(key, 64))

    params = {}
    # MaskAConv: MaskedConv2d('A', n_channel, 2h, 7, 1, 3, bias=False) + BN + ReLU
    wA = _masked_weight(next(keys), 'A', twoh, n_channel, 7)
    sA, bA = _fold_bn(*_bn_params(next(keys), twoh))
    params['maskA'] = (wA, sA, bA)

    # 15x MaskBConvBlock: MaskedConv2d('B', 2h, 2h, 3, 1, 1, bias=False) + BN + ReLU
    blocks = []
    for _ in range(15):
        wB = _masked_weight(next(keys), 'B', twoh, twoh, 3)
        sB, bB = _fold_bn(*_bn_params(next(keys), twoh))
        blocks.append((wB, sB, bB))
    params['maskB'] = blocks

    # out: ReLU -> Conv1x1(2h,1024,bias) -> BN -> ReLU -> Conv1x1(1024,out_c,bias)
    w1 = jax.random.normal(next(keys), (1, 1, twoh, mid), jnp.float32) / np.sqrt(twoh)
    b1 = 0.1 * jax.random.normal(next(keys), (mid,), jnp.float32)
    s1, sh1 = _fold_bn(*_bn_params(next(keys), mid), conv_bias=b1)
    w2 = jax.random.normal(next(keys), (1, 1, mid, out_c), jnp.float32) / np.sqrt(mid)
    b2 = 0.1 * jax.random.normal(next(keys), (out_c,), jnp.float32)
    params['out'] = (w1, s1, sh1, w2, b2)
    return params


# ---------------------------------------------------------------------------
# Forward pass (matches PixelCNN.forward)
# ---------------------------------------------------------------------------
def pixelcnn_forward(params, x_nchw, *, n_channel, discrete_channel):
    # NCHW (PyTorch) -> NHWC (kernel layout)
    x = jnp.transpose(x_nchw, (0, 2, 3, 1)).astype(jnp.float32)
    B, H, W, Cin = x.shape

    wA, sA, bA = params['maskA']          # HWIO (7,7,Cin,C), BN scale, BN shift
    C = wA.shape[-1]                      # 2h
    C_pad = _round_up(C, 128)             # lane-dense channel dim
    n_blocks = len(params['maskB'])
    w1, s1, sh1, w2, b2 = params['out']
    mid = w1.shape[-1]
    out_c = w2.shape[-1]
    out_c_pad = _round_up(out_c, 128)     # lane-dense logits (sliced back below)
    nt = len(_TAPS_B3)

    # ---- parameter prep (outside the kernel): fold BN scales into weight
    #      columns, zero-pad channel (lane) dims to 128, stack MaskB taps into
    #      one (5*C_pad, C_pad) GEMM operand per layer, cast operands to bf16.
    ka = len(_TAPS_A7) * Cin
    ka_pad = _round_up(ka, 128)
    wa_taps = jnp.stack([wA[kh, kw] for (kh, kw) in _TAPS_A7], axis=0)  # (24,Cin,C)
    wa2d = wa_taps.reshape(ka, C) * sA[None, :]
    wa2d = jnp.pad(wa2d, ((0, ka_pad - ka), (0, C_pad - C))).astype(jnp.bfloat16)
    sa2 = jnp.pad(bA, (0, C_pad - C)).reshape(1, C_pad)

    wb_layers, sb_layers = [], []
    for (wB, sB, bB) in params['maskB']:
        taps = jnp.stack([wB[kh, kw] for (kh, kw) in _TAPS_B3], axis=0)  # (5,C,C)
        taps = taps * sB[None, None, :]
        taps = jnp.pad(taps, ((0, 0), (0, C_pad - C), (0, C_pad - C)))   # (5,Cp,Cp)
        wb_layers.append(taps.reshape(nt * C_pad, C_pad))
        sb_layers.append(jnp.pad(bB, (0, C_pad - C)))
    wb = jnp.stack(wb_layers, axis=0).astype(jnp.bfloat16)   # (nb, 5*C_pad, C_pad)
    sb = jnp.stack(sb_layers, axis=0).reshape(n_blocks, 1, C_pad)

    w1_2d = jnp.pad(w1.reshape(C, mid) * s1[None, :],
                    ((0, C_pad - C), (0, 0))).astype(jnp.bfloat16)
    s1_2 = sh1.reshape(1, mid)
    w2_2d = jnp.pad(w2.reshape(mid, out_c),
                    ((0, 0), (0, out_c_pad - out_c))).astype(jnp.bfloat16)
    b2_2 = jnp.pad(b2, (0, out_c_pad - out_c)).reshape(1, out_c_pad)

    # ---- im2col over the 24 non-masked mask-'A' taps; batch flattened into M
    pad = 3
    xp = jnp.pad(x, ((0, 0), (pad, pad), (pad, pad), (0, 0)))
    cols = [xp[:, kh:kh + H, kw:kw + W, :] for (kh, kw) in _TAPS_A7]
    patches = jnp.stack(cols, axis=3).reshape(B * H * W, ka)   # (tap, cin) order
    patches = jnp.pad(patches, ((0, 0), (0, ka_pad - ka))).astype(jnp.bfloat16)

    bt = _pick_batch_tile(B, H * W)
    m = bt * H * W
    assert m % 8 == 0, "bt*H*W must be a multiple of 8 for the (8,128) constraint"
    grid = (B // bt,)

    kernel = functools.partial(_pixelcnn_fused_kernel, bt=bt, h=H, w=W,
                               c_pad=C_pad, n_blocks=n_blocks)
    out = pl.pallas_call(
        kernel,
        out_shape=jax.ShapeDtypeStruct((B * H * W, out_c_pad), jnp.float32),
        grid=grid,
        in_specs=[
            pl.BlockSpec((m, ka_pad), lambda i: (i, 0)),
            pl.BlockSpec((ka_pad, C_pad), lambda i: (0, 0)),
            pl.BlockSpec((1, C_pad), lambda i: (0, 0)),
            pl.BlockSpec((n_blocks, nt * C_pad, C_pad), lambda i: (0, 0, 0)),
            pl.BlockSpec((n_blocks, 1, C_pad), lambda i: (0, 0, 0)),
            pl.BlockSpec((C_pad, mid), lambda i: (0, 0)),
            pl.BlockSpec((1, mid), lambda i: (0, 0)),
            pl.BlockSpec((mid, out_c_pad), lambda i: (0, 0)),
            pl.BlockSpec((1, out_c_pad), lambda i: (0, 0)),
        ],
        out_specs=pl.BlockSpec((m, out_c_pad), lambda i: (i, 0)),
        scratch_shapes=[pltpu.VMEM((bt, H + 1, W + 1 + _PAD_L, C_pad),
                                   jnp.bfloat16)],
        compiler_params=pltpu.CompilerParams(
            dimension_semantics=("parallel",),
            # Actual footprint is a few MB; 32 MiB is safe on v5e/v6e and within
            # v7x's 64 MiB physical VMEM with plenty of headroom.
            vmem_limit_bytes=32 * 1024 * 1024),
    )(patches, wa2d, sa2, wb, sb, w1_2d, s1_2, w2_2d, b2_2)

    # (B*H*W, out_c_pad) -> slice off lane padding -> [B, n_channel, H, W, discrete]
    out = out[:, :out_c].reshape(B, H, W, n_channel, discrete_channel)
    return jnp.transpose(out, (0, 3, 1, 2, 4))


if __name__ == "__main__":
    key = jax.random.PRNGKey(0)
    kp, kx = jax.random.split(key)

    # small config: n_channel=3, h=32 (2h=64 -> padded to 128 lanes),
    # discrete_channel=64 (192 logits -> padded to 256 lanes), 16x16 images.
    n_channel, h, discrete = 3, 32, 64
    B, H, W = 2, 16, 16

    params = init_pixelcnn_params(kp, n_channel=n_channel, h=h,
                                  discrete_channel=discrete)
    x = jax.random.uniform(kx, (B, n_channel, H, W), jnp.float32)  # NCHW input

    fwd = jax.jit(functools.partial(pixelcnn_forward,
                                    n_channel=n_channel,
                                    discrete_channel=discrete))
    out = jax.block_until_ready(fwd(params, x))

    assert out.shape == (B, n_channel, H, W, discrete), out.shape
    assert bool(jnp.all(jnp.isfinite(out)))
    print("KERNEL_OK")
</pallas_src>

<mosaic_0001>
module attributes {stable_mosaic.version = 11 : i64} {
  func.func @_pixelcnn_fused_kernel(%arg0: i32, %arg1: memref<256x128xbf16, #tpu.memory_space<vmem>>, %arg2: memref<128x128xbf16, #tpu.memory_space<vmem>>, %arg3: memref<1x128xf32, #tpu.memory_space<vmem>>, %arg4: memref<15x640x128xbf16, #tpu.memory_space<vmem>>, %arg5: memref<15x1x128xf32, #tpu.memory_space<vmem>>, %arg6: memref<128x1024xbf16, #tpu.memory_space<vmem>>, %arg7: memref<1x1024xf32, #tpu.memory_space<vmem>>, %arg8: memref<1024x256xbf16, #tpu.memory_space<vmem>>, %arg9: memref<1x256xf32, #tpu.memory_space<vmem>>, %arg10: memref<256x256xf32, #tpu.memory_space<vmem>>, %arg11: memref<1x17x25x128xbf16, #tpu.memory_space<vmem>>) attributes {dimension_semantics = [#tpu.dimension_semantics<parallel>], iteration_bounds = array<i64: 2>, scalar_prefetch = 0 : i64, scratch_operands = 1 : i64, tpu.core_type = #tpu.core_type<tc>, window_params = [{transform_indices = @transform_0, window_bounds = array<i64: 256, 128>}, {pipeline_mode = #tpu.pipeline_mode<synchronous>, transform_indices = @transform_1, window_bounds = array<i64: 128, 128>}, {pipeline_mode = #tpu.pipeline_mode<synchronous>, transform_indices = @transform_2, window_bounds = array<i64: 1, 128>}, {pipeline_mode = #tpu.pipeline_mode<synchronous>, transform_indices = @transform_3, window_bounds = array<i64: 15, 640, 128>}, {pipeline_mode = #tpu.pipeline_mode<synchronous>, transform_indices = @transform_4, window_bounds = array<i64: 15, 1, 128>}, {pipeline_mode = #tpu.pipeline_mode<synchronous>, transform_indices = @transform_5, window_bounds = array<i64: 128, 1024>}, {pipeline_mode = #tpu.pipeline_mode<synchronous>, transform_indices = @transform_6, window_bounds = array<i64: 1, 1024>}, {pipeline_mode = #tpu.pipeline_mode<synchronous>, transform_indices = @transform_7, window_bounds = array<i64: 1024, 256>}, {pipeline_mode = #tpu.pipeline_mode<synchronous>, transform_indices = @transform_8, window_bounds = array<i64: 1, 256>}, {transform_indices = @transform_9, window_bounds = array<i64: 256, 256>}]} {
    %cst = arith.constant 0.000000e+00 : bf16
    %0 = vector.broadcast %cst : bf16 to vector<1x17x1x128xbf16>
    %c0 = arith.constant 0 : index
    %c0_0 = arith.constant 0 : index
    %c7 = arith.constant 7 : index
    %c0_1 = arith.constant 0 : index
    %1 = vector.load %arg11[%c0, %c0_0, %c7, %c0_1] : memref<1x17x25x128xbf16, #tpu.memory_space<vmem>>, vector<1x17x1x128xbf16>
    tpu.vector_store %arg11[%c0, %c0_0, %c7, %c0_1], %0 {strides = array<i32>} : memref<1x17x25x128xbf16, #tpu.memory_space<vmem>>, vector<1x17x1x128xbf16>,
    %c0_2 = arith.constant 0 : index
    %c0_3 = arith.constant 0 : index
    %c24 = arith.constant 24 : index
    %c0_4 = arith.constant 0 : index
    %2 = vector.load %arg11[%c0_2, %c0_3, %c24, %c0_4] : memref<1x17x25x128xbf16, #tpu.memory_space<vmem>>, vector<1x17x1x128xbf16>
    tpu.vector_store %arg11[%c0_2, %c0_3, %c24, %c0_4], %0 {strides = array<i32>} : memref<1x17x25x128xbf16, #tpu.memory_space<vmem>>, vector<1x17x1x128xbf16>,
    %cst_5 = arith.constant 0.000000e+00 : bf16
    %3 = vector.broadcast %cst_5 : bf16 to vector<1x1x16x128xbf16>
    %c0_6 = arith.constant 0 : index
    %c0_7 = arith.constant 0 : index
    %c8 = arith.constant 8 : index
    %c0_8 = arith.constant 0 : index
    %4 = vector.load %arg11[%c0_6, %c0_7, %c8, %c0_8] : memref<1x17x25x128xbf16, #tpu.memory_space<vmem>>, vector<1x1x16x128xbf16>
    tpu.vector_store %arg11[%c0_6, %c0_7, %c8, %c0_8], %3 {strides = array<i32>} : memref<1x17x25x128xbf16, #tpu.memory_space<vmem>>, vector<1x1x16x128xbf16>,
    %c0_9 = arith.constant 0 : index
    %c0_10 = arith.constant 0 : index
    %5 = vector.load %arg1[%c0_9, %c0_10] : memref<256x128xbf16, #tpu.memory_space<vmem>>, vector<256x128xbf16>
    %c0_11 = arith.constant 0 : index
    %c0_12 = arith.constant 0 : index
    %6 = vector.load %arg2[%c0_11, %c0_12] : memref<128x128xbf16, #tpu.memory_space<vmem>>, vector<128x128xbf16>
    %cst_13 = arith.constant dense<0.000000e+00> : vector<256x128xf32>
    %7 = tpu.matmul %5, %6, %cst_13 {dimension_numbers = #tpu.dot_dimension_numbers<[1], [0], [0], [1], [0, 0, 1, 1], [], []>} : vector<256x128xbf16>, vector<128x128xbf16>, vector<256x128xf32> -> vector<256x128xf32>
    %c0_14 = arith.constant 0 : index
    %c0_15 = arith.constant 0 : index
    %8 = vector.load %arg3[%c0_14, %c0_15] : memref<1x128xf32, #tpu.memory_space<vmem>>, vector<1x128xf32>
    %9 = vector.broadcast %8 : vector<1x128xf32> to vector<256x128xf32>
    %10 = arith.addf %7, %9 : vector<256x128xf32>
    %cst_16 = arith.constant 0.000000e+00 : f32
    %11 = vector.broadcast %cst_16 : f32 to vector<256x128xf32>
    %12 = arith.maximumf %10, %11 : vector<256x128xf32>
    %13 = vector.shape_cast %12 : vector<256x128xf32> to vector<1x16x16x128xf32>
    %14 = arith.truncf %13 : vector<1x16x16x128xf32> to vector<1x16x16x128xbf16>
    %c0_17 = arith.constant 0 : index
    %c1 = arith.constant 1 : index
    %c8_18 = arith.constant 8 : index
    %c0_19 = arith.constant 0 : index
    %15 = vector.load %arg11[%c0_17, %c1, %c8_18, %c0_19] : memref<1x17x25x128xbf16, #tpu.memory_space<vmem>>, vector<1x16x16x128xbf16>
    tpu.vector_store %arg11[%c0_17, %c1, %c8_18, %c0_19], %14 {strides = array<i32>} : memref<1x17x25x128xbf16, #tpu.memory_space<vmem>>, vector<1x16x16x128xbf16>,
    %c0_i32 = arith.constant 0 : i32
    %c15_i32 = arith.constant 15 : i32
    %16 = arith.addi %c0_i32, %c15_i32 : i32
    %c1_i32 = arith.constant 1 : i32
    scf.for %arg12 = %c0_i32 to %16 step %c1_i32  : i32 {
      %c1_i32_38 = arith.constant 1 : i32
      %33 = arith.muli %arg12, %c1_i32_38 : i32
      %c0_i32_39 = arith.constant 0 : i32
      %34 = arith.addi %c0_i32_39, %33 : i32
      %c0_40 = arith.constant 0 : index
      %c0_41 = arith.constant 0 : index
      %c7_42 = arith.constant 7 : index
      %c0_43 = arith.constant 0 : index
      %35 = vector.load %arg11[%c0_40, %c0_41, %c7_42, %c0_43] : memref<1x17x25x128xbf16, #tpu.memory_space<vmem>>, vector<1x16x16x128xbf16>
      %36 = vector.shape_cast %35 : vector<1x16x16x128xbf16> to vector<256x128xbf16>
      %c0_44 = arith.constant 0 : index
      %c0_45 = arith.constant 0 : index
      %c8_46 = arith.constant 8 : index
      %c0_47 = arith.constant 0 : index
      %37 = vector.load %arg11[%c0_44, %c0_45, %c8_46, %c0_47] : memref<1x17x25x128xbf16, #tpu.memory_space<vmem>>, vector<1x16x16x128xbf16>
      %38 = vector.shape_cast %37 : vector<1x16x16x128xbf16> to vector<256x128xbf16>
      %c0_48 = arith.constant 0 : index
      %c0_49 = arith.constant 0 : index
      %c9 = arith.constant 9 : index
      %c0_50 = arith.constant 0 : index
      %39 = vector.load %arg11[%c0_48, %c0_49, %c9, %c0_50] : memref<1x17x25x128xbf16, #tpu.memory_space<vmem>>, vector<1x16x16x128xbf16>
      %40 = vector.shape_cast %39 : vector<1x16x16x128xbf16> to vector<256x128xbf16>
      %c0_51 = arith.constant 0 : index
      %c1_52 = arith.constant 1 : index
      %c7_53 = arith.constant 7 : index
      %c0_54 = arith.constant 0 : index
      %41 = vector.load %arg11[%c0_51, %c1_52, %c7_53, %c0_54] : memref<1x17x25x128xbf16, #tpu.memory_space<vmem>>, vector<1x16x16x128xbf16>
      %42 = vector.shape_cast %41 : vector<1x16x16x128xbf16> to vector<256x128xbf16>
      %c0_55 = arith.constant 0 : index
      %c1_56 = arith.constant 1 : index
      %c8_57 = arith.constant 8 : index
      %c0_58 = arith.constant 0 : index
      %43 = vector.load %arg11[%c0_55, %c1_56, %c8_57, %c0_58] : memref<1x17x25x128xbf16, #tpu.memory_space<vmem>>, vector<1x16x16x128xbf16>
      %44 = vector.shape_cast %43 : vector<1x16x16x128xbf16> to vector<256x128xbf16>
      %45 = tpu.concatenate %36, %38, %40, %42, %44 in 1 : vector<256x128xbf16>, vector<256x128xbf16>, vector<256x128xbf16>, vector<256x128xbf16>, vector<256x128xbf16> -> vector<256x640xbf16>
      %46 = arith.index_cast %34 : i32 to index
      %c0_59 = arith.constant 0 : index
      %c0_60 = arith.constant 0 : index
      %47 = vector.load %arg4[%46, %c0_59, %c0_60] : memref<15x640x128xbf16, #tpu.memory_space<vmem>>, vector<1x640x128xbf16>
      %48 = vector.shape_cast %47 : vector<1x640x128xbf16> to vector<640x128xbf16>
      %cst_61 = arith.constant dense<0.000000e+00> : vector<256x128xf32>
      %49 = tpu.matmul %45, %48, %cst_61 {dimension_numbers = #tpu.dot_dimension_numbers<[1], [0], [0], [1], [0, 0, 1, 1], [], []>} : vector<256x640xbf16>, vector<640x128xbf16>, vector<256x128xf32> -> vector<256x128xf32>
      %50 = arith.index_cast %34 : i32 to index
      %c0_62 = arith.constant 0 : index
      %c0_63 = arith.constant 0 : index
      %51 = vector.load %arg5[%50, %c0_62, %c0_63] : memref<15x1x128xf32, #tpu.memory_space<vmem>>, vector<1x1x128xf32>
      %52 = vector.shape_cast %51 : vector<1x1x128xf32> to vector<1x128xf32>
      %53 = vector.broadcast %52 : vector<1x128xf32> to vector<256x128xf32>
      %54 = arith.addf %49, %53 : vector<256x128xf32>
      %cst_64 = arith.constant 0.000000e+00 : f32
      %55 = vector.broadcast %cst_64 : f32 to vector<256x128xf32>
      %56 = arith.maximumf %54, %55 : vector<256x128xf32>
      %57 = vector.shape_cast %56 : vector<256x128xf32> to vector<1x16x16x128xf32>
      %58 = arith.truncf %57 : vector<1x16x16x128xf32> to vector<1x16x16x128xbf16>
      %c0_65 = arith.constant 0 : index
      %c1_66 = arith.constant 1 : index
      %c8_67 = arith.constant 8 : index
      %c0_68 = arith.constant 0 : index
      %59 = vector.load %arg11[%c0_65, %c1_66, %c8_67, %c0_68] : memref<1x17x25x128xbf16, #tpu.memory_space<vmem>>, vector<1x16x16x128xbf16>
      tpu.vector_store %arg11[%c0_65, %c1_66, %c8_67, %c0_68], %58 {strides = array<i32>} : memref<1x17x25x128xbf16, #tpu.memory_space<vmem>>, vector<1x16x16x128xbf16>,
    }
    %c15_i32_20 = arith.constant 15 : i32
    %c0_21 = arith.constant 0 : index
    %c1_22 = arith.constant 1 : index
    %c8_23 = arith.constant 8 : index
    %c0_24 = arith.constant 0 : index
    %17 = vector.load %arg11[%c0_21, %c1_22, %c8_23, %c0_24] : memref<1x17x25x128xbf16, #tpu.memory_space<vmem>>, vector<1x16x16x128xbf16>
    %18 = vector.shape_cast %17 : vector<1x16x16x128xbf16> to vector<256x128xbf16>
    %c0_25 = arith.constant 0 : index
    %c0_26 = arith.constant 0 : index
    %19 = vector.load %arg6[%c0_25, %c0_26] : memref<128x1024xbf16, #tpu.memory_space<vmem>>, vector<128x1024xbf16>
    %cst_27 = arith.constant dense<0.000000e+00> : vector<256x1024xf32>
    %20 = tpu.matmul %18, %19, %cst_27 {dimension_numbers = #tpu.dot_dimension_numbers<[1], [0], [0], [1], [0, 0, 1, 1], [], []>} : vector<256x128xbf16>, vector<128x1024xbf16>, vector<256x1024xf32> -> vector<256x1024xf32>
    %c0_28 = arith.constant 0 : index
    %c0_29 = arith.constant 0 : index
    %21 = vector.load %arg7[%c0_28, %c0_29] : memref<1x1024xf32, #tpu.memory_space<vmem>>, vector<1x1024xf32>
    %22 = vector.broadcast %21 : vector<1x1024xf32> to vector<256x1024xf32>
    %23 = arith.addf %20, %22 : vector<256x1024xf32>
    %cst_30 = arith.constant 0.000000e+00 : f32
    %24 = vector.broadcast %cst_30 : f32 to vector<256x1024xf32>
    %25 = arith.maximumf %23, %24 : vector<256x1024xf32>
    %26 = arith.truncf %25 : vector<256x1024xf32> to vector<256x1024xbf16>
    %c0_31 = arith.constant 0 : index
    %c0_32 = arith.constant 0 : index
    %27 = vector.load %arg8[%c0_31, %c0_32] : memref<1024x256xbf16, #tpu.memory_space<vmem>>, vector<1024x256xbf16>
    %cst_33 = arith.constant dense<0.000000e+00> : vector<256x256xf32>
    %28 = tpu.matmul %26, %27, %cst_33 {dimension_numbers = #tpu.dot_dimension_numbers<[1], [0], [0], [1], [0, 0, 1, 1], [], []>} : vector<256x1024xbf16>, vector<1024x256xbf16>, vector<256x256xf32> -> vector<256x256xf32>
    %c0_34 = arith.constant 0 : index
    %c0_35 = arith.constant 0 : index
    %29 = vector.load %arg9[%c0_34, %c0_35] : memref<1x256xf32, #tpu.memory_space<vmem>>, vector<1x256xf32>
    %30 = vector.broadcast %29 : vector<1x256xf32> to vector<256x256xf32>
    %31 = arith.addf %28, %30 : vector<256x256xf32>
    %c0_36 = arith.constant 0 : index
    %c0_37 = arith.constant 0 : index
    %32 = vector.load %arg10[%c0_36, %c0_37] : memref<256x256xf32, #tpu.memory_space<vmem>>, vector<256x256xf32>
    tpu.vector_store %arg10[%c0_36, %c0_37], %31 {strides = array<i32>} : memref<256x256xf32, #tpu.memory_space<vmem>>, vector<256x256xf32>,
    return
  }
  func.func @transform_0(%arg0: i32) -> (i32, i32) {
    %c0_i32 = arith.constant 0 : i32
    %c0_i32_0 = arith.constant 0 : i32
    return %arg0, %c0_i32 : i32, i32
  }
  func.func @transform_1(%arg0: i32) -> (i32, i32) {
    %c0_i32 = arith.constant 0 : i32
    %c0_i32_0 = arith.constant 0 : i32
    %c0_i32_1 = arith.constant 0 : i32
    return %c0_i32, %c0_i32_0 : i32, i32
  }
  func.func @transform_2(%arg0: i32) -> (i32, i32) {
    %c0_i32 = arith.constant 0 : i32
    %c0_i32_0 = arith.constant 0 : i32
    %c0_i32_1 = arith.constant 0 : i32
    return %c0_i32, %c0_i32_0 : i32, i32
  }
  func.func @transform_3(%arg0: i32) -> (i32, i32, i32) {
    %c0_i32 = arith.constant 0 : i32
    %c0_i32_0 = arith.constant 0 : i32
    %c0_i32_1 = arith.constant 0 : i32
    %c0_i32_2 = arith.constant 0 : i32
    return %c0_i32, %c0_i32_0, %c0_i32_1 : i32, i32, i32
  }
  func.func @transform_4(%arg0: i32) -> (i32, i32, i32) {
    %c0_i32 = arith.constant 0 : i32
    %c0_i32_0 = arith.constant 0 : i32
    %c0_i32_1 = arith.constant 0 : i32
    %c0_i32_2 = arith.constant 0 : i32
    return %c0_i32, %c0_i32_0, %c0_i32_1 : i32, i32, i32
  }
  func.func @transform_5(%arg0: i32) -> (i32, i32) {
    %c0_i32 = arith.constant 0 : i32
    %c0_i32_0 = arith.constant 0 : i32
    %c0_i32_1 = arith.constant 0 : i32
    return %c0_i32, %c0_i32_0 : i32, i32
  }
  func.func @transform_6(%arg0: i32) -> (i32, i32) {
    %c0_i32 = arith.constant 0 : i32
    %c0_i32_0 = arith.constant 0 : i32
    %c0_i32_1 = arith.constant 0 : i32
    return %c0_i32, %c0_i32_0 : i32, i32
  }
  func.func @transform_7(%arg0: i32) -> (i32, i32) {
    %c0_i32 = arith.constant 0 : i32
    %c0_i32_0 = arith.constant 0 : i32
    %c0_i32_1 = arith.constant 0 : i32
    return %c0_i32, %c0_i32_0 : i32, i32
  }
  func.func @transform_8(%arg0: i32) -> (i32, i32) {
    %c0_i32 = arith.constant 0 : i32
    %c0_i32_0 = arith.constant 0 : i32
    %c0_i32_1 = arith.constant 0 : i32
    return %c0_i32, %c0_i32_0 : i32, i32
  }
  func.func @transform_9(%arg0: i32) -> (i32, i32) {
    %c0_i32 = arith.constant 0 : i32
    %c0_i32_0 = arith.constant 0 : i32
    return %arg0, %c0_i32 : i32, i32
  }
}

</mosaic_0001>

<bundles_post_ra>
// kernel: pixelcnn_forward.1
= control target key start
LH: loop header
LB: loop body
LE: loop exit
PB: predicated region body
PF: predicated region fallthrough
CT: control target
= control target key end

     0   :  { %s8420_s30 = smov 0   ;;  %s11262_s0 = inlined_call_operand.vmem [shape: bf16[512,128], index: 0, kind: input, shape index: {}]   ;;  %s11263_s1 = inlined_call_operand.vmem [shape: bf16[128,128], index: 1, kind: input, shape index: {}]   ;;  %s11264_s2 = inlined_call_operand.vmem [shape: f32[1,128], index: 2, kind: input, shape index: {}]   ;;  %s11265_s3 = inlined_call_operand.vmem [shape: bf16[15,640,128], index: 3, kind: input, shape index: {}]   ;;  %s11266_s4 = inlined_call_operand.vmem [shape: f32[15,1,128], index: 4, kind: input, shape index: {}]   ;;  %s11267_s5 = inlined_call_operand.vmem [shape: bf16[128,1024], index: 5, kind: input, shape index: {}]   ;;  %s11268_s6 = inlined_call_operand.vmem [shape: f32[1,1024], index: 6, kind: input, shape index: {}]   ;;  %s11269_s7 = inlined_call_operand.vmem [shape: bf16[1024,256], index: 7, kind: input, shape index: {}]   ;;  %s11270_s8 = inlined_call_operand.vmem [shape: f32[1,256], index: 8, kind: input, shape index: {}]   ;;  %s11271_s9 = inlined_call_operand.vmem [shape: f32[512,256], index: 9, kind: output, shape index: {}]  }
   0x1 LB: > { %s6835_s10 = sadd.s32 4294967295, %s8363_s30   ;;  %p6839_p0 = scmp.ge.s32.totalorder %s8363_s30, 1  ;;  %s8363_s30 = sphi %s8420_s30, %s19_s30  }
   0x2   : > { %p288_p1 = scmp.lt.s32.totalorder %s8363_s30, 3 }
   0x4   : > { %p289_p2 = pnand %p6839_p0, %p288_p1 }
   0x6   : > { %292 = sbr.rel (%p289_p2) target bundleno = 1702 (0x6a6), region = 56 }
   0xd   : > { %vm339_vm0 = vcmask 1043459   ;;  %vm340_vm1 = vsmask.f32 7950  ;;  %v342_v0 = vld [vmem:[#allocation2] sm:$0x8]  ;;  %vm393_vm2 = vcmask 1040384  }
   0xe   : > { %vm8428_vm3 = vmand %vm339_vm0, %vm340_vm1  ;;  %v345_v2 = vld [vmem:[#allocation2 + $0x10] sm:$0x8]  ;;  %v348_v3 = vld [vmem:[#allocation2 + $0x20] sm:$0x8]  ;;  %vm394_vm4 = vsmask.f32 256 }
   0xf   : > { %v343_v4 = vsel %vm8428_vm3, 0, %v342_v0  ;;  %v346_v5 = vsel %vm8428_vm3, 0, %v345_v2  ;;  %v349_v6 = vsel %vm8428_vm3, 0, %v348_v3  ;;  %v351_v7 = vld [vmem:[#allocation2 + $0x30] sm:$0x8]  ;;  %v11272_v11 = vmov 0   ;;  %vm8463_vm5 = vmand %vm393_vm2, %vm394_vm4 }
  0x10   : > { %344 = vst [vmem:[#allocation2] sm:$0x8] %v343_v4  ;;  %347 = vst [vmem:[#allocation2 + $0x10] sm:$0x8] %v346_v5  ;;  %v352_v8 = vsel %vm8428_vm3, 0, %v351_v7  ;;  %v8037_v12 = vld [vmem:[%s11263_s1] sm:$0xff]  }
  0x11   : > { %350 = vst [vmem:[#allocation2 + $0x20] sm:$0x8] %v349_v6  ;;  %v354_v9 = vld [vmem:[#allocation2 + $0x40] sm:$0x8]  ;;  %v357_v10 = vld [vmem:[#allocation2 + $0x50] sm:$0x8]  ;;  %7636 = vmatprep.subr.bf16.mxu0 %v8037_v12  ;;  %7732 = vmatprep.subr.bf16.mxu1 %v8037_v12 }
  0x12   : > { %447 = vst [vmem:[#allocation2 + $0x4] sm:$0xf] %v11272_v11  ;;  %448 = vst [vmem:[#allocation2 + $0x8] sm:$0xf] %v11272_v11  ;;  %v355_v13 = vsel %vm8428_vm3, 0, %v354_v9  ;;  %v358_v14 = vsel %vm8428_vm3, 0, %v357_v10  ;;  %7637 = vmatpush3.bf16.msra.mxu0 %v8037_v12  ;;  %7740 = vmatpush3.bf16.msra.mxu1 %v8037_v12 }
  0x13   : > { %353 = vst [vmem:[#allocation2 + $0x30] sm:$0x8] %v352_v8  ;;  %v360_v15 = vld [vmem:[#allocation2 + $0x60] sm:$0x8]  ;;  %v363_v16 = vld [vmem:[#allocation2 + $0x70] sm:$0x8] }
  0x14   : > { %356 = vst [vmem:[#allocation2 + $0x40] sm:$0x8] %v355_v13  ;;  %359 = vst [vmem:[#allocation2 + $0x50] sm:$0x8] %v358_v14  ;;  %v361_v17 = vsel %vm8428_vm3, 0, %v360_v15  ;;  %v364_v18 = vsel %vm8428_vm3, 0, %v363_v16 }
  0x15   : > { %v366_v19 = vld [vmem:[#allocation2 + $0x80] sm:$0x8]  ;;  %v369_v20 = vld [vmem:[#allocation2 + $0x90] sm:$0x8]  ;;  %362 = vst [vmem:[#allocation2 + $0x60] sm:$0x8] %v361_v17 }
  0x16   : > { %365 = vst [vmem:[#allocation2 + $0x70] sm:$0x8] %v364_v18  ;;  %v367_v21 = vsel %vm8428_vm3, 0, %v366_v19  ;;  %v370_v22 = vsel %vm8428_vm3, 0, %v369_v20  ;;  %v372_v23 = vld [vmem:[#allocation2 + $0xa0] sm:$0x8] }
  0x17   : > { %v375_v24 = vld [vmem:[#allocation2 + $0xb0] sm:$0x8]  ;;  %368 = vst [vmem:[#allocation2 + $0x80] sm:$0x8] %v367_v21  ;;  %371 = vst [vmem:[#allocation2 + $0x90] sm:$0x8] %v370_v22 }
  0x18   : > { %v373_v25 = vsel %vm8428_vm3, 0, %v372_v23  ;;  %v376_v26 = vsel %vm8428_vm3, 0, %v375_v24  ;;  %v378_v27 = vld [vmem:[#allocation2 + $0xc0] sm:$0x8]  ;;  %v381_v28 = vld [vmem:[#allocation2 + $0xd0] sm:$0x8] }
  0x19   : > { %374 = vst [vmem:[#allocation2 + $0xa0] sm:$0x8] %v373_v25  ;;  %377 = vst [vmem:[#allocation2 + $0xb0] sm:$0x8] %v376_v26  ;;  %v379_v30 = vsel %vm8428_vm3, 0, %v378_v27  ;;  %v382_v31 = vsel %vm8428_vm3, 0, %v381_v28 }
  0x1a   : > { %v384_v32 = vld [vmem:[#allocation2 + $0xe0] sm:$0x8]  ;;  %v387_v33 = vld [vmem:[#allocation2 + $0xf0] sm:$0x8]  ;;  %380 = vst [vmem:[#allocation2 + $0xc0] sm:$0x8] %v379_v30 }
  0x1b   : > { %383 = vst [vmem:[#allocation2 + $0xd0] sm:$0x8] %v382_v31  ;;  %v385_v34 = vsel %vm8428_vm3, 0, %v384_v32  ;;  %v388_v35 = vsel %vm8428_vm3, 0, %v387_v33  ;;  %v390_v36 = vld [vmem:[#allocation2 + $0x100] sm:$0x8] }
  0x1c   : > { %v396_v37 = vld [vmem:[#allocation2 + $0xc] sm:$0x1]  ;;  %386 = vst [vmem:[#allocation2 + $0xe0] sm:$0x8] %v385_v34  ;;  %389 = vst [vmem:[#allocation2 + $0xf0] sm:$0x8] %v388_v35 }
  0x1d   : > { %v391_v38 = vsel %vm8428_vm3, 0, %v390_v36  ;;  %v397_v39 = vsel %vm8463_vm5, 0, %v396_v37  ;;  %v399_v40 = vld [vmem:[#allocation2 + $0x1c] sm:$0x1]  ;;  %v402_v41 = vld [vmem:[#allocation2 + $0x2c] sm:$0x1] }
  0x1e   : > { %392 = vst [vmem:[#allocation2 + $0x100] sm:$0x8] %v391_v38  ;;  %398 = vst [vmem:[#allocation2 + $0xc] sm:$0x1] %v397_v39  ;;  %v400_v42 = vsel %vm8463_vm5, 0, %v399_v40  ;;  %v403_v43 = vsel %vm8463_vm5, 0, %v402_v41 }
  0x1f   : > { %v405_v44 = vld [vmem:[#allocation2 + $0x3c] sm:$0x1]  ;;  %v408_v45 = vld [vmem:[#allocation2 + $0x4c] sm:$0x1]  ;;  %401 = vst [vmem:[#allocation2 + $0x1c] sm:$0x1] %v400_v42 }
  0x20   : > { %404 = vst [vmem:[#allocation2 + $0x2c] sm:$0x1] %v403_v43  ;;  %v406_v46 = vsel %vm8463_vm5, 0, %v405_v44  ;;  %v409_v47 = vsel %vm8463_vm5, 0, %v408_v45  ;;  %v411_v48 = vld [vmem:[#allocation2 + $0x5c] sm:$0x1] }
  0x21   : > { %v414_v49 = vld [vmem:[#allocation2 + $0x6c] sm:$0x1]  ;;  %407 = vst [vmem:[#allocation2 + $0x3c] sm:$0x1] %v406_v46  ;;  %410 = vst [vmem:[#allocation2 + $0x4c] sm:$0x1] %v409_v47 }
  0x22   : > { %v412_v50 = vsel %vm8463_vm5, 0, %v411_v48  ;;  %v415_v51 = vsel %vm8463_vm5, 0, %v414_v49  ;;  %v417_v52 = vld [vmem:[#allocation2 + $0x7c] sm:$0x1]  ;;  %v420_v53 = vld [vmem:[#allocation2 + $0x8c] sm:$0x1] }
  0x23   : > { %413 = vst [vmem:[#allocation2 + $0x5c] sm:$0x1] %v412_v50  ;;  %416 = vst [vmem:[#allocation2 + $0x6c] sm:$0x1] %v415_v51  ;;  %v418_v54 = vsel %vm8463_vm5, 0, %v417_v52  ;;  %v421_v55 = vsel %vm8463_vm5, 0, %v420_v53 }
  0x24   : > { %v423_v56 = vld [vmem:[#allocation2 + $0x9c] sm:$0x1]  ;;  %v426_v57 = vld [vmem:[#allocation2 + $0xac] sm:$0x1]  ;;  %419 = vst [vmem:[#allocation2 + $0x7c] sm:$0x1] %v418_v54 }
  0x25   : > { %422 = vst [vmem:[#allocation2 + $0x8c] sm:$0x1] %v421_v55  ;;  %v424_v58 = vsel %vm8463_vm5, 0, %v423_v56  ;;  %v427_v59 = vsel %vm8463_vm5, 0, %v426_v57  ;;  %v429_v60 = vld [vmem:[#allocation2 + $0xbc] sm:$0x1] }
  0x26   : > { %v432_v61 = vld [vmem:[#allocation2 + $0xcc] sm:$0x1]  ;;  %425 = vst [vmem:[#allocation2 + $0x9c] sm:$0x1] %v424_v58  ;;  %428 = vst [vmem:[#allocation2 + $0xac] sm:$0x1] %v427_v59 }
  0x27   : > { %v430_v62 = vsel %vm8463_vm5, 0, %v429_v60  ;;  %v433_v63 = vsel %vm8463_vm5, 0, %v432_v61  ;;  %v435_v0 = vld [vmem:[#allocation2 + $0xdc] sm:$0x1]  ;;  %v438_v1 = vld [vmem:[#allocation2 + $0xec] sm:$0x1] }
  0x28   : > { %431 = vst [vmem:[#allocation2 + $0xbc] sm:$0x1] %v430_v62  ;;  %434 = vst [vmem:[#allocation2 + $0xcc] sm:$0x1] %v433_v63  ;;  %v436_v2 = vsel %vm8463_vm5, 0, %v435_v0  ;;  %v439_v3 = vsel %vm8463_vm5, 0, %v438_v1 }
  0x29   : > { %v441_v4 = vld [vmem:[#allocation2 + $0xfc] sm:$0x1]  ;;  %v444_v5 = vld [vmem:[#allocation2 + $0x10c] sm:$0x1]  ;;  %437 = vst [vmem:[#allocation2 + $0xdc] sm:$0x1] %v436_v2 }
  0x2a   : > { %440 = vst [vmem:[#allocation2 + $0xec] sm:$0x1] %v439_v3  ;;  %v442_v6 = vsel %vm8463_vm5, 0, %v441_v4  ;;  %v445_v7 = vsel %vm8463_vm5, 0, %v444_v5  ;;  %v8038_v8 = vld [vmem:[%s11263_s1 + $0x8] sm:$0xff]   ;;  %s6840_s15 = sshll.u32 %s6835_s10, 5 }
  0x2b   : > { %443 = vst [vmem:[#allocation2 + $0xfc] sm:$0x1] %v442_v6  ;;  %446 = vst [vmem:[#allocation2 + $0x10c] sm:$0x1] %v445_v7  ;;  %v8039_v9 = vld [vmem:[%s11263_s1 + $0x10] sm:$0xff]   ;;  %p326_p3 = scmp.lt.s32.totalorder %s6840_s15, 63  ;;  %7638 = vmatprep.subr.bf16.mxu0 %v8038_v8  ;;  %7733 = vmatprep.subr.bf16.mxu1 %v8038_v8 }
  0x2c   : > { %7639 = vmatpush3.bf16.msra.mxu0 %v8038_v8  ;;  %7741 = vmatpush3.bf16.msra.mxu1 %v8038_v8  ;;  %v8040_v10 = vld [vmem:[%s11263_s1 + $0x18] sm:$0xff]   ;;  %v8041_v12 = vld [vmem:[%s11263_s1 + $0x20] sm:$0xff]   ;;  %v8042_v15 = vld [vmem:[%s11263_s1 + $0x28] sm:$0xff]   ;;  %s8597_s18 = smov 0  }
  0x2d   : > { %s11419_s15 = smov (!%p326_p3, %s6840_s15), 63  ;;  %7640 = vmatprep.subr.bf16.mxu0 %v8039_v9  ;;  %7734 = vmatprep.subr.bf16.mxu1 %v8039_v9  ;;  %v8043_v16 = vld [vmem:[%s11263_s1 + $0x30] sm:$0xff]   ;;  %v8044_v17 = vld [vmem:[%s11263_s1 + $0x38] sm:$0xff]   ;;  %v8563_v32 = vld [vmem:[%s11264_s2] ss:$0 sm:$0xff] }
  0x2e   : > { %s6841_s20 = sshll.u32 %s11419_s15, 2  ;;  %s7298_s26 = sshll.u32 %s11419_s15, 4 }
  0x2f   : > { %s8528_s25 = scalar_lea.vmem %s11262_s0, %s6841_s20  ;;  %s8533_s29 = scalar_lea.vmem %s11271_s9, %s7298_s26 }
  0x30   : > { %7641 = vmatpush3.bf16.msra.mxu0 %v8039_v9  ;;  %7742 = vmatpush3.bf16.msra.mxu1 %v8039_v9  ;;  %v8045_v13 = vld [vmem:[%s8528_s25] sm:$0xff]   ;;  %v8047_v18 = vld [vmem:[%s8528_s25 + $0x8] sm:$0xff]   ;;  %v8049_v20 = vld [vmem:[%s8528_s25 + $0x10] sm:$0xff]  }
  0x31   : > { %7642 = vmatprep.subr.bf16.mxu0 %v8040_v10  ;;  %7735 = vmatprep.subr.bf16.mxu1 %v8040_v10  ;;  %v8046_v14 = vld [vmem:[%s8528_s25 + $0x40] sm:$0xff]   ;;  %v8048_v19 = vld [vmem:[%s8528_s25 + $0x48] sm:$0xff]   ;;  %v8050_v21 = vld [vmem:[%s8528_s25 + $0x50] sm:$0xff]  }
  0x32   : > { %7652 = vmatprep.mubr.bf16.mxu0 %v8045_v13  ;;  %7668 = vmatprep.mubr.bf16.mxu1 %v8046_v14  ;;  %v8051_v22 = vld [vmem:[%s8528_s25 + $0x18] sm:$0xff]   ;;  %v8053_v24 = vld [vmem:[%s8528_s25 + $0x20] sm:$0xff]   ;;  %v8055_v26 = vld [vmem:[%s8528_s25 + $0x28] sm:$0xff]  }
  0x33   : > { %v8052_v23 = vld [vmem:[%s8528_s25 + $0x58] sm:$0xff]   ;;  %v8054_v25 = vld [vmem:[%s8528_s25 + $0x60] sm:$0xff]   ;;  %v8056_v27 = vld [vmem:[%s8528_s25 + $0x68] sm:$0xff]  }
  0x34   : > { %7643 = vmatpush3.bf16.msra.mxu0 %v8040_v10  ;;  %7743 = vmatpush3.bf16.msra.mxu1 %v8040_v10  ;;  %v8057_v28 = vld [vmem:[%s8528_s25 + $0x30] sm:$0xff]   ;;  %v8059_v30 = vld [vmem:[%s8528_s25 + $0x38] sm:$0xff]  }
  0x35   : > { %7644 = vmatprep.subr.bf16.mxu0 %v8041_v12  ;;  %7736 = vmatprep.subr.bf16.mxu1 %v8041_v12  ;;  %v8058_v29 = vld [vmem:[%s8528_s25 + $0x70] sm:$0xff]   ;;  %v8060_v31 = vld [vmem:[%s8528_s25 + $0x78] sm:$0xff]  }
  0x38   : > { %7645 = vmatpush3.bf16.msra.mxu0 %v8041_v12  ;;  %7744 = vmatpush3.bf16.msra.mxu1 %v8041_v12 }
  0x39   : > { %7646 = vmatprep.subr.bf16.mxu0 %v8042_v15  ;;  %7737 = vmatprep.subr.bf16.mxu1 %v8042_v15 }
  0x3c   : > { %7647 = vmatpush3.bf16.msra.mxu0 %v8042_v15  ;;  %7745 = vmatpush3.bf16.msra.mxu1 %v8042_v15 }
  0x3d   : > { %7648 = vmatprep.subr.bf16.mxu0 %v8043_v16  ;;  %7738 = vmatprep.subr.bf16.mxu1 %v8043_v16 }
  0x40   : > { %7649 = vmatpush3.bf16.msra.mxu0 %v8043_v16  ;;  %7746 = vmatpush3.bf16.msra.mxu1 %v8043_v16 }
  0x41   : > { %7650 = vmatprep.subr.bf16.mxu0 %v8044_v17  ;;  %7739 = vmatprep.subr.bf16.mxu1 %v8044_v17 }
  0x44   : > { %7651 = vmatpush3.bf16.msra.mxu0 %v8044_v17  ;;  %7747 = vmatpush3.bf16.msra.mxu1 %v8044_v17 }
  0x47   : > { %7653 = vmatmul.mubr.bf16.vlgmr.msra.gmra.mrb[0].mxu0 %v8047_v18  ;;  %7669 = vmatmul.mubr.bf16.vlgmr.msra.gmra.mrb[0].mxu1 %v8048_v19 }
  0x48   : > { %7656 = vmatprep.mubr.bf16.mxu0 %v8049_v20  ;;  %7672 = vmatprep.mubr.bf16.mxu1 %v8050_v21 }
  0x4f   : > { %7657 = vmatmul.mubr.bf16.gmra.mrb[4].mxu0 %v8051_v22  ;;  %7673 = vmatmul.mubr.bf16.gmra.mrb[4].mxu1 %v8052_v23 }
  0x50   : > { %7660 = vmatprep.mubr.bf16.mxu0 %v8053_v24  ;;  %7676 = vmatprep.mubr.bf16.mxu1 %v8054_v25 }
  0x57   : > { %7661 = vmatmul.mubr.bf16.gmra.mrb[8].mxu0 %v8055_v26  ;;  %7677 = vmatmul.mubr.bf16.gmra.mrb[8].mxu1 %v8056_v27 }
  0x58   : > { %7664 = vmatprep.mubr.bf16.mxu0 %v8057_v28  ;;  %7680 = vmatprep.mubr.bf16.mxu1 %v8058_v29 }
  0x5f   : > { %7665 = vmatmul.mubr.bf16.gmra.mrb[12].mxu0 %v8059_v30  ;;  %7681 = vmatmul.mubr.bf16.gmra.mrb[12].mxu1 %v8060_v31 }
 0x11a   : > { %v7654_v33 = vpop.f32.mrb[0].mxu0  ;;  %v7670_v34 = vpop.f32.mrb[0].mxu1 }
 0x11b   : > { %v691_v35 = vadd.f32 %v7654_v33, %v8563_v32  ;;  %v755_v36 = vadd.f32 %v7670_v34, %v8563_v32  ;;  %v682_v37 = vpop.f32.mrb[1].mxu0  ;;  %v746_v38 = vpop.f32.mrb[1].mxu1 }
 0x11c   : > { %v683_v39 = vadd.f32 %v8563_v32, %v682_v37  ;;  %v747_v40 = vadd.f32 %v8563_v32, %v746_v38  ;;  %v7655_v41 = vpop.f32.mrb[2].mxu0  ;;  %v7671_v42 = vpop.f32.mrb[2].mxu1 }
 0x11d   : > { %v811_v43 = vmax.f32 %v691_v35, 0.0  ;;  %v827_v44 = vmax.f32 %v755_v36, 0.0  ;;  %v694_v45 = vadd.f32 %v7655_v41, %v8563_v32  ;;  %v758_v46 = vadd.f32 %v7671_v42, %v8563_v32  ;;  %v685_v47 = vpop.f32.mrb[3].mxu0  ;;  %v749_v48 = vpop.f32.mrb[3].mxu1 }
 0x11e   : > { %v809_v49 = vmax.f32 %v683_v39, 0.0  ;;  %v825_v50 = vmax.f32 %v747_v40, 0.0  ;;  %v686_v51 = vadd.f32 %v8563_v32, %v685_v47  ;;  %v750_v52 = vadd.f32 %v8563_v32, %v749_v48 }
 0x11f   : > { %v7301_v53 = vpack.c.bf16 %v811_v43, %v811_v43  ;;  %v7317_v54 = vpack.c.bf16 %v827_v44, %v827_v44  ;;  %v812_v55 = vmax.f32 %v694_v45, 0.0  ;;  %v828_v56 = vmax.f32 %v758_v46, 0.0 }
 0x120   : > { %v7299_v57 = vpack.c.bf16 %v809_v49, %v809_v49  ;;  %v7315_v58 = vpack.c.bf16 %v825_v50, %v825_v50  ;;  %v810_v59 = vmax.f32 %v686_v51, 0.0  ;;  %v826_v60 = vmax.f32 %v750_v52, 0.0 }
 0x121   : > { %972 = vst [vmem:[#allocation2 + $0x24] sm:$0xf] %v7301_v53  ;;  %988 = vst [vmem:[#allocation2 + $0xa4] sm:$0xf] %v7317_v54  ;;  %v7302_v61 = vpack.c.bf16 %v812_v55, %v812_v55  ;;  %v7318_v62 = vpack.c.bf16 %v828_v56, %v828_v56 }
 0x122   : > { %970 = vst [vmem:[#allocation2 + $0x14] sm:$0xf] %v7299_v57  ;;  %986 = vst [vmem:[#allocation2 + $0x94] sm:$0xf] %v7315_v58  ;;  %v7300_v63 = vpack.c.bf16 %v810_v59, %v810_v59  ;;  %v7316_v0 = vpack.c.bf16 %v826_v60, %v826_v60  ;;  %v7658_v1 = vpop.f32.mrb[4].mxu0  ;;  %v7674_v2 = vpop.f32.mrb[4].mxu1 }
 0x123   : > { %973 = vst [vmem:[#allocation2 + $0x28] sm:$0xf] %v7302_v61  ;;  %989 = vst [vmem:[#allocation2 + $0xa8] sm:$0xf] %v7318_v62  ;;  %v707_v3 = vadd.f32 %v7658_v1, %v8563_v32  ;;  %v771_v4 = vadd.f32 %v7674_v2, %v8563_v32  ;;  %v698_v5 = vpop.f32.mrb[5].mxu0  ;;  %v762_v6 = vpop.f32.mrb[5].mxu1 }
 0x124   : > { %971 = vst [vmem:[#allocation2 + $0x18] sm:$0xf] %v7300_v63  ;;  %987 = vst [vmem:[#allocation2 + $0x98] sm:$0xf] %v7316_v0  ;;  %v699_v7 = vadd.f32 %v8563_v32, %v698_v5  ;;  %v763_v8 = vadd.f32 %v8563_v32, %v762_v6  ;;  %v7659_v9 = vpop.f32.mrb[6].mxu0  ;;  %v7675_v10 = vpop.f32.mrb[6].mxu1 }
 0x125   : > { %v815_v12 = vmax.f32 %v707_v3, 0.0  ;;  %v831_v13 = vmax.f32 %v771_v4, 0.0  ;;  %v710_v14 = vadd.f32 %v7659_v9, %v8563_v32  ;;  %v774_v15 = vadd.f32 %v7675_v10, %v8563_v32  ;;  %v701_v16 = vpop.f32.mrb[7].mxu0  ;;  %v765_v17 = vpop.f32.mrb[7].mxu1 }
 0x126   : > { %v813_v18 = vmax.f32 %v699_v7, 0.0  ;;  %v829_v19 = vmax.f32 %v763_v8, 0.0  ;;  %v702_v20 = vadd.f32 %v8563_v32, %v701_v16  ;;  %v766_v21 = vadd.f32 %v8563_v32, %v765_v17 }
 0x127   : > { %v7305_v22 = vpack.c.bf16 %v815_v12, %v815_v12  ;;  %v7321_v23 = vpack.c.bf16 %v831_v13, %v831_v13  ;;  %v816_v24 = vmax.f32 %v710_v14, 0.0  ;;  %v832_v25 = vmax.f32 %v774_v15, 0.0 }
 0x128   : > { %v7303_v26 = vpack.c.bf16 %v813_v18, %v813_v18  ;;  %v7319_v27 = vpack.c.bf16 %v829_v19, %v829_v19  ;;  %v814_v28 = vmax.f32 %v702_v20, 0.0  ;;  %v830_v29 = vmax.f32 %v766_v21, 0.0 }
 0x129   : > { %976 = vst [vmem:[#allocation2 + $0x44] sm:$0xf] %v7305_v22  ;;  %992 = vst [vmem:[#allocation2 + $0xc4] sm:$0xf] %v7321_v23  ;;  %v7306_v30 = vpack.c.bf16 %v816_v24, %v816_v24  ;;  %v7322_v31 = vpack.c.bf16 %v832_v25, %v832_v25 }
 0x12a   : > { %974 = vst [vmem:[#allocation2 + $0x34] sm:$0xf] %v7303_v26  ;;  %990 = vst [vmem:[#allocation2 + $0xb4] sm:$0xf] %v7319_v27  ;;  %v7304_v33 = vpack.c.bf16 %v814_v28, %v814_v28  ;;  %v7320_v34 = vpack.c.bf16 %v830_v29, %v830_v29  ;;  %v7662_v35 = vpop.f32.mrb[8].mxu0  ;;  %v7678_v36 = vpop.f32.mrb[8].mxu1 }
 0x12b   : > { %977 = vst [vmem:[#allocation2 + $0x48] sm:$0xf] %v7306_v30  ;;  %993 = vst [vmem:[#allocation2 + $0xc8] sm:$0xf] %v7322_v31  ;;  %v723_v37 = vadd.f32 %v7662_v35, %v8563_v32  ;;  %v787_v38 = vadd.f32 %v7678_v36, %v8563_v32  ;;  %v714_v39 = vpop.f32.mrb[9].mxu0  ;;  %v778_v40 = vpop.f32.mrb[9].mxu1 }
 0x12c   : > { %975 = vst [vmem:[#allocation2 + $0x38] sm:$0xf] %v7304_v33  ;;  %991 = vst [vmem:[#allocation2 + $0xb8] sm:$0xf] %v7320_v34  ;;  %v715_v41 = vadd.f32 %v8563_v32, %v714_v39  ;;  %v779_v42 = vadd.f32 %v8563_v32, %v778_v40  ;;  %v7663_v43 = vpop.f32.mrb[10].mxu0  ;;  %v7679_v44 = vpop.f32.mrb[10].mxu1 }
 0x12d   : > { %v819_v45 = vmax.f32 %v723_v37, 0.0  ;;  %v835_v46 = vmax.f32 %v787_v38, 0.0  ;;  %v726_v47 = vadd.f32 %v7663_v43, %v8563_v32  ;;  %v790_v48 = vadd.f32 %v7679_v44, %v8563_v32  ;;  %v717_v49 = vpop.f32.mrb[11].mxu0  ;;  %v781_v50 = vpop.f32.mrb[11].mxu1 }
 0x12e   : > { %v817_v51 = vmax.f32 %v715_v41, 0.0  ;;  %v833_v52 = vmax.f32 %v779_v42, 0.0  ;;  %v718_v53 = vadd.f32 %v8563_v32, %v717_v49  ;;  %v782_v54 = vadd.f32 %v8563_v32, %v781_v50 }
 0x12f   : > { %v7309_v55 = vpack.c.bf16 %v819_v45, %v819_v45  ;;  %v7325_v56 = vpack.c.bf16 %v835_v46, %v835_v46  ;;  %v820_v57 = vmax.f32 %v726_v47, 0.0  ;;  %v836_v58 = vmax.f32 %v790_v48, 0.0 }
 0x130   : > { %v7307_v59 = vpack.c.bf16 %v817_v51, %v817_v51  ;;  %v7323_v60 = vpack.c.bf16 %v833_v52, %v833_v52  ;;  %v818_v61 = vmax.f32 %v718_v53, 0.0  ;;  %v834_v62 = vmax.f32 %v782_v54, 0.0 }
 0x131   : > { %980 = vst [vmem:[#allocation2 + $0x64] sm:$0xf] %v7309_v55  ;;  %996 = vst [vmem:[#allocation2 + $0xe4] sm:$0xf] %v7325_v56  ;;  %v7310_v63 = vpack.c.bf16 %v820_v57, %v820_v57  ;;  %v7326_v0 = vpack.c.bf16 %v836_v58, %v836_v58 }
 0x132   : > { %978 = vst [vmem:[#allocation2 + $0x54] sm:$0xf] %v7307_v59  ;;  %994 = vst [vmem:[#allocation2 + $0xd4] sm:$0xf] %v7323_v60  ;;  %v7308_v1 = vpack.c.bf16 %v818_v61, %v818_v61  ;;  %v7324_v2 = vpack.c.bf16 %v834_v62, %v834_v62  ;;  %v7666_v3 = vpop.f32.mrb[12].mxu0  ;;  %v7682_v4 = vpop.f32.mrb[12].mxu1 }
 0x133   : > { %981 = vst [vmem:[#allocation2 + $0x68] sm:$0xf] %v7310_v63  ;;  %997 = vst [vmem:[#allocation2 + $0xe8] sm:$0xf] %v7326_v0  ;;  %v739_v5 = vadd.f32 %v7666_v3, %v8563_v32  ;;  %v803_v6 = vadd.f32 %v7682_v4, %v8563_v32  ;;  %v730_v7 = vpop.f32.mrb[13].mxu0  ;;  %v794_v8 = vpop.f32.mrb[13].mxu1 }
 0x134   : > { %979 = vst [vmem:[#allocation2 + $0x58] sm:$0xf] %v7308_v1  ;;  %995 = vst [vmem:[#allocation2 + $0xd8] sm:$0xf] %v7324_v2  ;;  %v731_v9 = vadd.f32 %v8563_v32, %v730_v7  ;;  %v795_v10 = vadd.f32 %v8563_v32, %v794_v8  ;;  %v7667_v12 = vpop.f32.mrb[14].mxu0  ;;  %v7683_v13 = vpop.f32.mrb[14].mxu1 }
 0x135   : > { %v823_v14 = vmax.f32 %v739_v5, 0.0  ;;  %v839_v15 = vmax.f32 %v803_v6, 0.0  ;;  %v742_v16 = vadd.f32 %v7667_v12, %v8563_v32  ;;  %v806_v17 = vadd.f32 %v7683_v13, %v8563_v32  ;;  %v733_v18 = vpop.f32.mrb[15].mxu0  ;;  %v797_v19 = vpop.f32.mrb[15].mxu1 }
 0x136   : > { %v821_v20 = vmax.f32 %v731_v9, 0.0  ;;  %v837_v21 = vmax.f32 %v795_v10, 0.0  ;;  %v734_v22 = vadd.f32 %v8563_v32, %v733_v18  ;;  %v798_v23 = vadd.f32 %v8563_v32, %v797_v19 }
 0x137   : > { %v7313_v24 = vpack.c.bf16 %v823_v14, %v823_v14  ;;  %v7329_v25 = vpack.c.bf16 %v839_v15, %v839_v15  ;;  %v824_v26 = vmax.f32 %v742_v16, 0.0  ;;  %v840_v27 = vmax.f32 %v806_v17, 0.0 }
 0x138   : > { %v7311_v28 = vpack.c.bf16 %v821_v20, %v821_v20  ;;  %v7327_v29 = vpack.c.bf16 %v837_v21, %v837_v21  ;;  %v822_v30 = vmax.f32 %v734_v22, 0.0  ;;  %v838_v31 = vmax.f32 %v798_v23, 0.0 }
 0x139   : > { %984 = vst [vmem:[#allocation2 + $0x84] sm:$0xf] %v7313_v24  ;;  %1000 = vst [vmem:[#allocation2 + $0x104] sm:$0xf] %v7329_v25  ;;  %v7314_v33 = vpack.c.bf16 %v824_v26, %v824_v26  ;;  %v7330_v34 = vpack.c.bf16 %v840_v27, %v840_v27 }
 0x13a   : > { %982 = vst [vmem:[#allocation2 + $0x74] sm:$0xf] %v7311_v28  ;;  %998 = vst [vmem:[#allocation2 + $0xf4] sm:$0xf] %v7327_v29  ;;  %v7312_v35 = vpack.c.bf16 %v822_v30, %v822_v30  ;;  %v7328_v36 = vpack.c.bf16 %v838_v31, %v838_v31 }
 0x13b   : > { %985 = vst [vmem:[#allocation2 + $0x88] sm:$0xf] %v7314_v33  ;;  %1001 = vst [vmem:[#allocation2 + $0x108] sm:$0xf] %v7330_v34 }
 0x13c   : > { %983 = vst [vmem:[#allocation2 + $0x78] sm:$0xf] %v7312_v35  ;;  %999 = vst [vmem:[#allocation2 + $0xf8] sm:$0xf] %v7328_v36 }
 0x13d LB: >> { %v8602_v32 = vld [vmem:[#allocation2 + $0x4] sm:$0xf]  ;;  %v8604_v37 = vld [vmem:[#allocation2 + $0x8] sm:$0xf]  ;;  %s7331_s19 = smul.u32 320, %s8367_s18  ;;  %s2520_s25 = scalar_lea.vmem %s11266_s4, %s8367_s18  ;;  %s8367_s18 = sphi %s8597_s18, %s1007_s18  }
 0x13e   : >> { %v6950_v38 = vcombine.low %v8602_v32, %v8604_v37  ;;  %v8614_v39 = vld [vmem:[#allocation2 + $0xc4] sm:$0xf]  ;;  %v8616_v40 = vld [vmem:[#allocation2 + $0xc8] sm:$0xf]  ;;  %v1064_v43 = vshrl.u32 %v8602_v32, 16  ;;  %v1067_v46 = vshll.u32 %v8602_v32, 16 }
 0x13f   : >> { %s8612_s22 = scalar_lea.vmem %s11265_s3, %s7331_s19  ;;  %v6962_v44 = vcombine.low %v8614_v39, %v8616_v40  ;;  %v1073_v48 = vshrl.u32 %v8604_v37, 16  ;;  %v1076_v50 = vshll.u32 %v8604_v37, 16  ;;  %v1328_v56 = vshrl.u32 %v8614_v39, 16  ;;  %v1008_v63 = vld [vmem:[#allocation2] sm:$0x8]  ;;  %s1007_s18 = sadd.s32 1, %s8367_s18  }
 0x140   : >> { %2800 = vmatprep.mubr.bf16.mxu0 %v6950_v38  ;;  %v8061_v41 = vld [vmem:[%s8612_s22 + $0x40] sm:$0xff]   ;;  %v8063_v45 = vld [vmem:[%s8612_s22 + $0x48] sm:$0xff]   ;;  %v8065_v49 = vld [vmem:[%s8612_s22 + $0x50] sm:$0xff]   ;;  %v1429_v51 = vrot.slane %v1064_v43, 4  ;;  %v1430_v52 = vrot.slane %v1067_v46, 5  ;;  %v8634_v58 = vrot.slane %v1064_v43, 7 }
 0x141   : >> { %v8062_v42 = vld [vmem:[%s8612_s22] sm:$0xff]   ;;  %7388 = vmatprep.subr.bf16.mxu0 %v8061_v41  ;;  %7748 = vmatprep.subr.bf16.mxu1 %v8061_v41  ;;  %v8064_v47 = vld [vmem:[%s8612_s22 + $0x8] sm:$0xff]   ;;  %v8629_v53 = vrot.slane %v1076_v50, 5  ;;  %v1435_v54 = vrot.slane %v1073_v48, 4  ;;  %v8066_v55 = vld [vmem:[%s8612_s22 + $0x10] sm:$0xff]   ;;  %v1075_v60 = vrot.slane %v1073_v48, 7 }
 0x142   : >> { %7389 = vmatpush3.bf16.msra.mxu0 %v8062_v42  ;;  %7756 = vmatpush3.bf16.msra.mxu1 %v8062_v42  ;;  %v8067_v57 = vld [vmem:[%s8612_s22 + $0x58] sm:$0xff]   ;;  %v1431_v59 = vor.u32 %v1430_v52, %v1429_v51  ;;  %v1337_v62 = vshrl.u32 %v8616_v40, 16  ;;  %v8639_v1 = vrot.slane %v1328_v56, 7  ;;  %v1044_v2 = vld [vmem:[#allocation2 + $0xc0] sm:$0x8]  ;;  %v1331_v4 = vshll.u32 %v8614_v39, 16 }
 0x143   : >> { %7390 = vmatprep.subr.bf16.mxu0 %v8063_v45  ;;  %7749 = vmatprep.subr.bf16.mxu1 %v8063_v45  ;;  %v1436_v61 = vor.u32 %v1435_v54, %v8629_v53  ;;  %v8068_v0 = vld [vmem:[%s8612_s22 + $0x18] sm:$0xff]   ;;  %v8069_v3 = vld [vmem:[%s8612_s22 + $0x60] sm:$0xff]   ;;  %v1071_v5 = vrot.slane %v8634_v58, 4  ;;  %v1059_v10 = vshrl.u32 %v1008_v63, 16  ;;  %v8071_v12 = vld [vmem:[%s8612_s22 + $0x68] sm:$0xff]   ;;  %v1323_v13 = vshrl.u32 %v1044_v2, 16 }
 0x144   : >> { %2896 = vmatprep.mubr.bf16.mxu1 %v6962_v44  ;;  %v8644_v6 = vrot.slane %v1431_v59, 4  ;;  %v1339_v8 = vrot.slane %v1337_v62, 7  ;;  %v8070_v9 = vld [vmem:[%s8612_s22 + $0x20] sm:$0xff]   ;;  %v11286_v14 = vshll.u32 %v8616_v40, 16  ;;  %v8651_v15 = vrot.slane %v1328_v56, 4  ;;  %v8072_v16 = vld [vmem:[%s8612_s22 + $0x28] sm:$0xff]  }
 0x145   : >> { %v8646_v7 = vrot.slane %v1436_v61, 4  ;;  %vm1056_vm6 = vsmask.f32 4368  ;;  %v8654_v17 = vrot.slane %v1331_v4, 5  ;;  %v8073_v18 = vld [vmem:[%s8612_s22 + $0x70] sm:$0xff]   ;;  %v1069_v19 = vor.u32 %v1067_v46, %v8634_v58  ;;  %v8075_v39 = vld [vmem:[%s8612_s22 + $0x78] sm:$0xff]  }
 0x146   : >> { %7391 = vmatpush3.bf16.msra.mxu0 %v8064_v47  ;;  %7757 = vmatpush3.bf16.msra.mxu1 %v8064_v47  ;;  %v6902_v20 = vrot.slane %v1059_v10, 11  ;;  %v1078_v21 = vor.u32 %v1076_v50, %v1075_v60  ;;  %v8658_v22 = vrot.slane %v1337_v62, 4  ;;  %vm8661_vm7 = vmor %vm394_vm4, %vm1056_vm6  ;;  %v6914_v24 = vrot.slane %v1323_v13, 11  ;;  %v8074_v25 = vld [vmem:[%s8612_s22 + $0x30] sm:$0xff]   ;;  %v8672_v30 = vld [vmem:[#allocation2 + $0x18] sm:$0xf] }
 0x147   : >> { %7392 = vmatprep.subr.bf16.mxu0 %v8065_v49  ;;  %7750 = vmatprep.subr.bf16.mxu1 %v8065_v49  ;;  %v1335_v26 = vrot.slane %v8639_v1, 4  ;;  %v8667_v27 = vld [vmem:[#allocation2 + $0x14] sm:$0xf]  ;;  %v1333_v28 = vor.u32 %v1331_v4, %v8639_v1  ;;  %v1342_v29 = vor.u32 %v11286_v14, %v1339_v8  ;;  %v1095_v36 = vshrl.u32 %v8672_v30, 16  ;;  %v8681_v32 = vld [vmem:[#allocation2 + $0xd8] sm:$0xf] }
 0x148   : >> { %v1086_v31 = vshrl.u32 %v8667_v27, 16  ;;  %v8675_v33 = vld [vmem:[#allocation2 + $0xd4] sm:$0xf]  ;;  %v1089_v34 = vshll.u32 %v8667_v27, 16  ;;  %v1070_v35 = vsel %vm8661_vm7, %v6902_v20, %v1069_v19  ;;  %v1011_v38 = vld [vmem:[#allocation2 + $0x10] sm:$0x8]  ;;  %v1079_v41 = vsel %vm8661_vm7, %v1071_v5, %v1078_v21 }
 0x149   : >> { %v11285_v37 = vshrl.u32 %v8675_v33, 16  ;;  %v11282_v42 = vshrl.u32 %v8681_v32, 16  ;;  %v1081_v43 = vshrl.u32 %v1011_v38, 16  ;;  %v1047_v45 = vld [vmem:[#allocation2 + $0xd0] sm:$0x8]  ;;  %v1097_v46 = vrot.slane %v1095_v36, 7 }
 0x14a   : >> { %7393 = vmatpush3.bf16.msra.mxu0 %v8066_v55  ;;  %7758 = vmatpush3.bf16.msra.mxu1 %v8066_v55  ;;  %v1088_v44 = vrot.slane %v1086_v31, 7  ;;  %v1098_v47 = vshll.u32 %v8672_v30, 16  ;;  %v1345_v48 = vshrl.u32 %v1047_v45, 16  ;;  %v8076_v50 = vld [vmem:[%s8612_s22 + $0x38] sm:$0xff]   ;;  %v1334_v51 = vsel %vm8661_vm7, %v6914_v24, %v1333_v28  ;;  %v8079_v54 = vld [vmem:[%s8612_s22 + $0xc0] sm:$0xff]   ;;  %v8093_v45 = vld [vmem:[%s8612_s22 + $0x108] sm:$0xff]  }
 0x14b   : >> { %7394 = vmatprep.subr.bf16.mxu0 %v8067_v57  ;;  %7751 = vmatprep.subr.bf16.mxu1 %v8067_v57  ;;  %v1352_v49 = vrot.slane %v11285_v37, 7  ;;  %v1343_v52 = vsel %vm8661_vm7, %v1335_v26, %v1342_v29  ;;  %v8701_v55 = vrot.slane %v1081_v43, 11  ;;  %v11284_v56 = vshll.u32 %v8675_v33, 16  ;;  %v8082_v57 = vld [vmem:[%s8612_s22 + $0x100] sm:$0xff]   ;;  %v8738_v21 = vld [vmem:[#allocation2 + $0xe8] sm:$0xf] }
 0x14c   : >> { %v8707_v58 = vor.u32 %v1089_v34, %v1088_v44  ;;  %v1093_v59 = vrot.slane %v1088_v44, 4  ;;  %v8709_v60 = vrot.slane %v1345_v48, 11  ;;  %v1361_v61 = vrot.slane %v11282_v42, 7  ;;  %v8725_v10 = vld [vmem:[#allocation2 + $0x24] sm:$0xf]  ;;  %v8102_v11 = vld [vmem:[%s8612_s22 + $0x110] sm:$0xff]  }
 0x14d   : >> { %v1100_v62 = vor.u32 %v1098_v47, %v1097_v46  ;;  %v1355_v63 = vor.u32 %v11284_v56, %v1352_v49  ;;  %v11283_v1 = vshll.u32 %v8681_v32, 16  ;;  %v6934_v2 = vcombine.low %v1070_v35, %v1079_v41  ;;  %v8729_v13 = vld [vmem:[#allocation2 + $0xe4] sm:$0xf]  ;;  %v1014_v29 = vld [vmem:[#allocation2 + $0x20] sm:$0x8]  ;;  %p1004_p4 = scmp.ge.s32.totalorder %s1007_s18, 15  }
 0x14e   : >> { %7395 = vmatpush3.bf16.msra.mxu0 %v8068_v0  ;;  %7759 = vmatpush3.bf16.msra.mxu1 %v8068_v0  ;;  %v1357_v0 = vrot.slane %v1352_v49, 4  ;;  %v6946_v4 = vcombine.low %v1334_v51, %v1343_v52  ;;  %v6951_v5 = vcombine.low %v8667_v27, %v8672_v30  ;;  %v6963_v8 = vcombine.low %v8675_v33, %v8681_v32  ;;  %v1050_v38 = vld [vmem:[#allocation2 + $0xe0] sm:$0x8]  ;;  %v8083_v51 = vld [vmem:[%s8612_s22 + $0x88] sm:$0xff]   ;;  %v8882_v14 = vld [vmem:[#allocation2 + $0x54] sm:$0xf] }
 0x14f   : >> { %7396 = vmatprep.subr.bf16.mxu0 %v8069_v3  ;;  %7752 = vmatprep.subr.bf16.mxu1 %v8069_v3  ;;  %v8080_v3 = vld [vmem:[%s8612_s22 + $0x80] sm:$0xff]   ;;  %v1108_v19 = vshrl.u32 %v8725_v10, 16  ;;  %v11281_v24 = vshrl.u32 %v8729_v13, 16  ;;  %v1356_v26 = vsel %vm8661_vm7, %v8709_v60, %v1355_v63  ;;  %v11278_v28 = vshrl.u32 %v8738_v21, 16 }
 0x150   : >> { %v1111_v35 = vshll.u32 %v8725_v10, 16  ;;  %v1103_v41 = vshrl.u32 %v1014_v29, 16  ;;  %vm1426_vm8 = vsmask.f32 3328  ;;  %vm1427_vm9 = vsmask.f32 7440 }
 0x151   : >> { %v1110_v43 = vrot.slane %v1108_v19, 7  ;;  %v1367_v48 = vshrl.u32 %v1050_v38, 16  ;;  %v1374_v49 = vrot.slane %v11281_v24, 7  ;;  %v6964_v38 = vcombine.low %v8729_v13, %v8738_v21  ;;  %vm8817_vm10 = vmor %vm1426_vm8, %vm1427_vm9  ;;  %v8106_v24 = vld [vmem:[%s8612_s22 + $0x118] sm:$0xff]  }
 0x152   : >> { %7397 = vmatpush3.bf16.msra.mxu0 %v8070_v9  ;;  %7760 = vmatpush3.bf16.msra.mxu1 %v8070_v9  ;;  %v1364_v9 = vor.u32 %v11283_v1, %v1361_v61  ;;  %v6904_v52 = vrot.slane %v1103_v41, 11 }
 0x153   : >> { %7398 = vmatprep.subr.bf16.mxu0 %v8071_v12  ;;  %7753 = vmatprep.subr.bf16.mxu1 %v8071_v12  ;;  %v8727_v12 = vld [vmem:[#allocation2 + $0x28] sm:$0xf]  ;;  %v6916_v61 = vrot.slane %v1367_v48, 11  ;;  %v1379_v63 = vrot.slane %v1374_v49, 4 }
 0x154   : >> { %v1117_v20 = vshrl.u32 %v8727_v12, 16  ;;  %v1120_v46 = vshll.u32 %v8727_v12, 16 }
 0x156   : >> { %7399 = vmatpush3.bf16.msra.mxu0 %v8072_v16  ;;  %7761 = vmatpush3.bf16.msra.mxu1 %v8072_v16  ;;  %v8081_v16 = vld [vmem:[%s8612_s22 + $0xc8] sm:$0xff]   ;;  %v1119_v44 = vrot.slane %v1117_v20, 7 }
 0x157   : >> { %7400 = vmatprep.subr.bf16.mxu0 %v8073_v18  ;;  %7754 = vmatprep.subr.bf16.mxu1 %v8073_v18  ;;  %v1092_v18 = vsel %vm8661_vm7, %v8701_v55, %v8707_v58  ;;  %v1115_v55 = vrot.slane %v1110_v43, 4  ;;  %v1383_v58 = vrot.slane %v11278_v28, 7 }
 0x158   : >> { %v1122_v60 = vor.u32 %v1120_v46, %v1119_v44  ;;  %v8796_v44 = vld [vmem:[#allocation2 + $0xf8] sm:$0xf] }
 0x15a   : >> { %7401 = vmatpush3.bf16.msra.mxu0 %v8074_v25  ;;  %7762 = vmatpush3.bf16.msra.mxu1 %v8074_v25  ;;  %v1101_v25 = vsel %vm8661_vm7, %v1093_v59, %v1100_v62  ;;  %v8086_v59 = vld [vmem:[%s8612_s22 + $0xd0] sm:$0xff]  }
 0x15b   : >> { %7402 = vmatprep.subr.bf16.mxu0 %v8075_v39  ;;  %7755 = vmatprep.subr.bf16.mxu1 %v8075_v39  ;;  %v1365_v39 = vsel %vm8661_vm7, %v1357_v0, %v1364_v9  ;;  %v11279_v0 = vshll.u32 %v8738_v21, 16  ;;  %v8088_v9 = vld [vmem:[%s8612_s22 + $0xd8] sm:$0xff]  }
 0x15d   : >> { %v1386_v29 = vor.u32 %v11279_v0, %v1383_v58 }
 0x15e   : >> { %7403 = vmatpush3.bf16.msra.mxu0 %v8076_v50  ;;  %7763 = vmatpush3.bf16.msra.mxu1 %v8076_v50  ;;  %v11280_v50 = vshll.u32 %v8729_v13, 16 }
 0x15f   : >> { %7500 = vmatprep.subr.bf16.mxu1 %v8079_v54  ;;  %7684 = vmatprep.subr.bf16.mxu0 %v8082_v57  ;;  %v1113_v54 = vor.u32 %v1111_v35, %v1110_v43  ;;  %v8794_v43 = vld [vmem:[#allocation2 + $0xf4] sm:$0xf]  ;;  %v1387_v48 = vsel %vm8661_vm7, %v1379_v63, %v1386_v29  ;;  %v8094_v29 = vld [vmem:[%s8612_s22 + $0xa0] sm:$0xff]  }
 0x160   : >> { %v1377_v62 = vor.u32 %v11280_v50, %v1374_v49  ;;  %v11274_v49 = vshrl.u32 %v8794_v43, 16 }
 0x161   : >> { %2801 = vmatmul.mubr.bf16.vlgmr.msra.gmra.mrb[0].mxu0 %v6934_v2  ;;  %2897 = vmatmul.mubr.bf16.vlgmr.msra.gmra.mrb[0].mxu1 %v6946_v4  ;;  %v6935_v2 = vcombine.low %v1092_v18, %v1101_v25  ;;  %v1114_v4 = vsel %vm8661_vm7, %v6904_v52, %v1113_v54  ;;  %v8782_v18 = vld [vmem:[#allocation2 + $0x34] sm:$0xf]  ;;  %v8784_v25 = vld [vmem:[#allocation2 + $0x38] sm:$0xf]  ;;  %v1053_v52 = vld [vmem:[#allocation2 + $0xf0] sm:$0x8] }
 0x162   : >> { %7501 = vmatpush3.bf16.msra.mxu1 %v8080_v3  ;;  %7685 = vmatpush3.bf16.msra.mxu0 %v8082_v57  ;;  %v8087_v57 = vld [vmem:[%s8612_s22 + $0x90] sm:$0xff]   ;;  %v6947_v3 = vcombine.low %v1356_v26, %v1365_v39  ;;  %v8788_v26 = vrot.slane %v1086_v31, 4  ;;  %v11292_v39 = vshrl.u32 %v8782_v18, 16  ;;  %v11289_v41 = vshrl.u32 %v8784_v25, 16  ;;  %v8089_v54 = vld [vmem:[%s8612_s22 + $0x98] sm:$0xff]  }
 0x163   : >> { %7502 = vmatprep.subr.bf16.mxu1 %v8081_v16  ;;  %2808 = vmatprep.mubr.bf16.mxu0 %v6951_v5  ;;  %v1123_v5 = vsel %vm8661_vm7, %v1115_v55, %v1122_v60  ;;  %v6952_v16 = vcombine.low %v8725_v10, %v8727_v12  ;;  %v11275_v31 = vshrl.u32 %v8796_v44, 16  ;;  %v11291_v60 = vshll.u32 %v8782_v18, 16 }
 0x164   : >> { %2904 = vmatprep.mubr.bf16.mxu1 %v6963_v8  ;;  %7686 = vmatprep.subr.bf16.mxu0 %v8093_v45  ;;  %v1378_v8 = vsel %vm8661_vm7, %v6916_v61, %v1377_v62  ;;  %v1141_v61 = vrot.slane %v11289_v41, 7  ;;  %v11290_v62 = vshll.u32 %v8784_v25, 16  ;;  %v1389_v63 = vshrl.u32 %v1053_v52, 16 }
 0x165   : >> { %v6948_v55 = vcombine.low %v1378_v8, %v1387_v48 }
 0x166   : >> { %7503 = vmatpush3.bf16.msra.mxu1 %v8083_v51  ;;  %7687 = vmatpush3.bf16.msra.mxu0 %v8093_v45  ;;  %v6936_v45 = vcombine.low %v1114_v4, %v1123_v5  ;;  %v1017_v51 = vld [vmem:[#allocation2 + $0x30] sm:$0x8] }
 0x167   : >> { %7504 = vmatprep.subr.bf16.mxu1 %v8086_v59  ;;  %v1125_v58 = vshrl.u32 %v1017_v51, 16  ;;  %v1132_v59 = vrot.slane %v11292_v39, 7  ;;  %v1405_v51 = vrot.slane %v11275_v31, 7  ;;  %v8095_v31 = vld [vmem:[%s8612_s22 + $0xe8] sm:$0xff]   ;;  %7688 = vmatprep.subr.bf16.mxu0 %v8102_v11  ;;  %v8101_v39 = vld [vmem:[%s8612_s22 + $0xf8] sm:$0xff]  }
 0x169   : >> { %2809 = vmatmul.mubr.bf16.gmra.mrb[4].mxu0 %v6935_v2  ;;  %2905 = vmatmul.mubr.bf16.gmra.mrb[4].mxu1 %v6947_v3  ;;  %v1396_v2 = vrot.slane %v11274_v49, 7  ;;  %v8092_v3 = vld [vmem:[%s8612_s22 + $0xe0] sm:$0xff]   ;;  %v6905_v4 = vrot.slane %v1125_v58, 11  ;;  %v1135_v5 = vor.u32 %v11291_v60, %v1132_v59  ;;  %v1137_v8 = vrot.slane %v1132_v59, 4  ;;  %v8886_v49 = vld [vmem:[#allocation2 + $0x58] sm:$0xf] }
 0x16a   : >> { %7505 = vmatpush3.bf16.msra.mxu1 %v8087_v57  ;;  %2816 = vmatprep.mubr.bf16.mxu0 %v6952_v16  ;;  %v11276_v57 = vshll.u32 %v8794_v43, 16  ;;  %v11277_v59 = vshll.u32 %v8796_v44, 16  ;;  %v1656_v60 = vld [vmem:[#allocation2 + $0x20] sm:$0x8] }
 0x16b   : >> { %7506 = vmatprep.subr.bf16.mxu1 %v8088_v9  ;;  %2912 = vmatprep.mubr.bf16.mxu1 %v6964_v38  ;;  %v1144_v9 = vor.u32 %v11290_v62, %v1141_v61  ;;  %v6917_v38 = vrot.slane %v1389_v63, 11  ;;  %v1401_v48 = vrot.slane %v1396_v2, 4  ;;  %v1136_v52 = vsel %vm8661_vm7, %v6905_v4, %v1135_v5 }
 0x16c   : >> { %v1399_v58 = vor.u32 %v11276_v57, %v1396_v2  ;;  %v6953_v61 = vcombine.low %v8782_v18, %v8784_v25  ;;  %v6965_v4 = vcombine.low %v8794_v43, %v8796_v44  ;;  %v1408_v5 = vor.u32 %v11277_v59, %v1405_v51  ;;  %7689 = vmatpush3.bf16.msra.mxu0 %v8102_v11  ;;  %v8868_v11 = vld [vmem:[#allocation2 + $0x14] sm:$0xf] }
 0x16d   : >> { %v1145_v63 = vsel %vm8661_vm7, %v1137_v8, %v1144_v9  ;;  %v8849_v57 = vrot.slane %v1089_v34, 5  ;;  %v8096_v8 = vld [vmem:[%s8612_s22 + $0xa8] sm:$0xff]   ;;  %v8099_v34 = vld [vmem:[%s8612_s22 + $0xf0] sm:$0xff]   ;;  %7690 = vmatprep.subr.bf16.mxu0 %v8106_v24 }
 0x16e   : >> { %7507 = vmatpush3.bf16.msra.mxu1 %v8089_v54  ;;  %v1400_v2 = vsel %vm8661_vm7, %v6917_v38, %v1399_v58  ;;  %v8845_v54 = vld [vmem:[#allocation2 + $0x44] sm:$0xf]  ;;  %v8856_v9 = vcombine.low %v1136_v52, %v1145_v63  ;;  %v8858_v38 = vld [vmem:[#allocation2 + $0x48] sm:$0xf]  ;;  %v1653_v58 = vld [vmem:[#allocation2 + $0x10] sm:$0x8]  ;;  %v1409_v27 = vsel %vm8661_vm7, %v1401_v48, %v1408_v5 }
 0x16f   : >> { %7508 = vmatprep.subr.bf16.mxu1 %v8092_v3  ;;  %v1434_v3 = vsel %vm8817_vm10, %v8644_v6, %v8629_v53  ;;  %v11287_v51 = vshrl.u32 %v8845_v54, 16  ;;  %v1155_v59 = vshll.u32 %v8845_v54, 16  ;;  %v11288_v28 = vshrl.u32 %v8858_v38, 16  ;;  %v8870_v63 = vld [vmem:[#allocation2 + $0x18] sm:$0xf] }
 0x170   : >> { %v6954_v52 = vcombine.low %v8845_v54, %v8858_v38  ;;  %v1702_v0 = vshrl.u32 %v1653_v58, 16  ;;  %v6949_v50 = vcombine.low %v1400_v2, %v1409_v27  ;;  %v1716_v48 = vshrl.u32 %v8870_v63, 16  ;;  %v1020_v5 = vld [vmem:[#allocation2 + $0x40] sm:$0x8]  ;;  %7691 = vmatpush3.bf16.msra.mxu0 %v8106_v24 }
 0x171   : >> { %2817 = vmatmul.mubr.bf16.gmra.mrb[8].mxu0 %v6936_v45  ;;  %2913 = vmatmul.mubr.bf16.gmra.mrb[8].mxu1 %v6948_v55  ;;  %v1707_v45 = vshrl.u32 %v8868_v11, 16  ;;  %v1710_v55 = vshll.u32 %v8868_v11, 16  ;;  %v1719_v1 = vshll.u32 %v8870_v63, 16  ;;  %v1147_v56 = vshrl.u32 %v1020_v5, 16 }
 0x172   : >> { %7509 = vmatpush3.bf16.msra.mxu1 %v8094_v29  ;;  %2824 = vmatprep.mubr.bf16.mxu0 %v6953_v61  ;;  %v6918_v42 = vrot.slane %v1702_v0, 11  ;;  %v1154_v29 = vrot.slane %v11287_v51, 7  ;;  %v1410_v61 = vld [vmem:[#allocation2 + $0xc] sm:$0x1]  ;;  %v1718_v58 = vrot.slane %v1716_v48, 7  ;;  %v1163_v27 = vrot.slane %v11288_v28, 7 }
 0x173   : >> { %7510 = vmatprep.subr.bf16.mxu1 %v8095_v31  ;;  %2920 = vmatprep.mubr.bf16.mxu1 %v6965_v4  ;;  %v1709_v2 = vrot.slane %v1707_v45, 7  ;;  %v1164_v37 = vshll.u32 %v8858_v38, 16  ;;  %v6906_v0 = vrot.slane %v1147_v56, 11  ;;  %v1439_v5 = vshll.u32 %v1410_v61, 16  ;;  %v8108_v45 = vld [vmem:[%s8612_s22 + $0x120] sm:$0xff]   ;;  %v8100_v48 = vld [vmem:[%s8612_s22 + $0xb0] sm:$0xff]  }
 0x174   : >> { %v1157_v31 = vor.u32 %v1155_v59, %v1154_v29  ;;  %v1159_v4 = vrot.slane %v1154_v29, 4  ;;  %v1721_v41 = vor.u32 %v1719_v1, %v1718_v58  ;;  %v8892_v56 = vld [vmem:[#allocation2 + $0x24] sm:$0xf]  ;;  %v1174_v24 = vshrl.u32 %v8882_v14, 16  ;;  %7692 = vmatprep.subr.bf16.mxu0 %v8108_v45 }
 0x175   : >> { %v1712_v51 = vor.u32 %v1710_v55, %v1709_v2  ;;  %v1714_v28 = vrot.slane %v1709_v2, 4  ;;  %v1166_v62 = vor.u32 %v1164_v37, %v1163_v27  ;;  %v1441_v61 = vrot.slane %v1439_v5, 5  ;;  %v8899_v55 = vld [vmem:[#allocation2 + $0x28] sm:$0xf]  ;;  %v1023_v27 = vld [vmem:[#allocation2 + $0x50] sm:$0x8]  ;;  %7693 = vmatpush3.bf16.msra.mxu0 %v8108_v45 }
 0x176   : >> { %7511 = vmatpush3.bf16.msra.mxu1 %v8096_v8  ;;  %v1158_v29 = vsel %vm8661_vm7, %v6906_v0, %v1157_v31  ;;  %v11293_v8 = vshrl.u32 %v8886_v49, 16  ;;  %v6955_v58 = vcombine.low %v8882_v14, %v8886_v49  ;;  %v1177_v53 = vshll.u32 %v8882_v14, 16  ;;  %v1659_v45 = vld [vmem:[#allocation2 + $0x30] sm:$0x8] }
 0x177   : >> { %7512 = vmatprep.subr.bf16.mxu1 %v8099_v34  ;;  %v1713_v1 = vsel %vm8661_vm7, %v6918_v42, %v1712_v51  ;;  %v1722_v34 = vsel %vm8661_vm7, %v1714_v28, %v1721_v41  ;;  %v1167_v2 = vsel %vm8661_vm7, %v1159_v4, %v1166_v62  ;;  %v1442_v5 = vsel %vm8817_vm10, %v8646_v7, %v1441_v61  ;;  %v8111_v51 = vld [vmem:[%s8612_s22 + $0x128] sm:$0xff]   ;;  %v8103_v28 = vld [vmem:[%s8612_s22 + $0xb8] sm:$0xff]  }
 0x178   : >> { %v6982_v0 = vcombine.low %v1713_v1, %v1722_v34  ;;  %v6938_v31 = vcombine.low %v1158_v29, %v1167_v2  ;;  %v1724_v42 = vshrl.u32 %v1656_v60, 16  ;;  %v6966_v41 = vcombine.low %v1434_v3, %v1442_v5  ;;  %v1411_v3 = vld [vmem:[#allocation2 + $0x1c] sm:$0x1]  ;;  %v8932_v2 = vld [vmem:[#allocation2 + $0x64] sm:$0xf]  ;;  %7694 = vmatprep.subr.bf16.mxu0 %v8111_v51 }
 0x179   : >> { %2825 = vmatmul.mubr.bf16.gmra.mrb[12].mxu0 %v8856_v9  ;;  %2921 = vmatmul.mubr.bf16.gmra.mrb[12].mxu1 %v6949_v50  ;;  %v1729_v62 = vshrl.u32 %v8892_v56, 16  ;;  %v1732_v50 = vshll.u32 %v8892_v56, 16  ;;  %v1738_v9 = vshrl.u32 %v8899_v55, 16  ;;  %v1741_v60 = vshll.u32 %v8899_v55, 16 }
 0x17a   : >> { %7513 = vmatpush3.bf16.msra.mxu1 %v8100_v48  ;;  %2832 = vmatprep.mubr.bf16.mxu0 %v6954_v52  ;;  %v6919_v7 = vrot.slane %v1724_v42, 11  ;;  %v1169_v4 = vshrl.u32 %v1023_v27, 16  ;;  %v1176_v52 = vrot.slane %v1174_v24, 7  ;;  %v1185_v6 = vrot.slane %v11293_v8, 7 }
 0x17b   : >> { %7514 = vmatprep.subr.bf16.mxu1 %v8101_v39  ;;  %2961 = vmatprep.mubr.bf16.mxu1 %v6982_v0  ;;  %v1731_v48 = vrot.slane %v1729_v62, 7  ;;  %v1740_v29 = vrot.slane %v1738_v9, 7  ;;  %v11295_v1 = vshll.u32 %v8886_v49, 16  ;;  %v1445_v34 = vor.u32 %v8849_v57, %v8788_v26  ;;  %v8936_v62 = vld [vmem:[#allocation2 + $0x68] sm:$0xf]  ;;  %v8113_v9 = vld [vmem:[%s8612_s22 + $0x130] sm:$0xff]  }
 0x17c   : >> { %v6907_v61 = vrot.slane %v1169_v4, 11  ;;  %v1181_v39 = vrot.slane %v1176_v52, 4  ;;  %v1179_v42 = vor.u32 %v1177_v53, %v1176_v52  ;;  %v1447_v26 = vrot.slane %v1098_v47, 5  ;;  %7695 = vmatpush3.bf16.msra.mxu0 %v8111_v51 }
 0x17d   : >> { %v1734_v27 = vor.u32 %v1732_v50, %v1731_v48  ;;  %v1736_v0 = vrot.slane %v1731_v48, 4  ;;  %v1743_v5 = vor.u32 %v1741_v60, %v1740_v29  ;;  %v1188_v4 = vor.u32 %v11295_v1, %v1185_v6  ;;  %v8951_v48 = vld [vmem:[#allocation2 + $0x34] sm:$0xf]  ;;  %v8958_v29 = vld [vmem:[#allocation2 + $0x38] sm:$0xf]  ;;  %7696 = vmatprep.subr.bf16.mxu0 %v8113_v9 }
 0x17e   : >> { %7515 = vmatpush3.bf16.msra.mxu1 %v8103_v28  ;;  %v1446_v8 = vrot.slane %v1445_v34, 4  ;;  %v1449_v57 = vrot.slane %v1095_v36, 4  ;;  %v1180_v60 = vsel %vm8661_vm7, %v6907_v61, %v1179_v42  ;;  %v1453_v52 = vshll.u32 %v1411_v3, 16  ;;  %v1026_v6 = vld [vmem:[#allocation2 + $0x60] sm:$0x8]  ;;  %v8116_v34 = vld [vmem:[%s8612_s22 + $0x138] sm:$0xff]  }
 0x17f   : >> { %v1735_v28 = vsel %vm8661_vm7, %v6919_v7, %v1734_v27  ;;  %v1744_v50 = vsel %vm8661_vm7, %v1736_v0, %v1743_v5  ;;  %v1189_v30 = vsel %vm8661_vm7, %v1181_v39, %v1188_v4  ;;  %v11294_v7 = vshrl.u32 %v8932_v2, 16 }
 0x180   : >> { %v6983_v47 = vcombine.low %v1735_v28, %v1744_v50  ;;  %v1448_v36 = vsel %vm8817_vm10, %v1446_v8, %v1447_v26  ;;  %v6939_v3 = vcombine.low %v1180_v60, %v1189_v30  ;;  %v1450_v61 = vor.u32 %v1449_v57, %v1447_v26  ;;  %7697 = vmatpush3.bf16.msra.mxu0 %v8113_v9 }
 0x181   : >> { %2833 = vmatmul.mubr.bf16.gmra.mrb[16].mxu0 %v6938_v31  ;;  %2962 = vmatmul.mubr.bf16.vlgmr.msra.gmra.mrb[16].mxu1 %v6966_v41  ;;  %v1455_v27 = vrot.slane %v1453_v52, 5  ;;  %v1205_v31 = vshrl.u32 %v8936_v62, 16  ;;  %v6956_v51 = vcombine.low %v8932_v2, %v8936_v62  ;;  %v1746_v41 = vshrl.u32 %v1659_v45, 16 }
 0x182   : >> { %2840 = vmatprep.mubr.bf16.mxu0 %v6955_v58  ;;  %2969 = vmatprep.mubr.bf16.mxu1 %v6983_v47  ;;  %v1751_v8 = vshrl.u32 %v8951_v48, 16  ;;  %v1754_v39 = vshll.u32 %v8951_v48, 16  ;;  %v1451_v0 = vrot.slane %v1450_v61, 4  ;;  %v1760_v5 = vshrl.u32 %v8958_v29, 16  ;;  %v1412_v61 = vld [vmem:[#allocation2 + $0x2c] sm:$0x1] }
 0x183   : >> { %v1763_v58 = vshll.u32 %v8958_v29, 16  ;;  %v1191_v42 = vshrl.u32 %v1026_v6, 16  ;;  %v6920_v4 = vrot.slane %v1746_v41, 11  ;;  %v1198_v57 = vrot.slane %v11294_v7, 7  ;;  %7698 = vmatprep.subr.bf16.mxu0 %v8116_v34  ;;  %v8977_v41 = vld [vmem:[#allocation2 + $0x74] sm:$0xf] }
 0x184   : >> { %v1753_v26 = vrot.slane %v1751_v8, 7  ;;  %v1199_v28 = vshll.u32 %v8932_v2, 16  ;;  %v1456_v45 = vsel %vm8817_vm10, %v1451_v0, %v1455_v27  ;;  %v1762_v50 = vrot.slane %v1760_v5, 7  ;;  %v8982_v0 = vld [vmem:[#allocation2 + $0x78] sm:$0xf]  ;;  %7699 = vmatpush3.bf16.msra.mxu0 %v8116_v34 }
 0x185   : >> { %v6908_v60 = vrot.slane %v1191_v42, 11  ;;  %v1207_v52 = vrot.slane %v1205_v31, 7  ;;  %v6967_v47 = vcombine.low %v1448_v36, %v1456_v45  ;;  %v1203_v7 = vrot.slane %v1198_v57, 4  ;;  %v1662_v42 = vld [vmem:[#allocation2 + $0x40] sm:$0x8] }
 0x186   : >> { %v1756_v30 = vor.u32 %v1754_v39, %v1753_v26  ;;  %v1758_v6 = vrot.slane %v1753_v26, 4  ;;  %v1201_v9 = vor.u32 %v1199_v28, %v1198_v57  ;;  %v1765_v8 = vor.u32 %v1763_v58, %v1762_v50  ;;  %v8992_v26 = vld [vmem:[#allocation2 + $0x44] sm:$0xf]  ;;  %v9002_v45 = vld [vmem:[#allocation2 + $0x48] sm:$0xf] }
 0x187   : >> { %v1208_v1 = vshll.u32 %v8936_v62, 16  ;;  %v1457_v27 = vrot.slane %v1108_v19, 4  ;;  %v1458_v5 = vrot.slane %v1111_v35, 5  ;;  %v1461_v58 = vrot.slane %v1120_v46, 5  ;;  %v9183_v62 = vld [vmem:[#allocation2 + $0x84] sm:$0xf] }
 0x188   : >> { %v1757_v36 = vsel %vm8661_vm7, %v6920_v4, %v1756_v30  ;;  %v1202_v39 = vsel %vm8661_vm7, %v6908_v60, %v1201_v9  ;;  %v1766_v19 = vsel %vm8661_vm7, %v1758_v6, %v1765_v8  ;;  %v1467_v4 = vshll.u32 %v1412_v61, 16 }
 0x189   : >> { %2841 = vmatmul.mubr.bf16.gmra.mrb[20].mxu0 %v6939_v3  ;;  %2970 = vmatmul.mubr.bf16.gmra.mrb[20].mxu1 %v6967_v47  ;;  %v1210_v34 = vor.u32 %v1208_v1, %v1207_v52  ;;  %v1463_v3 = vrot.slane %v1117_v20, 4  ;;  %v6984_v57 = vcombine.low %v1757_v36, %v1766_v19  ;;  %v1459_v10 = vor.u32 %v1458_v5, %v1457_v27  ;;  %v1029_v47 = vld [vmem:[#allocation2 + $0x70] sm:$0x8] }
 0x18a   : >> { %2848 = vmatprep.mubr.bf16.mxu0 %v6956_v51  ;;  %v11299_v35 = vshrl.u32 %v8977_v41, 16  ;;  %v11296_v46 = vshrl.u32 %v8982_v0, 16  ;;  %v1469_v60 = vrot.slane %v1467_v4, 5  ;;  %v6957_v52 = vcombine.low %v8977_v41, %v8982_v0 }
 0x18b   : >> { %v1211_v51 = vsel %vm8661_vm7, %v1203_v7, %v1210_v34  ;;  %v1464_v50 = vor.u32 %v1463_v3, %v1461_v58  ;;  %2977 = vmatprep.mubr.bf16.mxu1 %v6984_v57  ;;  %v1460_v20 = vrot.slane %v1459_v10, 4  ;;  %v1768_v30 = vshrl.u32 %v1662_v42, 16 }
 0x18c   : >> { %v6940_v12 = vcombine.low %v1202_v39, %v1211_v51  ;;  %v1773_v6 = vshrl.u32 %v8992_v26, 16  ;;  %v1776_v61 = vshll.u32 %v8992_v26, 16  ;;  %v1782_v8 = vshrl.u32 %v9002_v45, 16 }
 0x18d   : >> { %v1465_v9 = vrot.slane %v1464_v50, 4  ;;  %v1785_v27 = vshll.u32 %v9002_v45, 16  ;;  %v1462_v7 = vsel %vm8817_vm10, %v1460_v20, %v1461_v58  ;;  %v6921_v36 = vrot.slane %v1768_v30, 11  ;;  %v1413_v20 = vld [vmem:[#allocation2 + $0x3c] sm:$0x1] }
 0x18e   : >> { %v1775_v5 = vrot.slane %v1773_v6, 7  ;;  %v1213_v19 = vshrl.u32 %v1029_v47, 16  ;;  %v1784_v34 = vrot.slane %v1782_v8, 7  ;;  %v1220_v42 = vrot.slane %v11299_v35, 7  ;;  %v9023_v30 = vld [vmem:[#allocation2 + $0x84] sm:$0xf] }
 0x18f   : >> { %v1470_v39 = vsel %vm8817_vm10, %v1465_v9, %v1469_v60  ;;  %v11298_v3 = vshll.u32 %v8977_v41, 16  ;;  %v1229_v60 = vrot.slane %v11296_v46, 7  ;;  %v11297_v6 = vshll.u32 %v8982_v0, 16 }
 0x190   : >> { %v6968_v4 = vcombine.low %v1462_v7, %v1470_v39  ;;  %v1778_v57 = vor.u32 %v1776_v61, %v1775_v5  ;;  %v1780_v10 = vrot.slane %v1775_v5, 4  ;;  %v6909_v51 = vrot.slane %v1213_v19, 11 }
 0x191   : >> { %2849 = vmatmul.mubr.bf16.gmra.mrb[24].mxu0 %v6940_v12  ;;  %v1787_v50 = vor.u32 %v1785_v27, %v1784_v34  ;;  %v1223_v58 = vor.u32 %v11298_v3, %v1220_v42  ;;  %v1225_v47 = vrot.slane %v1220_v42, 4  ;;  %v11324_v9 = vshrl.u32 %v8782_v18, 16  ;;  %v9032_v27 = vld [vmem:[#allocation2 + $0x88] sm:$0xf]  ;;  %v1665_v42 = vld [vmem:[#allocation2 + $0x50] sm:$0x8] }
 0x192   : >> { %2856 = vmatprep.mubr.bf16.mxu0 %v6957_v52  ;;  %2978 = vmatmul.mubr.bf16.gmra.mrb[24].mxu1 %v6968_v4  ;;  %v1779_v12 = vsel %vm8661_vm7, %v6921_v36, %v1778_v57  ;;  %v11325_v61 = vshll.u32 %v8782_v18, 16  ;;  %v11326_v19 = vshll.u32 %v8784_v25, 16  ;;  %v11327_v36 = vshrl.u32 %v8784_v25, 16 }
 0x193   : >> { %v1471_v52 = vrot.slane %v11324_v9, 4  ;;  %v1788_v7 = vsel %vm8661_vm7, %v1780_v10, %v1787_v50  ;;  %v1224_v5 = vsel %vm8661_vm7, %v6909_v51, %v1223_v58  ;;  %v1232_v18 = vor.u32 %v11297_v6, %v1229_v60  ;;  %v9050_v58 = vld [vmem:[#allocation2 + $0x58] sm:$0xf] }
 0x194   : >> { %v1472_v8 = vrot.slane %v11325_v61, 5  ;;  %v1475_v39 = vrot.slane %v11326_v19, 5  ;;  %v1477_v34 = vrot.slane %v11327_v36, 4  ;;  %v6985_v4 = vcombine.low %v1779_v12, %v1788_v7  ;;  %v9044_v61 = vld [vmem:[#allocation2 + $0x54] sm:$0xf] }
 0x195   : >> { %v1481_v9 = vshll.u32 %v1413_v20, 16  ;;  %v11307_v10 = vshrl.u32 %v9023_v30, 16  ;;  %v11300_v51 = vshrl.u32 %v9032_v27, 16  ;;  %v6958_v50 = vcombine.low %v9023_v30, %v9032_v27  ;;  %v1032_v20 = vld [vmem:[#allocation2 + $0x80] sm:$0x8] }
 0x196   : >> { %v1473_v57 = vor.u32 %v1472_v8, %v1471_v52  ;;  %v1478_v46 = vor.u32 %v1477_v34, %v1475_v39  ;;  %2985 = vmatprep.mubr.bf16.mxu1 %v6985_v4  ;;  %v1233_v25 = vsel %vm8661_vm7, %v1225_v47, %v1232_v18  ;;  %v1790_v52 = vshrl.u32 %v1665_v42, 16 }
 0x197   : >> { %v1483_v60 = vrot.slane %v1481_v9, 5  ;;  %v6941_v8 = vcombine.low %v1224_v5, %v1233_v25  ;;  %v1795_v19 = vshrl.u32 %v9044_v61, 16  ;;  %v1798_v36 = vshll.u32 %v9044_v61, 16  ;;  %v1414_v5 = vld [vmem:[#allocation2 + $0x4c] sm:$0x1] }
 0x198   : >> { %v1474_v12 = vrot.slane %v1473_v57, 4  ;;  %v1479_v7 = vrot.slane %v1478_v46, 4  ;;  %v6922_v6 = vrot.slane %v1790_v52, 11  ;;  %v1804_v3 = vshrl.u32 %v9050_v58, 16 }
 0x199   : >> { %v1807_v4 = vshll.u32 %v9050_v58, 16  ;;  %2857 = vmatmul.mubr.bf16.gmra.mrb[28].mxu0 %v6941_v8  ;;  %v1797_v42 = vrot.slane %v1795_v19, 7  ;;  %v1235_v18 = vshrl.u32 %v1032_v20, 16  ;;  %v1242_v46 = vrot.slane %v11307_v10, 7 }
 0x19a   : >> { %v1476_v34 = vsel %vm8817_vm10, %v1474_v12, %v1475_v39  ;;  %v1484_v47 = vsel %vm8817_vm10, %v1479_v7, %v1483_v60  ;;  %2864 = vmatprep.mubr.bf16.mxu0 %v6958_v50  ;;  %v1806_v9 = vrot.slane %v1804_v3, 7  ;;  %v11302_v39 = vshll.u32 %v9023_v30, 16  ;;  %v9072_v3 = vld [vmem:[#allocation2 + $0x94] sm:$0xf] }
 0x19b   : >> { %v6969_v57 = vcombine.low %v1476_v34, %v1484_v47  ;;  %v1251_v25 = vrot.slane %v11300_v51, 7  ;;  %v1800_v12 = vor.u32 %v1798_v36, %v1797_v42  ;;  %v1802_v52 = vrot.slane %v1797_v42, 4 }
 0x19c   : >> { %v6910_v8 = vrot.slane %v1235_v18, 11  ;;  %v1247_v35 = vrot.slane %v1242_v46, 4  ;;  %v1809_v60 = vor.u32 %v1807_v4, %v1806_v9  ;;  %v1245_v20 = vor.u32 %v11302_v39, %v1242_v46  ;;  %v9082_v18 = vld [vmem:[#allocation2 + $0x98] sm:$0xf] }
 0x19d   : >> { %2986 = vmatmul.mubr.bf16.gmra.mrb[28].mxu1 %v6969_v57  ;;  %v11301_v7 = vshll.u32 %v9032_v27, 16  ;;  %v11328_v19 = vshrl.u32 %v8845_v54, 16  ;;  %v1801_v34 = vsel %vm8661_vm7, %v6922_v6, %v1800_v12  ;;  %v1486_v36 = vrot.slane %v1155_v59, 5  ;;  %v1668_v54 = vld [vmem:[#allocation2 + $0x60] sm:$0x8] }
 0x19e   : >> { %v1489_v47 = vrot.slane %v1164_v37, 5  ;;  %v11329_v4 = vshrl.u32 %v8858_v38, 16  ;;  %v1810_v46 = vsel %vm8661_vm7, %v1802_v52, %v1809_v60  ;;  %v1246_v57 = vsel %vm8661_vm7, %v6910_v8, %v1245_v20  ;;  %v9091_v38 = vld [vmem:[#allocation2 + $0x64] sm:$0xf] }
 0x19f   : >> { %v1485_v50 = vrot.slane %v11328_v19, 4  ;;  %v1254_v6 = vor.u32 %v11301_v7, %v1251_v25  ;;  %v1495_v9 = vshll.u32 %v1414_v5, 16  ;;  %v6986_v59 = vcombine.low %v1801_v34, %v1810_v46  ;;  %v1035_v5 = vld [vmem:[#allocation2 + $0x90] sm:$0x8] }
 0x1a0   : >> { %v1491_v42 = vrot.slane %v11329_v4, 4  ;;  %v11306_v37 = vshrl.u32 %v9072_v3, 16  ;;  %v9093_v4 = vld [vmem:[#allocation2 + $0x68] sm:$0xf]  ;;  %v11303_v8 = vshrl.u32 %v9082_v18, 16  ;;  %v6959_v25 = vcombine.low %v9072_v3, %v9082_v18 }
 0x1a1   : >> { %v1487_v12 = vor.u32 %v1486_v36, %v1485_v50  ;;  %v1255_v52 = vsel %vm8661_vm7, %v1247_v35, %v1254_v6  ;;  %v1497_v60 = vrot.slane %v1495_v9, 5  ;;  %2993 = vmatprep.mubr.bf16.mxu1 %v6986_v59  ;;  %v1812_v36 = vshrl.u32 %v1668_v54, 16 }
 0x1a2   : >> { %v1492_v19 = vor.u32 %v1491_v42, %v1489_v47  ;;  %v6942_v20 = vcombine.low %v1246_v57, %v1255_v52  ;;  %v1817_v42 = vshrl.u32 %v9091_v38, 16  ;;  %v1820_v46 = vshll.u32 %v9091_v38, 16 }
 0x1a3   : >> { %v1488_v50 = vrot.slane %v1487_v12, 4  ;;  %v1826_v51 = vshrl.u32 %v9093_v4, 16  ;;  %v1829_v35 = vshll.u32 %v9093_v4, 16  ;;  %v6923_v59 = vrot.slane %v1812_v36, 11  ;;  %v1415_v36 = vld [vmem:[#allocation2 + $0x5c] sm:$0x1] }
 0x1a4   : >> { %v1493_v34 = vrot.slane %v1492_v19, 4  ;;  %2865 = vmatmul.mubr.bf16.gmra.mrb[32].mxu0 %v6942_v20  ;;  %v1257_v57 = vshrl.u32 %v1035_v5, 16  ;;  %v1819_v54 = vrot.slane %v1817_v42, 7  ;;  %v1264_v52 = vrot.slane %v11306_v37, 7  ;;  %v1416_v37 = vld [vmem:[#allocation2 + $0x6c] sm:$0x1] }
 0x1a5   : >> { %v1490_v6 = vsel %vm8817_vm10, %v1488_v50, %v1489_v47  ;;  %2872 = vmatprep.mubr.bf16.mxu0 %v6959_v25  ;;  %v1828_v19 = vrot.slane %v1826_v51, 7  ;;  %v11305_v39 = vshll.u32 %v9072_v3, 16  ;;  %v1273_v20 = vrot.slane %v11303_v8, 7 }
 0x1a6   : >> { %v1498_v9 = vsel %vm8817_vm10, %v1493_v34, %v1497_v60  ;;  %v6911_v7 = vrot.slane %v1257_v57, 11  ;;  %v11304_v47 = vshll.u32 %v9082_v18, 16  ;;  %v1822_v50 = vor.u32 %v1820_v46, %v1819_v54 }
 0x1a7   : >> { %v6970_v12 = vcombine.low %v1490_v6, %v1498_v9  ;;  %v1824_v60 = vrot.slane %v1819_v54, 4  ;;  %v1831_v34 = vor.u32 %v1829_v35, %v1828_v19  ;;  %v1269_v5 = vrot.slane %v1264_v52, 4  ;;  %v9122_v9 = vld [vmem:[#allocation2 + $0xa4] sm:$0xf] }
 0x1a8   : >> { %v1267_v25 = vor.u32 %v11305_v39, %v1264_v52  ;;  %v1276_v51 = vor.u32 %v11304_v47, %v1273_v20  ;;  %v1499_v42 = vrot.slane %v1174_v24, 4  ;;  %v1500_v6 = vrot.slane %v1177_v53, 5  ;;  %v9132_v52 = vld [vmem:[#allocation2 + $0xa8] sm:$0xf]  ;;  %v1671_v24 = vld [vmem:[#allocation2 + $0x70] sm:$0x8] }
 0x1a9   : >> { %2994 = vmatmul.mubr.bf16.gmra.mrb[32].mxu1 %v6970_v12  ;;  %v1823_v46 = vsel %vm8661_vm7, %v6923_v59, %v1822_v50  ;;  %v1832_v35 = vsel %vm8661_vm7, %v1824_v60, %v1831_v34  ;;  %v11330_v57 = vshll.u32 %v8886_v49, 16  ;;  %v11331_v54 = vshrl.u32 %v8886_v49, 16  ;;  %v9138_v50 = vld [vmem:[#allocation2 + $0x74] sm:$0xf]  ;;  %v9141_v49 = vld [vmem:[#allocation2 + $0x78] sm:$0xf] }
 0x1aa   : >> { %v6987_v20 = vcombine.low %v1823_v46, %v1832_v35  ;;  %v1268_v14 = vsel %vm8661_vm7, %v6911_v7, %v1267_v25  ;;  %v1277_v53 = vsel %vm8661_vm7, %v1269_v5, %v1276_v51  ;;  %v1501_v59 = vor.u32 %v1500_v6, %v1499_v42  ;;  %v1038_v35 = vld [vmem:[#allocation2 + $0xa0] sm:$0x8] }
 0x1ab   : >> { %v1503_v12 = vrot.slane %v11330_v57, 5  ;;  %v1505_v19 = vrot.slane %v11331_v54, 4  ;;  %v6943_v60 = vcombine.low %v1268_v14, %v1277_v53  ;;  %v1509_v8 = vshll.u32 %v1415_v36, 16 }
 0x1ac   : >> { %v1284_v57 = vshrl.u32 %v9122_v9, 16  ;;  %3001 = vmatprep.mubr.bf16.mxu1 %v6987_v20  ;;  %v1502_v54 = vrot.slane %v1501_v59, 4  ;;  %v11308_v46 = vshrl.u32 %v9132_v52, 16  ;;  %v6960_v7 = vcombine.low %v9122_v9, %v9132_v52 }
 0x1ad   : >> { %v1506_v34 = vor.u32 %v1505_v19, %v1503_v12  ;;  %v1834_v25 = vshrl.u32 %v1671_v24, 16  ;;  %2873 = vmatmul.mubr.bf16.gmra.mrb[36].mxu0 %v6943_v60  ;;  %v1511_v51 = vrot.slane %v1509_v8, 5  ;;  %v1839_v42 = vshrl.u32 %v9138_v50, 16 }
 0x1ae   : >> { %v1842_v36 = vshll.u32 %v9138_v50, 16  ;;  %v1504_v6 = vsel %vm8817_vm10, %v1502_v54, %v1503_v12  ;;  %2880 = vmatprep.mubr.bf16.mxu0 %v6960_v7  ;;  %v1848_v20 = vshrl.u32 %v9141_v49, 16  ;;  %v1851_v14 = vshll.u32 %v9141_v49, 16 }
 0x1af   : >> { %v1507_v5 = vrot.slane %v1506_v34, 4  ;;  %v6924_v19 = vrot.slane %v1834_v25, 11  ;;  %v1841_v53 = vrot.slane %v1839_v42, 7  ;;  %v1279_v59 = vshrl.u32 %v1038_v35, 16 }
 0x1b0   : >> { %v1286_v8 = vrot.slane %v1284_v57, 7  ;;  %v1850_v34 = vrot.slane %v1848_v20, 7  ;;  %v1287_v47 = vshll.u32 %v9122_v9, 16  ;;  %v1295_v12 = vrot.slane %v11308_v46, 7 }
 0x1b1   : >> { %v1512_v24 = vsel %vm8817_vm10, %v1507_v5, %v1511_v51  ;;  %v1844_v54 = vor.u32 %v1842_v36, %v1841_v53  ;;  %v1846_v7 = vrot.slane %v1841_v53, 4  ;;  %v6912_v25 = vrot.slane %v1279_v59, 11  ;;  %v9174_v53 = vld [vmem:[#allocation2 + $0xb8] sm:$0xf] }
 0x1b2   : >> { %v6971_v60 = vcombine.low %v1504_v6, %v1512_v24  ;;  %v1291_v39 = vrot.slane %v1286_v8, 4  ;;  %v1853_v10 = vor.u32 %v1851_v14, %v1850_v34  ;;  %v1289_v35 = vor.u32 %v1287_v47, %v1286_v8  ;;  %v9164_v6 = vld [vmem:[#allocation2 + $0xb4] sm:$0xf] }
 0x1b3   : >> { %v11309_v5 = vshll.u32 %v9132_v52, 16  ;;  %v11332_v51 = vshrl.u32 %v8932_v2, 16  ;;  %v1845_v20 = vsel %vm8661_vm7, %v6924_v19, %v1844_v54  ;;  %v1514_v36 = vrot.slane %v1199_v28, 5  ;;  %v1674_v2 = vld [vmem:[#allocation2 + $0x80] sm:$0x8] }
 0x1b4   : >> { %3002 = vmatmul.mubr.bf16.gmra.mrb[36].mxu1 %v6971_v60  ;;  %v1517_v24 = vrot.slane %v1208_v1, 5  ;;  %v1519_v14 = vrot.slane %v1205_v31, 4  ;;  %v1854_v59 = vsel %vm8661_vm7, %v1846_v7, %v1853_v10  ;;  %v1290_v8 = vsel %vm8661_vm7, %v6912_v25, %v1289_v35  ;;  %v9185_v31 = vld [vmem:[#allocation2 + $0x88] sm:$0xf] }
 0x1b5   : >> { %v1513_v42 = vrot.slane %v11332_v51, 4  ;;  %v1298_v19 = vor.u32 %v11309_v5, %v1295_v12  ;;  %v1523_v60 = vshll.u32 %v1416_v37, 16  ;;  %v6988_v28 = vcombine.low %v1845_v20, %v1854_v59  ;;  %v1041_v37 = vld [vmem:[#allocation2 + $0xb0] sm:$0x8] }
 0x1b6   : >> { %v1520_v54 = vor.u32 %v1519_v14, %v1517_v24  ;;  %v11313_v1 = vshrl.u32 %v9164_v6, 16  ;;  %v11310_v25 = vshrl.u32 %v9174_v53, 16  ;;  %v6961_v12 = vcombine.low %v9164_v6, %v9174_v53 }
 0x1b7   : >> { %v1515_v34 = vor.u32 %v1514_v36, %v1513_v42  ;;  %v1299_v10 = vsel %vm8661_vm7, %v1291_v39, %v1298_v19  ;;  %v1525_v7 = vrot.slane %v1523_v60, 5  ;;  %3009 = vmatprep.mubr.bf16.mxu1 %v6988_v28  ;;  %v1856_v20 = vshrl.u32 %v1674_v2, 16 }
 0x1b8   : >> { %v6944_v35 = vcombine.low %v1290_v8, %v1299_v10  ;;  %v1521_v42 = vrot.slane %v1520_v54, 4  ;;  %v1861_v36 = vshrl.u32 %v9183_v62, 16  ;;  %v1864_v14 = vshll.u32 %v9183_v62, 16 }
 0x1b9   : >> { %v1516_v51 = vrot.slane %v1515_v34, 4  ;;  %v1870_v59 = vshrl.u32 %v9185_v31, 16  ;;  %v1873_v39 = vshll.u32 %v9185_v31, 16  ;;  %v6925_v28 = vrot.slane %v1856_v20, 11 }
 0x1ba   : >> { %2881 = vmatmul.mubr.bf16.gmra.mrb[40].mxu0 %v6944_v35  ;;  %v1526_v60 = vsel %vm8817_vm10, %v1521_v42, %v1525_v7  ;;  %v1301_v8 = vshrl.u32 %v1041_v37, 16  ;;  %v1863_v2 = vrot.slane %v1861_v36, 7  ;;  %v1308_v10 = vrot.slane %v11313_v1, 7  ;;  %v1417_v36 = vld [vmem:[#allocation2 + $0x7c] sm:$0x1] }
 0x1bb   : >> { %v1518_v19 = vsel %vm8817_vm10, %v1516_v51, %v1517_v24  ;;  %2888 = vmatprep.mubr.bf16.mxu0 %v6961_v12  ;;  %v1872_v54 = vrot.slane %v1870_v59, 7  ;;  %v11312_v5 = vshll.u32 %v9164_v6, 16  ;;  %v1317_v35 = vrot.slane %v11310_v25, 7  ;;  %v1677_v25 = vld [vmem:[#allocation2 + $0x90] sm:$0x8] }
 0x1bc   : >> { %v6972_v34 = vcombine.low %v1518_v19, %v1526_v60  ;;  %v6913_v46 = vrot.slane %v1301_v8, 11  ;;  %v11311_v24 = vshll.u32 %v9174_v53, 16  ;;  %v1866_v51 = vor.u32 %v1864_v14, %v1863_v2 }
 0x1bd   : >> { %v1868_v7 = vrot.slane %v1863_v2, 4  ;;  %v1875_v42 = vor.u32 %v1873_v39, %v1872_v54  ;;  %v1313_v37 = vrot.slane %v1308_v10, 4  ;;  %v1311_v12 = vor.u32 %v11312_v5, %v1308_v10 }
 0x1be   : >> { %3010 = vmatmul.mubr.bf16.gmra.mrb[40].mxu1 %v6972_v34  ;;  %v1320_v20 = vor.u32 %v11311_v24, %v1317_v35  ;;  %v11333_v59 = vshrl.u32 %v8977_v41, 16  ;;  %v11334_v60 = vshll.u32 %v8977_v41, 16  ;;  %v1867_v14 = vsel %vm8661_vm7, %v6925_v28, %v1866_v51  ;;  %v9222_v35 = vld [vmem:[#allocation2 + $0x94] sm:$0xf]  ;;  %v9224_v24 = vld [vmem:[#allocation2 + $0x98] sm:$0xf] }
 0x1bf   : >> { %v1876_v39 = vsel %vm8661_vm7, %v1868_v7, %v1875_v42  ;;  %v11335_v34 = vshll.u32 %v8982_v0, 16  ;;  %v11336_v54 = vshrl.u32 %v8982_v0, 16  ;;  %v1312_v41 = vsel %vm8661_vm7, %v6913_v46, %v1311_v12 }
 0x1c0   : >> { %v1527_v19 = vrot.slane %v11333_v59, 4  ;;  %v1528_v8 = vrot.slane %v11334_v60, 5  ;;  %v6989_v59 = vcombine.low %v1867_v14, %v1876_v39  ;;  %v1321_v28 = vsel %vm8661_vm7, %v1313_v37, %v1320_v20 }
 0x1c1   : >> { %v1531_v2 = vrot.slane %v11335_v34, 5  ;;  %v1533_v10 = vrot.slane %v11336_v54, 4  ;;  %v6945_v60 = vcombine.low %v1312_v41, %v1321_v28  ;;  %v1537_v42 = vshll.u32 %v1417_v36, 16 }
 0x1c2   : >> { %v1529_v51 = vor.u32 %v1528_v8, %v1527_v19  ;;  %v1878_v5 = vshrl.u32 %v1677_v25, 16  ;;  %3017 = vmatprep.mubr.bf16.mxu1 %v6989_v59  ;;  %v1883_v0 = vshrl.u32 %v9222_v35, 16  ;;  %v1886_v54 = vshll.u32 %v9222_v35, 16  ;;  %v1418_v19 = vld [vmem:[#allocation2 + $0x8c] sm:$0x1] }
 0x1c3   : >> { %v1534_v7 = vor.u32 %v1533_v10, %v1531_v2  ;;  %v1892_v1 = vshrl.u32 %v9224_v24, 16  ;;  %2889 = vmatmul.mubr.bf16.gmra.mrb[44].mxu0 %v6945_v60  ;;  %v1539_v39 = vrot.slane %v1537_v42, 5  ;;  %v1895_v12 = vshll.u32 %v9224_v24, 16  ;;  %v1680_v8 = vld [vmem:[#allocation2 + $0xa0] sm:$0x8] }
 0x1c4   : >> { %v1530_v34 = vrot.slane %v1529_v51, 4  ;;  %v6926_v46 = vrot.slane %v1878_v5, 11  ;;  %v1885_v20 = vrot.slane %v1883_v0, 7  ;;  %v6998_v25 = vcombine.low %v8868_v11, %v8870_v63 }
 0x1c5   : >> { %v1535_v14 = vrot.slane %v1534_v7, 4  ;;  %v1894_v36 = vrot.slane %v1892_v1, 7  ;;  %v11337_v59 = vshrl.u32 %v9023_v30, 16  ;;  %v11338_v5 = vshll.u32 %v9023_v30, 16  ;;  %v9252_v30 = vld [vmem:[#allocation2 + $0xa8] sm:$0xf] }
 0x1c6   : >> { %v1532_v37 = vsel %vm8817_vm10, %v1530_v34, %v1531_v2  ;;  %v11339_v51 = vshll.u32 %v9032_v27, 16  ;;  %v9246_v2 = vld [vmem:[#allocation2 + $0xa4] sm:$0xf]  ;;  %v1888_v7 = vor.u32 %v1886_v54, %v1885_v20  ;;  %v1890_v42 = vrot.slane %v1885_v20, 4  ;;  %7700 = vmatprep.mubr.bf16.mxu0 %v6998_v25 }
 0x1c7   : >> { %v1540_v10 = vsel %vm8817_vm10, %v1535_v14, %v1539_v39  ;;  %v1541_v41 = vrot.slane %v11337_v59, 4  ;;  %v1542_v28 = vrot.slane %v11338_v5, 5  ;;  %v1897_v11 = vor.u32 %v1895_v12, %v1894_v36 }
 0x1c8   : >> { %v1545_v60 = vrot.slane %v11339_v51, 5  ;;  %v6973_v1 = vcombine.low %v1532_v37, %v1540_v10  ;;  %v11340_v34 = vshrl.u32 %v9032_v27, 16  ;;  %v1551_v14 = vshll.u32 %v1418_v19, 16 }
 0x1c9   : >> { %v1543_v63 = vor.u32 %v1542_v28, %v1541_v41  ;;  %v6999_v39 = vcombine.low %v8892_v56, %v8899_v55  ;;  %v1889_v59 = vsel %vm8661_vm7, %v6926_v46, %v1888_v7  ;;  %v1898_v54 = vsel %vm8661_vm7, %v1890_v42, %v1897_v11  ;;  %v1419_v28 = vld [vmem:[#allocation2 + $0x9c] sm:$0x1] }
 0x1ca   : >> { %v1547_v0 = vrot.slane %v11340_v34, 4  ;;  %3018 = vmatmul.mubr.bf16.gmra.mrb[44].mxu1 %v6973_v1  ;;  %v1900_v37 = vshrl.u32 %v1680_v8, 16  ;;  %v1905_v12 = vshrl.u32 %v9246_v2, 16  ;;  %v6990_v20 = vcombine.low %v1889_v59, %v1898_v54  ;;  %v9276_v59 = vld [vmem:[#allocation2 + $0xb4] sm:$0xf] }
 0x1cb   : >> { %v1544_v36 = vrot.slane %v1543_v63, 4  ;;  %v1553_v25 = vrot.slane %v1551_v14, 5  ;;  %v1908_v56 = vshll.u32 %v9246_v2, 16  ;;  %v1914_v55 = vshrl.u32 %v9252_v30, 16  ;;  %7701 = vmatmul.mubr.bf16.vlgmr.msra.gmra.mrb[48].mxu0 %v6999_v39  ;;  %v1683_v63 = vld [vmem:[#allocation2 + $0xb0] sm:$0x8] }
 0x1cc   : >> { %v1548_v27 = vor.u32 %v1547_v0, %v1545_v60  ;;  %v6927_v19 = vrot.slane %v1900_v37, 11  ;;  %v1907_v10 = vrot.slane %v1905_v12, 7  ;;  %3025 = vmatprep.mubr.bf16.mxu1 %v6990_v20  ;;  %v1917_v8 = vshll.u32 %v9252_v30, 16 }
 0x1cd   : >> { %v1546_v46 = vsel %vm8817_vm10, %v1544_v36, %v1545_v60  ;;  %v7000_v5 = vcombine.low %v8951_v48, %v8958_v29  ;;  %v1916_v7 = vrot.slane %v1914_v55, 7  ;;  %v11341_v42 = vshrl.u32 %v9072_v3, 16 }
 0x1ce   : >> { %v1549_v41 = vrot.slane %v1548_v27, 4  ;;  %v1910_v51 = vor.u32 %v1908_v56, %v1907_v10  ;;  %v1912_v1 = vrot.slane %v1907_v10, 4  ;;  %v11342_v60 = vshll.u32 %v9072_v3, 16 }
 0x1cf   : >> { %v1555_v11 = vrot.slane %v11341_v42, 4  ;;  %7704 = vmatprep.mubr.bf16.mxu0 %v7000_v5  ;;  %v11343_v14 = vshll.u32 %v9082_v18, 16  ;;  %v11344_v48 = vshrl.u32 %v9082_v18, 16  ;;  %v1919_v12 = vor.u32 %v1917_v8, %v1916_v7  ;;  %v1420_v7 = vld [vmem:[#allocation2 + $0xac] sm:$0x1] }
 0x1d0   : >> { %v1554_v34 = vsel %vm8817_vm10, %v1549_v41, %v1553_v25  ;;  %v1556_v0 = vrot.slane %v11342_v60, 5  ;;  %v1911_v37 = vsel %vm8661_vm7, %v6927_v19, %v1910_v51  ;;  %v1565_v20 = vshll.u32 %v1419_v28, 16  ;;  %v9282_v25 = vld [vmem:[#allocation2 + $0xb8] sm:$0xf] }
 0x1d1   : >> { %v1559_v39 = vrot.slane %v11343_v14, 5  ;;  %v1561_v29 = vrot.slane %v11344_v48, 4  ;;  %v6974_v54 = vcombine.low %v1546_v46, %v1554_v34  ;;  %v7001_v3 = vcombine.low %v8992_v26, %v9002_v45  ;;  %v1686_v34 = vld [vmem:[#allocation2 + $0xc0] sm:$0x8] }
 0x1d2   : >> { %v1557_v36 = vor.u32 %v1556_v0, %v1555_v11  ;;  %v1922_v10 = vshrl.u32 %v1683_v63, 16  ;;  %v1920_v18 = vsel %vm8661_vm7, %v1912_v1, %v1919_v12  ;;  %v1567_v56 = vrot.slane %v1565_v20, 5 }
 0x1d3   : >> { %v1562_v27 = vor.u32 %v1561_v29, %v1559_v39  ;;  %3026 = vmatmul.mubr.bf16.gmra.mrb[48].mxu1 %v6974_v54  ;;  %v1927_v55 = vshrl.u32 %v9276_v59, 16  ;;  %v1930_v46 = vshll.u32 %v9276_v59, 16  ;;  %v6991_v19 = vcombine.low %v1911_v37, %v1920_v18  ;;  %7705 = vmatmul.mubr.bf16.gmra.mrb[52].mxu0 %v7001_v3 }
 0x1d4   : >> { %v1558_v41 = vrot.slane %v1557_v36, 4  ;;  %v6928_v5 = vrot.slane %v1922_v10, 11  ;;  %v1936_v51 = vshrl.u32 %v9282_v25, 16  ;;  %v1939_v26 = vshll.u32 %v9282_v25, 16 }
 0x1d5   : >> { %v1563_v8 = vrot.slane %v1562_v27, 4  ;;  %v1929_v28 = vrot.slane %v1927_v55, 7  ;;  %v7002_v45 = vcombine.low %v9044_v61, %v9050_v58  ;;  %3033 = vmatprep.mubr.bf16.mxu1 %v6991_v19  ;;  %v1569_v11 = vrot.slane %v1284_v57, 4  ;;  %v9300_v58 = vld [vmem:[#allocation2 + $0xc4] sm:$0xf] }
 0x1d6   : >> { %v1560_v1 = vsel %vm8817_vm10, %v1558_v41, %v1559_v39  ;;  %v1570_v63 = vrot.slane %v1287_v47, 5  ;;  %v1938_v61 = vrot.slane %v1936_v51, 7  ;;  %v11345_v39 = vshll.u32 %v9132_v52, 16  ;;  %v9306_v57 = vld [vmem:[#allocation2 + $0xc8] sm:$0xf] }
 0x1d7   : >> { %v1568_v42 = vsel %vm8817_vm10, %v1563_v8, %v1567_v56  ;;  %v1932_v0 = vor.u32 %v1930_v46, %v1929_v28  ;;  %v1934_v14 = vrot.slane %v1929_v28, 4  ;;  %7708 = vmatprep.mubr.bf16.mxu0 %v7002_v45  ;;  %v11346_v54 = vshrl.u32 %v9132_v52, 16  ;;  %v1421_v51 = vld [vmem:[#allocation2 + $0xbc] sm:$0x1] }
 0x1d8   : >> { %v6975_v60 = vcombine.low %v1560_v1, %v1568_v42  ;;  %v1571_v48 = vor.u32 %v1570_v63, %v1569_v11  ;;  %v1573_v29 = vrot.slane %v11345_v39, 5  ;;  %v1579_v12 = vshll.u32 %v1420_v7, 16 }
 0x1d9   : >> { %v1575_v37 = vrot.slane %v11346_v54, 4  ;;  %v1933_v47 = vsel %vm8661_vm7, %v6928_v5, %v1932_v0  ;;  %v1941_v9 = vor.u32 %v1939_v26, %v1938_v61  ;;  %v7003_v20 = vcombine.low %v9091_v38, %v9093_v4 }
 0x1da   : >> { %v1944_v36 = vshrl.u32 %v1686_v34, 16  ;;  %v1572_v27 = vrot.slane %v1571_v48, 4  ;;  %v1581_v10 = vrot.slane %v1579_v12, 5  ;;  %v1949_v18 = vshrl.u32 %v9300_v58, 16  ;;  %v1689_v34 = vld [vmem:[#allocation2 + $0xd0] sm:$0x8] }
 0x1db   : >> { %v1576_v3 = vor.u32 %v1575_v37, %v1573_v29  ;;  %3034 = vmatmul.mubr.bf16.gmra.mrb[52].mxu1 %v6975_v60  ;;  %v1942_v52 = vsel %vm8661_vm7, %v1934_v14, %v1941_v9  ;;  %v1952_v55 = vshll.u32 %v9300_v58, 16  ;;  %v1958_v46 = vshrl.u32 %v9306_v57, 16  ;;  %7709 = vmatmul.mubr.bf16.gmra.mrb[56].mxu0 %v7003_v20  ;;  %v9328_v60 = vld [vmem:[#allocation2 + $0xd4] sm:$0xf]  ;;  %v9338_v37 = vld [vmem:[#allocation2 + $0xd8] sm:$0xf] }
 0x1dc   : >> { %v6929_v56 = vrot.slane %v1944_v36, 11  ;;  %v6992_v19 = vcombine.low %v1933_v47, %v1942_v52  ;;  %v1574_v41 = vsel %vm8817_vm10, %v1572_v27, %v1573_v29  ;;  %v1951_v4 = vrot.slane %v1949_v18, 7 }
 0x1dd   : >> { %v1577_v38 = vrot.slane %v1576_v3, 4  ;;  %v1960_v8 = vrot.slane %v1958_v46, 7  ;;  %v1961_v5 = vshll.u32 %v9306_v57, 16  ;;  %v7004_v28 = vcombine.low %v9138_v50, %v9141_v49 }
 0x1de   : >> { %v11347_v26 = vshrl.u32 %v9164_v6, 16  ;;  %3041 = vmatprep.mubr.bf16.mxu1 %v6992_v19  ;;  %v1954_v1 = vor.u32 %v1952_v55, %v1951_v4  ;;  %v1956_v42 = vrot.slane %v1951_v4, 4  ;;  %v11348_v11 = vshll.u32 %v9164_v6, 16  ;;  %v9353_v4 = vld [vmem:[#allocation2 + $0xe4] sm:$0xf] }
 0x1df   : >> { %v1582_v7 = vsel %vm8817_vm10, %v1577_v38, %v1581_v10  ;;  %v1963_v14 = vor.u32 %v1961_v5, %v1960_v8  ;;  %7712 = vmatprep.mubr.bf16.mxu0 %v7004_v28  ;;  %v11349_v50 = vshll.u32 %v9174_v53, 16  ;;  %v11350_v61 = vshrl.u32 %v9174_v53, 16  ;;  %v1692_v38 = vld [vmem:[#allocation2 + $0xe0] sm:$0x8] }
 0x1e0   : >> { %v1583_v45 = vrot.slane %v11347_v26, 4  ;;  %v1584_v63 = vrot.slane %v11348_v11, 5  ;;  %v6976_v0 = vcombine.low %v1574_v41, %v1582_v7  ;;  %v1955_v39 = vsel %vm8661_vm7, %v6929_v56, %v1954_v1 }
 0x1e1   : >> { %v1587_v49 = vrot.slane %v11349_v50, 5  ;;  %v1589_v48 = vrot.slane %v11350_v61, 4  ;;  %v1593_v54 = vshll.u32 %v1421_v51, 16  ;;  %v7005_v6 = vcombine.low %v9183_v62, %v9185_v31  ;;  %v1422_v31 = vld [vmem:[#allocation2 + $0xcc] sm:$0x1] }
 0x1e2   : >> { %v1585_v29 = vor.u32 %v1584_v63, %v1583_v45  ;;  %v1964_v12 = vsel %vm8661_vm7, %v1956_v42, %v1963_v14  ;;  %v1966_v9 = vshrl.u32 %v1689_v34, 16  ;;  %v1971_v20 = vshrl.u32 %v9328_v60, 16 }
 0x1e3   : >> { %v1590_v47 = vor.u32 %v1589_v48, %v1587_v49  ;;  %v6993_v36 = vcombine.low %v1955_v39, %v1964_v12  ;;  %v1595_v27 = vrot.slane %v1593_v54, 5  ;;  %v1974_v3 = vshll.u32 %v9328_v60, 16  ;;  %3042 = vmatmul.mubr.bf16.gmra.mrb[56].mxu1 %v6976_v0  ;;  %7713 = vmatmul.mubr.bf16.gmra.mrb[60].mxu0 %v7005_v6 }
 0x1e4   : >> { %v1586_v53 = vrot.slane %v1585_v29, 4  ;;  %v6930_v18 = vrot.slane %v1966_v9, 11  ;;  %v1973_v52 = vrot.slane %v1971_v20, 7  ;;  %v1980_v62 = vshrl.u32 %v9338_v37, 16  ;;  %v1423_v29 = vld [vmem:[#allocation2 + $0xdc] sm:$0x1] }
 0x1e5   : >> { %v1591_v10 = vrot.slane %v1590_v47, 4  ;;  %3049 = vmatprep.mubr.bf16.mxu1 %v6993_v36  ;;  %v1983_v55 = vshll.u32 %v9338_v37, 16  ;;  %v7006_v46 = vcombine.low %v9222_v35, %v9224_v24  ;;  %v11351_v19 = vor.u32 %v8654_v17, %v8651_v15  ;;  %v9361_v15 = vld [vmem:[#allocation2 + $0xe8] sm:$0xf]  ;;  %v1695_v9 = vld [vmem:[#allocation2 + $0xf0] sm:$0x8] }
 0x1e6   : >> { %v1588_v56 = vsel %vm8817_vm10, %v1586_v53, %v1587_v49  ;;  %v1976_v5 = vor.u32 %v1974_v3, %v1973_v52  ;;  %v1978_v28 = vrot.slane %v1973_v52, 4  ;;  %v1982_v51 = vrot.slane %v1980_v62, 7 }
 0x1e7   : >> { %v1600_v41 = vrot.slane %v11351_v19, 4  ;;  %v1596_v8 = vsel %vm8817_vm10, %v1591_v10, %v1595_v27  ;;  %v11352_v45 = vshll.u32 %v8616_v40, 16  ;;  %v1607_v1 = vshll.u32 %v1422_v31, 16  ;;  %7716 = vmatprep.mubr.bf16.mxu0 %v7006_v46  ;;  %v9386_v10 = vld [vmem:[#allocation2 + $0xf4] sm:$0xf] }
 0x1e8   : >> { %v6977_v26 = vcombine.low %v1588_v56, %v1596_v8  ;;  %v7007_v24 = vcombine.low %v9246_v2, %v9252_v30  ;;  %v1977_v17 = vsel %vm8661_vm7, %v6930_v18, %v1976_v5  ;;  %v1985_v35 = vor.u32 %v1983_v55, %v1982_v51  ;;  %v9390_v46 = vld [vmem:[#allocation2 + $0xf8] sm:$0xf] }
 0x1e9   : >> { %v1601_v7 = vrot.slane %v11352_v45, 5  ;;  %v1988_v42 = vshrl.u32 %v1692_v38, 16  ;;  %v1993_v11 = vshrl.u32 %v9353_v4, 16  ;;  %v1609_v34 = vrot.slane %v1607_v1, 5 }
 0x1ea   : >> { %v1996_v0 = vshll.u32 %v9353_v4, 16  ;;  %v1986_v2 = vsel %vm8661_vm7, %v1978_v28, %v1985_v35  ;;  %v2002_v50 = vshrl.u32 %v9361_v15, 16  ;;  %v2005_v48 = vshll.u32 %v9361_v15, 16 }
 0x1eb   : >> { %v1602_v63 = vsel %vm8817_vm10, %v1600_v41, %v1601_v7  ;;  %v1604_v40 = vor.u32 %v8658_v22, %v1601_v7  ;;  %v6931_v30 = vrot.slane %v1988_v42, 11  ;;  %v1995_v14 = vrot.slane %v1993_v11, 7  ;;  %3050 = vmatmul.mubr.bf16.gmra.mrb[60].mxu1 %v6977_v26  ;;  %7717 = vmatmul.mubr.bf16.gmra.mrb[64].mxu0 %v7007_v24  ;;  %v1424_v24 = vld [vmem:[#allocation2 + $0xec] sm:$0x1] }
 0x1ec   : >> { %v6994_v49 = vcombine.low %v1977_v17, %v1986_v2  ;;  %v7008_v39 = vcombine.low %v9276_v59, %v9282_v25  ;;  %v2004_v6 = vrot.slane %v2002_v50, 7  ;;  %v11353_v12 = vshrl.u32 %v8675_v33, 16 }
 0x1ed   : >> { %v1605_v61 = vrot.slane %v1604_v40, 4  ;;  %v1998_v22 = vor.u32 %v1996_v0, %v1995_v14  ;;  %v2000_v54 = vrot.slane %v1995_v14, 4  ;;  %v11354_v36 = vshll.u32 %v8675_v33, 16 }
 0x1ee   : >> { %v1611_v47 = vrot.slane %v11353_v12, 4  ;;  %3057 = vmatprep.mubr.bf16.mxu1 %v6994_v49  ;;  %v11355_v27 = vshll.u32 %v8681_v32, 16  ;;  %v11356_v59 = vshrl.u32 %v8681_v32, 16  ;;  %v2007_v62 = vor.u32 %v2005_v48, %v2004_v6  ;;  %7720 = vmatprep.mubr.bf16.mxu0 %v7008_v39 }
 0x1ef   : >> { %v1610_v20 = vsel %vm8817_vm10, %v1605_v61, %v1609_v34  ;;  %v1612_v53 = vrot.slane %v11354_v36, 5  ;;  %v1999_v52 = vsel %vm8661_vm7, %v6931_v30, %v1998_v22  ;;  %v1621_v31 = vshll.u32 %v1423_v29, 16  ;;  %v1699_v30 = vld [vmem:[#allocation2 + $0x104] sm:$0xf] }
 0x1f0   : >> { %v1615_v3 = vrot.slane %v11355_v27, 5  ;;  %v1617_v25 = vrot.slane %v11356_v59, 4  ;;  %v6978_v18 = vcombine.low %v1602_v63, %v1610_v20  ;;  %v2010_v33 = vshrl.u32 %v1695_v9, 16 }
 0x1f1   : >> { %v1613_v56 = vor.u32 %v1612_v53, %v1611_v47  ;;  %v2008_v19 = vsel %vm8661_vm7, %v2000_v54, %v2007_v62  ;;  %v1623_v32 = vrot.slane %v1621_v31, 5  ;;  %v2015_v41 = vshrl.u32 %v9386_v10, 16 }
 0x1f2   : >> { %v1618_v55 = vor.u32 %v1617_v25, %v1615_v3  ;;  %v2018_v38 = vshll.u32 %v9386_v10, 16  ;;  %v6995_v8 = vcombine.low %v1999_v52, %v2008_v19  ;;  %v7009_v51 = vcombine.low %v9300_v58, %v9306_v57  ;;  %v1698_v58 = vld [vmem:[#allocation2 + $0x100] sm:$0x8] }
 0x1f3   : >> { %v1614_v5 = vrot.slane %v1613_v56, 4  ;;  %v6932_v26 = vrot.slane %v2010_v33, 11  ;;  %v2017_v45 = vrot.slane %v2015_v41, 7  ;;  %v2024_v7 = vshrl.u32 %v9390_v46, 16  ;;  %3058 = vmatmul.mubr.bf16.gmra.mrb[64].mxu1 %v6978_v18  ;;  %v1425_v18 = vld [vmem:[#allocation2 + $0xfc] sm:$0x1] }
 0x1f4   : >> { %v1619_v28 = vrot.slane %v1618_v55, 4  ;;  %v2027_v1 = vshll.u32 %v9390_v46, 16  ;;  %v7010_v35 = vcombine.low %v9328_v60, %v9338_v37  ;;  %v11357_v42 = vshrl.u32 %v8729_v13, 16  ;;  %3065 = vmatprep.mubr.bf16.mxu1 %v6995_v8  ;;  %7721 = vmatmul.mubr.bf16.gmra.mrb[68].mxu0 %v7009_v51 }
 0x1f5   : >> { %v1616_v17 = vsel %vm8817_vm10, %v1614_v5, %v1615_v3  ;;  %v11358_v63 = vshll.u32 %v8729_v13, 16  ;;  %v2020_v34 = vor.u32 %v2018_v38, %v2017_v45  ;;  %v2022_v0 = vrot.slane %v2017_v45, 4  ;;  %v1700_v13 = vld [vmem:[#allocation2 + $0x108] sm:$0xf] }
 0x1f6   : >> { %v1625_v11 = vrot.slane %v11357_v42, 4  ;;  %v1624_v57 = vsel %vm8817_vm10, %v1619_v28, %v1623_v32  ;;  %v2026_v2 = vrot.slane %v2024_v7, 7  ;;  %v11359_v50 = vshll.u32 %v8738_v21, 16  ;;  %7724 = vmatprep.mubr.bf16.mxu0 %v7010_v35 }
 0x1f7   : >> { %v1626_v40 = vrot.slane %v11358_v63, 5  ;;  %v11360_v37 = vshrl.u32 %v8738_v21, 16  ;;  %v1635_v61 = vshll.u32 %v1424_v24, 16  ;;  %v2021_v48 = vsel %vm8661_vm7, %v6932_v26, %v2020_v34 }
 0x1f8   : >> { %v1629_v60 = vrot.slane %v11359_v50, 5  ;;  %v2029_v39 = vor.u32 %v2027_v1, %v2026_v2  ;;  %v2032_v29 = vshrl.u32 %v1698_v58, 16  ;;  %v6979_v22 = vcombine.low %v1616_v17, %v1624_v57 }
 0x1f9   : >> { %v1627_v14 = vor.u32 %v1626_v40, %v1625_v11  ;;  %v1631_v49 = vrot.slane %v11360_v37, 4  ;;  %v2037_v6 = vshrl.u32 %v1699_v30, 16  ;;  %v2040_v9 = vshll.u32 %v1699_v30, 16 }
 0x1fa   : >> { %v2030_v12 = vsel %vm8661_vm7, %v2022_v0, %v2029_v39  ;;  %v2046_v20 = vshrl.u32 %v1700_v13, 16  ;;  %v1637_v53 = vrot.slane %v1635_v61, 5  ;;  %v6933_v3 = vrot.slane %v2032_v29, 11 }
 0x1fb   : >> { %v1632_v54 = vor.u32 %v1631_v49, %v1629_v60  ;;  %v1628_v47 = vrot.slane %v1627_v14, 4  ;;  %v6996_v21 = vcombine.low %v2021_v48, %v2030_v12  ;;  %v2039_v27 = vrot.slane %v2037_v6, 7  ;;  %3066 = vmatmul.mubr.bf16.gmra.mrb[68].mxu1 %v6979_v22 }
 0x1fc   : >> { %v2048_v59 = vrot.slane %v2046_v20, 7  ;;  %v2049_v25 = vshll.u32 %v1700_v13, 16  ;;  %v11361_v52 = vshrl.u32 %v8794_v43, 16  ;;  %v7011_v31 = vcombine.low %v9353_v4, %v9361_v15 }
 0x1fd   : >> { %v1633_v36 = vrot.slane %v1632_v54, 4  ;;  %v2042_v56 = vor.u32 %v2040_v9, %v2039_v27  ;;  %v2044_v55 = vrot.slane %v2039_v27, 4  ;;  %v11362_v33 = vshll.u32 %v8794_v43, 16  ;;  %3073 = vmatprep.mubr.bf16.mxu1 %v6996_v21 }
 0x1fe   : >> { %v1639_v62 = vrot.slane %v11361_v52, 4  ;;  %v2051_v32 = vor.u32 %v2049_v25, %v2048_v59  ;;  %v7012_v41 = vcombine.low %v9386_v10, %v9390_v46  ;;  %v11363_v38 = vshll.u32 %v8796_v44, 16  ;;  %7725 = vmatmul.mubr.bf16.gmra.mrb[72].mxu0 %v7011_v31 }
 0x1ff   : >> { %v1640_v19 = vrot.slane %v11362_v33, 5  ;;  %v11364_v5 = vshrl.u32 %v8796_v44, 16  ;;  %v1630_v4 = vsel %vm8817_vm10, %v1628_v47, %v1629_v60  ;;  %v1638_v15 = vsel %vm8817_vm10, %v1633_v36, %v1637_v53 }
 0x200   : >> { %v1643_v8 = vrot.slane %v11363_v38, 5  ;;  %v1649_v51 = vshll.u32 %v1425_v18, 16  ;;  %v2043_v26 = vsel %vm8661_vm7, %v6933_v3, %v2042_v56  ;;  %v2052_v10 = vsel %vm8661_vm7, %v2044_v55, %v2051_v32  ;;  %7728 = vmatprep.mubr.bf16.mxu0 %v7012_v41 }
 0x201   : >> { %v1645_v28 = vrot.slane %v11364_v5, 4  ;;  %v1641_v43 = vor.u32 %v1640_v19, %v1639_v62  ;;  %v6980_v45 = vcombine.low %v1630_v4, %v1638_v15  ;;  %v6997_v44 = vcombine.low %v2043_v26, %v2052_v10 }
 0x202   : >> { %v1651_v24 = vrot.slane %v1649_v51, 5  ;;  %v7013_v17 = vcombine.low %v1699_v30, %v1700_v13 }
 0x203   : >> { %v1646_v46 = vor.u32 %v1645_v28, %v1643_v8  ;;  %v1642_v7 = vrot.slane %v1641_v43, 4  ;;  %3074 = vmatmul.mubr.bf16.gmra.mrb[72].mxu1 %v6980_v45  ;;  %v9466_v43 = vld [vmem:[%s2520_s25] ss:$0 sm:$0xff] }
 0x204   : >> { %3081 = vmatprep.mubr.bf16.mxu1 %v6997_v44 }
 0x205   : >> { %v1647_v1 = vrot.slane %v1646_v46, 4  ;;  %v1644_v35 = vsel %vm8817_vm10, %v1642_v7, %v1643_v8 }
 0x206   : >> { %7729 = vmatmul.mubr.bf16.gmra.mrb[76].mxu0 %v7013_v17 }
 0x207   : >> { %v1652_v42 = vsel %vm8817_vm10, %v1647_v1, %v1651_v24 }
 0x208   : >> { %v6981_v23 = vcombine.low %v1644_v35, %v1652_v42 }
 0x20b   : >> { %3082 = vmatmul.mubr.bf16.gmra.mrb[76].mxu1 %v6981_v23 }
 0x234   : >> { %v7476_v11 = vpop.f32.mrb[0].mxu1  ;;  %v7404_v63 = vpop.f32.mrb[0].mxu0 }
 0x235   : >> { %v7477_v40 = vpop.f32.mrb[1].mxu1  ;;  %v7405_v58 = vpop.f32.mrb[1].mxu0 }
 0x236   : >> { %v9442_v57 = vadd.f32 %v7477_v40, %v7476_v11  ;;  %v7479_v34 = vpop.f32.mrb[2].mxu1  ;;  %v7406_v0 = vadd.f32 %v7405_v58, %v7404_v63  ;;  %v7407_v2 = vpop.f32.mrb[2].mxu0 }
 0x237   : >> { %v7480_v30 = vpop.f32.mrb[3].mxu1  ;;  %v7408_v14 = vpop.f32.mrb[3].mxu0 }
 0x238   : >> { %v9444_v50 = vadd.f32 %v7480_v30, %v7479_v34  ;;  %v7409_v60 = vadd.f32 %v7408_v14, %v7407_v2  ;;  %v2803_v10 = vadd.f32 %v7406_v0, %v9466_v43 }
 0x23a   : >> { %v2806_v17 = vadd.f32 %v7409_v60, %v9466_v43 }
 0x23c   : >> { %v7482_v37 = vpop.f32.mrb[4].mxu1  ;;  %v7410_v16 = vpop.f32.mrb[4].mxu0 }
 0x23d   : >> { %v7483_v49 = vpop.f32.mrb[5].mxu1  ;;  %v7411_v61 = vpop.f32.mrb[5].mxu0 }
 0x23e   : >> { %v9446_v13 = vadd.f32 %v7483_v49, %v7482_v37  ;;  %v7485_v48 = vpop.f32.mrb[6].mxu1  ;;  %v7412_v39 = vadd.f32 %v7411_v61, %v7410_v16  ;;  %v7413_v29 = vpop.f32.mrb[6].mxu0 }
 0x23f   : >> { %v7486_v22 = vpop.f32.mrb[7].mxu1  ;;  %v7414_v54 = vpop.f32.mrb[7].mxu0 }
 0x240   : >> { %v9448_v6 = vadd.f32 %v7486_v22, %v7485_v48  ;;  %v7415_v12 = vadd.f32 %v7414_v54, %v7413_v29  ;;  %v2811_v0 = vadd.f32 %v7412_v39, %v9466_v43 }
 0x242   : >> { %v2814_v49 = vadd.f32 %v7415_v12, %v9466_v43 }
 0x244   : >> { %v7488_v47 = vpop.f32.mrb[8].mxu1  ;;  %v7416_v9 = vpop.f32.mrb[8].mxu0 }
 0x245   : >> { %v7489_v20 = vpop.f32.mrb[9].mxu1  ;;  %v7417_v21 = vpop.f32.mrb[9].mxu0 }
 0x246   : >> { %v9450_v36 = vadd.f32 %v7489_v20, %v7488_v47  ;;  %v7491_v53 = vpop.f32.mrb[10].mxu1  ;;  %v7418_v27 = vadd.f32 %v7417_v21, %v7416_v9  ;;  %v7419_v3 = vpop.f32.mrb[10].mxu0 }
 0x247   : >> { %v7492_v59 = vpop.f32.mrb[11].mxu1  ;;  %v7420_v25 = vpop.f32.mrb[11].mxu0 }
 0x248   : >> { %v9452_v18 = vadd.f32 %v7492_v59, %v7491_v53  ;;  %v7421_v52 = vadd.f32 %v7420_v25, %v7419_v3  ;;  %v2819_v3 = vadd.f32 %v7418_v27, %v9466_v43 }
 0x24c   : >> { %v7494_v62 = vpop.f32.mrb[12].mxu1  ;;  %v7422_v31 = vpop.f32.mrb[12].mxu0 }
 0x24d   : >> { %v7495_v56 = vpop.f32.mrb[13].mxu1  ;;  %v7423_v55 = vpop.f32.mrb[13].mxu0 }
 0x24e   : >> { %v9454_v33 = vadd.f32 %v7495_v56, %v7494_v62  ;;  %v7497_v19 = vpop.f32.mrb[14].mxu1  ;;  %v9456_v32 = vadd.f32 %v7423_v55, %v7422_v31  ;;  %v7425_v41 = vpop.f32.mrb[14].mxu0  ;;  %v2822_v31 = vadd.f32 %v7421_v52, %v9466_v43 }
 0x24f   : >> { %v7498_v38 = vpop.f32.mrb[15].mxu1  ;;  %v7426_v8 = vpop.f32.mrb[15].mxu0 }
 0x250   : >> { %v9458_v5 = vadd.f32 %v7498_v38, %v7497_v19  ;;  %v9460_v28 = vadd.f32 %v7426_v8, %v7425_v41 }
 0x254   : >> { %v7516_v4 = vpop.f32.mrb[16].mxu1  ;;  %v7428_v15 = vpop.f32.mrb[16].mxu0 }
 0x255   : >> { %v7517_v51 = vpop.f32.mrb[17].mxu1  ;;  %v7429_v26 = vpop.f32.mrb[17].mxu0 }
 0x256   : >> { %v7518_v46 = vadd.f32 %v7517_v51, %v7516_v4  ;;  %v7519_v45 = vpop.f32.mrb[18].mxu1  ;;  %v9469_v44 = vadd.f32 %v7429_v26, %v7428_v15  ;;  %v7431_v7 = vpop.f32.mrb[18].mxu0 }
 0x257   : >> { %v7520_v1 = vpop.f32.mrb[19].mxu1  ;;  %v7432_v24 = vpop.f32.mrb[19].mxu0 }
 0x258   : >> { %v7521_v35 = vadd.f32 %v7520_v1, %v7519_v45  ;;  %v9472_v42 = vadd.f32 %v7432_v24, %v7431_v7  ;;  %v9474_v23 = vadd.f32 %v7518_v46, %v2803_v10  ;;  %v2827_v10 = vadd.f32 %v9456_v32, %v9466_v43 }
 0x259   : >> { %v2830_v7 = vadd.f32 %v9460_v28, %v9466_v43 }
 0x25a   : >> { %v9476_v11 = vadd.f32 %v7521_v35, %v2806_v17 }
 0x25c   : >> { %v7522_v63 = vpop.f32.mrb[20].mxu1  ;;  %v7434_v40 = vpop.f32.mrb[20].mxu0 }
 0x25d   : >> { %v7523_v58 = vpop.f32.mrb[21].mxu1  ;;  %v7435_v34 = vpop.f32.mrb[21].mxu0 }
 0x25e   : >> { %v7524_v2 = vadd.f32 %v7523_v58, %v7522_v63  ;;  %v7525_v30 = vpop.f32.mrb[22].mxu1  ;;  %v9479_v14 = vadd.f32 %v7435_v34, %v7434_v40  ;;  %v7437_v37 = vpop.f32.mrb[22].mxu0 }
 0x25f   : >> { %v7526_v16 = vpop.f32.mrb[23].mxu1  ;;  %v7438_v60 = vpop.f32.mrb[23].mxu0 }
 0x260   : >> { %v7527_v61 = vadd.f32 %v7526_v16, %v7525_v30  ;;  %v9482_v48 = vadd.f32 %v7438_v60, %v7437_v37  ;;  %v9484_v29 = vadd.f32 %v7524_v2, %v2811_v0  ;;  %v2835_v30 = vadd.f32 %v9469_v44, %v9466_v43 }
 0x261   : >> { %v2838_v60 = vadd.f32 %v9472_v42, %v9466_v43 }
 0x262   : >> { %v9486_v22 = vadd.f32 %v7527_v61, %v2814_v49 }
 0x264   : >> { %v7440_v54 = vpop.f32.mrb[24].mxu0 }
 0x265   : >> { %v7441_v47 = vpop.f32.mrb[25].mxu0  ;;  %v7528_v9 = vpop.f32.mrb[24].mxu1 }
 0x266   : >> { %v9488_v39 = vadd.f32 %v7441_v47, %v7440_v54  ;;  %v7443_v20 = vpop.f32.mrb[26].mxu0  ;;  %v7529_v21 = vpop.f32.mrb[25].mxu1 }
 0x267   : >> { %v7444_v53 = vpop.f32.mrb[27].mxu0  ;;  %v7530_v59 = vadd.f32 %v7529_v21, %v7528_v9  ;;  %v7531_v25 = vpop.f32.mrb[26].mxu1 }
 0x268   : >> { %v9491_v12 = vadd.f32 %v7444_v53, %v7443_v20  ;;  %v7532_v62 = vpop.f32.mrb[27].mxu1 }
 0x269   : >> { %v7533_v56 = vadd.f32 %v7532_v62, %v7531_v25  ;;  %v9494_v55 = vadd.f32 %v7530_v59, %v2819_v3  ;;  %v2843_v25 = vadd.f32 %v9479_v14, %v9466_v43 }
 0x26b   : >> { %v9496_v19 = vadd.f32 %v7533_v56, %v2822_v31  ;;  %v2846_v56 = vadd.f32 %v9482_v48, %v9466_v43 }
 0x26c   : >> { %v7446_v41 = vpop.f32.mrb[28].mxu0 }
 0x26d   : >> { %v7447_v38 = vpop.f32.mrb[29].mxu0 }
 0x26e   : >> { %v9498_v8 = vadd.f32 %v7447_v38, %v7446_v41  ;;  %v7449_v4 = vpop.f32.mrb[30].mxu0 }
 0x26f   : >> { %v7450_v51 = vpop.f32.mrb[31].mxu0 }
 0x270   : >> { %v7534_v15 = vpop.f32.mrb[28].mxu1  ;;  %v9500_v26 = vadd.f32 %v7450_v51, %v7449_v4 }
 0x271   : >> { %v7535_v27 = vpop.f32.mrb[29].mxu1 }
 0x272   : >> { %v7536_v46 = vadd.f32 %v7535_v27, %v7534_v15  ;;  %v7537_v52 = vpop.f32.mrb[30].mxu1 }
 0x273   : >> { %v7538_v45 = vpop.f32.mrb[31].mxu1 }
 0x274   : >> { %v7539_v1 = vadd.f32 %v7538_v45, %v7537_v52  ;;  %v9506_v24 = vadd.f32 %v7536_v46, %v2827_v10 }
 0x276   : >> { %v9508_v17 = vadd.f32 %v7539_v1, %v2830_v7  ;;  %v2851_v7 = vadd.f32 %v9488_v39, %v9466_v43 }
 0x277   : >> { %v7452_v35 = vpop.f32.mrb[32].mxu0 }
 0x278   : >> { %v7453_v63 = vpop.f32.mrb[33].mxu0 }
 0x279   : >> { %v9510_v40 = vadd.f32 %v7453_v63, %v7452_v35  ;;  %v7455_v58 = vpop.f32.mrb[34].mxu0  ;;  %v2854_v63 = vadd.f32 %v9491_v12, %v9466_v43 }
 0x27a   : >> { %v7456_v0 = vpop.f32.mrb[35].mxu0 }
 0x27b   : >> { %v9512_v32 = vadd.f32 %v7456_v0, %v7455_v58 }
 0x27c   : >> { %v7540_v34 = vpop.f32.mrb[32].mxu1 }
 0x27d   : >> { %v7541_v2 = vpop.f32.mrb[33].mxu1 }
 0x27e   : >> { %v7542_v37 = vadd.f32 %v7541_v2, %v7540_v34  ;;  %v7543_v28 = vpop.f32.mrb[34].mxu1 }
 0x27f   : >> { %v7544_v16 = vpop.f32.mrb[35].mxu1 }
 0x280   : >> { %v7545_v49 = vadd.f32 %v7544_v16, %v7543_v28  ;;  %v9518_v61 = vadd.f32 %v7542_v37, %v2835_v30  ;;  %v7458_v54 = vpop.f32.mrb[36].mxu0 }
 0x281   : >> { %v7459_v9 = vpop.f32.mrb[37].mxu0 }
 0x282   : >> { %v9520_v47 = vadd.f32 %v7545_v49, %v2838_v60  ;;  %v9522_v20 = vadd.f32 %v7459_v9, %v7458_v54  ;;  %v7461_v21 = vpop.f32.mrb[38].mxu0  ;;  %v2859_v54 = vadd.f32 %v9498_v8, %v9466_v43 }
 0x283   : >> { %v7462_v53 = vpop.f32.mrb[39].mxu0 }
 0x284   : >> { %v9524_v3 = vadd.f32 %v7462_v53, %v7461_v21 }
 0x287   : >> { %v7546_v44 = vpop.f32.mrb[36].mxu1 }
 0x288   : >> { %v7547_v59 = vpop.f32.mrb[37].mxu1 }
 0x289   : >> { %v7548_v62 = vadd.f32 %v7547_v59, %v7546_v44  ;;  %v7549_v42 = vpop.f32.mrb[38].mxu1  ;;  %v2862_v44 = vadd.f32 %v9500_v26, %v9466_v43 }
 0x28a   : >> { %v7550_v31 = vpop.f32.mrb[39].mxu1 }
 0x28b   : >> { %v7551_v41 = vadd.f32 %v7550_v31, %v7549_v42  ;;  %v9530_v38 = vadd.f32 %v7548_v62, %v2843_v25 }
 0x28d   : >> { %v9532_v4 = vadd.f32 %v7551_v41, %v2846_v56  ;;  %v7464_v15 = vpop.f32.mrb[40].mxu0 }
 0x28e   : >> { %v7465_v51 = vpop.f32.mrb[41].mxu0 }
 0x28f   : >> { %v9534_v27 = vadd.f32 %v7465_v51, %v7464_v15  ;;  %v7467_v10 = vpop.f32.mrb[42].mxu0 }
 0x290   : >> { %v7468_v52 = vpop.f32.mrb[43].mxu0 }
 0x291   : >> { %v7552_v46 = vpop.f32.mrb[40].mxu1  ;;  %v9536_v14 = vadd.f32 %v7468_v52, %v7467_v10 }
 0x292   : >> { %v7553_v45 = vpop.f32.mrb[41].mxu1 }
 0x293   : >> { %v7554_v1 = vadd.f32 %v7553_v45, %v7552_v46  ;;  %v7555_v48 = vpop.f32.mrb[42].mxu1 }
 0x294   : >> { %v7556_v35 = vpop.f32.mrb[43].mxu1 }
 0x295   : >> { %v7557_v58 = vadd.f32 %v7556_v35, %v7555_v48  ;;  %v9542_v34 = vadd.f32 %v7554_v1, %v2851_v7  ;;  %v2867_v48 = vadd.f32 %v9510_v40, %v9466_v43 }
 0x296   : >> { %v7470_v0 = vpop.f32.mrb[44].mxu0 }
 0x297   : >> { %v9544_v2 = vadd.f32 %v7557_v58, %v2854_v63  ;;  %v7471_v30 = vpop.f32.mrb[45].mxu0 }
 0x298   : >> { %v9546_v37 = vadd.f32 %v7471_v30, %v7470_v0  ;;  %v7473_v28 = vpop.f32.mrb[46].mxu0 }
 0x299   : >> { %v7474_v16 = vpop.f32.mrb[47].mxu0 }
 0x29a   : >> { %v9548_v60 = vadd.f32 %v7474_v16, %v7473_v28 }
 0x29d   : >> { %v7558_v39 = vpop.f32.mrb[44].mxu1 }
 0x29e   : >> { %v7559_v49 = vpop.f32.mrb[45].mxu1  ;;  %v7702_v53 = vpop.f32.mrb[48].mxu0 }
 0x29f   : >> { %v7560_v9 = vadd.f32 %v7559_v49, %v7558_v39  ;;  %v7561_v12 = vpop.f32.mrb[46].mxu1  ;;  %v3133_v25 = vadd.f32 %v7702_v53, %v9484_v29  ;;  %v3124_v62 = vpop.f32.mrb[49].mxu0 }
 0x2a0   : >> { %v7562_v21 = vpop.f32.mrb[47].mxu1  ;;  %v3125_v31 = vadd.f32 %v3124_v62, %v9474_v23  ;;  %v7703_v56 = vpop.f32.mrb[50].mxu0 }
 0x2a1   : >> { %v7563_v59 = vadd.f32 %v7562_v21, %v7561_v12  ;;  %v9555_v42 = vadd.f32 %v7560_v9, %v2859_v54  ;;  %v3253_v41 = vmax.f32 %v3133_v25, 0.0  ;;  %v3136_v15 = vadd.f32 %v7703_v56, %v9486_v22  ;;  %v3127_v8 = vpop.f32.mrb[51].mxu0 }
 0x2a2   : >> { %v3251_v10 = vmax.f32 %v3125_v31, 0.0  ;;  %v3128_v46 = vadd.f32 %v3127_v8, %v9476_v11  ;;  %v2870_v11 = vadd.f32 %v9512_v32, %v9466_v43  ;;  %v2875_v56 = vadd.f32 %v9522_v20, %v9466_v43 }
 0x2a3   : >> { %v9559_v51 = vadd.f32 %v7563_v59, %v2862_v44  ;;  %v7334_v26 = vpack.c.bf16 %v3253_v41, %v3253_v41  ;;  %v3254_v45 = vmax.f32 %v3136_v15, 0.0 }
 0x2a4   : >> { %v7332_v29 = vpack.c.bf16 %v3251_v10, %v3251_v10  ;;  %v3252_v1 = vmax.f32 %v3128_v46, 0.0 }
 0x2a5   : >> { %3413 = vst [vmem:[#allocation2 + $0x24] sm:$0xf] %v7334_v26  ;;  %v7335_v63 = vpack.c.bf16 %v3254_v45, %v3254_v45 }
 0x2a6   : >> { %v7564_v52 = vpop.f32.mrb[48].mxu1  ;;  %3411 = vst [vmem:[#allocation2 + $0x14] sm:$0xf] %v7332_v29  ;;  %v7333_v58 = vpack.c.bf16 %v3252_v1, %v3252_v1  ;;  %v7706_v0 = vpop.f32.mrb[52].mxu0 }
 0x2a7   : >> { %v7565_v7 = vpop.f32.mrb[49].mxu1  ;;  %3414 = vst [vmem:[#allocation2 + $0x28] sm:$0xf] %v7335_v63  ;;  %v3149_v28 = vadd.f32 %v7706_v0, %v9506_v24  ;;  %v3140_v16 = vpop.f32.mrb[53].mxu0 }
 0x2a8   : >> { %v7566_v23 = vadd.f32 %v7565_v7, %v7564_v52  ;;  %v7567_v35 = vpop.f32.mrb[50].mxu1  ;;  %3412 = vst [vmem:[#allocation2 + $0x18] sm:$0xf] %v7333_v58  ;;  %v3141_v40 = vadd.f32 %v3140_v16, %v9494_v55  ;;  %v7707_v49 = vpop.f32.mrb[54].mxu0 }
 0x2a9   : >> { %v7568_v22 = vpop.f32.mrb[51].mxu1  ;;  %v3257_v54 = vmax.f32 %v3149_v28, 0.0  ;;  %v3152_v9 = vadd.f32 %v7707_v49, %v9508_v17  ;;  %v3143_v12 = vpop.f32.mrb[55].mxu0 }
 0x2aa   : >> { %v7569_v30 = vadd.f32 %v7568_v22, %v7567_v35  ;;  %v9567_v39 = vadd.f32 %v7566_v23, %v2867_v48  ;;  %v3255_v53 = vmax.f32 %v3141_v40, 0.0  ;;  %v3144_v32 = vadd.f32 %v3143_v12, %v9496_v19 }
 0x2ab   : >> { %v7338_v59 = vpack.c.bf16 %v3257_v54, %v3257_v54  ;;  %v3258_v25 = vmax.f32 %v3152_v9, 0.0  ;;  %v2878_v19 = vadd.f32 %v9524_v3, %v9466_v43 }
 0x2ac   : >> { %v9571_v21 = vadd.f32 %v7569_v30, %v2870_v11  ;;  %v7336_v62 = vpack.c.bf16 %v3255_v53, %v3255_v53  ;;  %v3256_v31 = vmax.f32 %v3144_v32, 0.0  ;;  %v2883_v30 = vadd.f32 %v9534_v27, %v9466_v43 }
 0x2ad   : >> { %3417 = vst [vmem:[#allocation2 + $0x44] sm:$0xf] %v7338_v59  ;;  %v7339_v15 = vpack.c.bf16 %v3258_v25, %v3258_v25 }
 0x2ae   : >> { %v7570_v44 = vpop.f32.mrb[52].mxu1  ;;  %3415 = vst [vmem:[#allocation2 + $0x34] sm:$0xf] %v7336_v62  ;;  %v7337_v8 = vpack.c.bf16 %v3256_v31, %v3256_v31  ;;  %v7710_v10 = vpop.f32.mrb[56].mxu0 }
 0x2af   : >> { %v7571_v24 = vpop.f32.mrb[53].mxu1  ;;  %3418 = vst [vmem:[#allocation2 + $0x48] sm:$0xf] %v7339_v15  ;;  %v3165_v52 = vadd.f32 %v7710_v10, %v9530_v38  ;;  %v3156_v26 = vpop.f32.mrb[57].mxu0 }
 0x2b0   : >> { %v7572_v55 = vadd.f32 %v7571_v24, %v7570_v44  ;;  %v7573_v41 = vpop.f32.mrb[54].mxu1  ;;  %3416 = vst [vmem:[#allocation2 + $0x38] sm:$0xf] %v7337_v8  ;;  %v3157_v20 = vadd.f32 %v3156_v26, %v9518_v61  ;;  %v7711_v7 = vpop.f32.mrb[58].mxu0 }
 0x2b1   : >> { %v7574_v17 = vpop.f32.mrb[55].mxu1  ;;  %v3261_v29 = vmax.f32 %v3165_v52, 0.0  ;;  %v3168_v1 = vadd.f32 %v7711_v7, %v9532_v4  ;;  %v3159_v48 = vpop.f32.mrb[59].mxu0 }
 0x2b2   : >> { %v7575_v46 = vadd.f32 %v7574_v17, %v7573_v41  ;;  %v3036_v45 = vadd.f32 %v7572_v55, %v2875_v56  ;;  %v3259_v35 = vmax.f32 %v3157_v20, 0.0  ;;  %v3160_v63 = vadd.f32 %v3159_v48, %v9520_v47 }
 0x2b3   : >> { %v7342_v3 = vpack.c.bf16 %v3261_v29, %v3261_v29  ;;  %v3262_v58 = vmax.f32 %v3168_v1, 0.0  ;;  %v2886_v47 = vadd.f32 %v9536_v14, %v9466_v43  ;;  %v2891_v17 = vadd.f32 %v9546_v37, %v9466_v43 }
 0x2b4   : >> { %v3039_v23 = vadd.f32 %v7575_v46, %v2878_v19  ;;  %v7340_v11 = vpack.c.bf16 %v3259_v35, %v3259_v35  ;;  %v3260_v38 = vmax.f32 %v3160_v63, 0.0 }
 0x2b5   : >> { %3421 = vst [vmem:[#allocation2 + $0x64] sm:$0xf] %v7342_v3  ;;  %v7343_v16 = vpack.c.bf16 %v3262_v58, %v3262_v58 }
 0x2b6   : >> { %v7576_v22 = vpop.f32.mrb[56].mxu1  ;;  %3419 = vst [vmem:[#allocation2 + $0x54] sm:$0xf] %v7340_v11  ;;  %v7341_v40 = vpack.c.bf16 %v3260_v38, %v3260_v38  ;;  %v7714_v49 = vpop.f32.mrb[60].mxu0 }
 0x2b7   : >> { %v7577_v0 = vpop.f32.mrb[57].mxu1  ;;  %3422 = vst [vmem:[#allocation2 + $0x68] sm:$0xf] %v7343_v16  ;;  %v3181_v9 = vadd.f32 %v7714_v49, %v9555_v42  ;;  %v3172_v12 = vpop.f32.mrb[61].mxu0 }
 0x2b8   : >> { %v7578_v61 = vadd.f32 %v7577_v0, %v7576_v22  ;;  %v7579_v28 = vpop.f32.mrb[58].mxu1  ;;  %3420 = vst [vmem:[#allocation2 + $0x58] sm:$0xf] %v7341_v40  ;;  %v3173_v27 = vadd.f32 %v3172_v12, %v9542_v34  ;;  %v7715_v32 = vpop.f32.mrb[62].mxu0 }
 0x2b9   : >> { %v7580_v4 = vpop.f32.mrb[59].mxu1  ;;  %v3265_v44 = vmax.f32 %v3181_v9, 0.0  ;;  %v3184_v59 = vadd.f32 %v7715_v32, %v9559_v51  ;;  %v3175_v25 = vpop.f32.mrb[63].mxu0 }
 0x2ba   : >> { %v7581_v54 = vadd.f32 %v7580_v4, %v7579_v28  ;;  %v3044_v53 = vadd.f32 %v7578_v61, %v2883_v30  ;;  %v3263_v62 = vmax.f32 %v3173_v27, 0.0  ;;  %v3176_v31 = vadd.f32 %v3175_v25, %v9544_v2 }
 0x2bb   : >> { %v7346_v14 = vpack.c.bf16 %v3265_v44, %v3265_v44  ;;  %v3266_v55 = vmax.f32 %v3184_v59, 0.0  ;;  %v2894_v2 = vadd.f32 %v9548_v60, %v9466_v43 }
 0x2bc   : >> { %v3047_v24 = vadd.f32 %v7581_v54, %v2886_v47  ;;  %v7344_v15 = vpack.c.bf16 %v3263_v62, %v3263_v62  ;;  %v3264_v42 = vmax.f32 %v3176_v31, 0.0 }
 0x2bd   : >> { %3425 = vst [vmem:[#allocation2 + $0x84] sm:$0xf] %v7346_v14  ;;  %v7347_v10 = vpack.c.bf16 %v3266_v55, %v3266_v55 }
 0x2be   : >> { %v7582_v56 = vpop.f32.mrb[60].mxu1  ;;  %3423 = vst [vmem:[#allocation2 + $0x74] sm:$0xf] %v7344_v15  ;;  %v7345_v19 = vpack.c.bf16 %v3264_v42, %v3264_v42  ;;  %v7718_v46 = vpop.f32.mrb[64].mxu0 }
 0x2bf   : >> { %v7583_v41 = vpop.f32.mrb[61].mxu1  ;;  %3426 = vst [vmem:[#allocation2 + $0x88] sm:$0xf] %v7347_v10  ;;  %v3197_v26 = vadd.f32 %v7718_v46, %v3036_v45  ;;  %v3188_v20 = vpop.f32.mrb[65].mxu0  ;;  %v2899_v45 = vadd.f32 %v9442_v57, %v9466_v43 }
 0x2c0   : >> { %v7584_v34 = vadd.f32 %v7583_v41, %v7582_v56  ;;  %v7585_v8 = vpop.f32.mrb[62].mxu1  ;;  %3424 = vst [vmem:[#allocation2 + $0x78] sm:$0xf] %v7345_v19  ;;  %v3189_v29 = vadd.f32 %v3188_v20, %v9567_v39  ;;  %v7719_v37 = vpop.f32.mrb[66].mxu0  ;;  %v2907_v41 = vadd.f32 %v9446_v13, %v9466_v43 }
 0x2c1   : >> { %v7586_v51 = vpop.f32.mrb[63].mxu1  ;;  %v3269_v1 = vmax.f32 %v3197_v26, 0.0  ;;  %v3200_v48 = vadd.f32 %v7719_v37, %v3039_v23  ;;  %v3191_v35 = vpop.f32.mrb[67].mxu0 }
 0x2c2   : >> { %v7587_v52 = vadd.f32 %v7586_v51, %v7585_v8  ;;  %v3052_v7 = vadd.f32 %v7584_v34, %v2891_v17  ;;  %v3267_v22 = vmax.f32 %v3189_v29, 0.0  ;;  %v3192_v3 = vadd.f32 %v3191_v35, %v9571_v21 }
 0x2c3   : >> { %v7350_v0 = vpack.c.bf16 %v3269_v1, %v3269_v1  ;;  %v3270_v11 = vmax.f32 %v3200_v48, 0.0  ;;  %v2902_v21 = vadd.f32 %v9444_v50, %v9466_v43 }
 0x2c4   : >> { %v3055_v63 = vadd.f32 %v7587_v52, %v2894_v2  ;;  %v7348_v38 = vpack.c.bf16 %v3267_v22, %v3267_v22  ;;  %v3268_v30 = vmax.f32 %v3192_v3, 0.0 }
 0x2c5   : >> { %3429 = vst [vmem:[#allocation2 + $0xa4] sm:$0xf] %v7350_v0  ;;  %v7351_v28 = vpack.c.bf16 %v3270_v11, %v3270_v11 }
 0x2c6   : >> { %v7588_v58 = vpop.f32.mrb[64].mxu1  ;;  %3427 = vst [vmem:[#allocation2 + $0x94] sm:$0xf] %v7348_v38  ;;  %v7349_v16 = vpack.c.bf16 %v3268_v30, %v3268_v30  ;;  %v2918_v30 = vadd.f32 %v9452_v18, %v9466_v43 }
 0x2c7   : >> { %v7589_v60 = vpop.f32.mrb[65].mxu1  ;;  %v7722_v4 = vpop.f32.mrb[68].mxu0  ;;  %3430 = vst [vmem:[#allocation2 + $0xa8] sm:$0xf] %v7351_v28 }
 0x2c8   : >> { %v7590_v61 = vadd.f32 %v7589_v60, %v7588_v58  ;;  %v7591_v39 = vpop.f32.mrb[66].mxu1  ;;  %v3213_v49 = vadd.f32 %v7722_v4, %v3052_v7  ;;  %v3204_v47 = vpop.f32.mrb[69].mxu0  ;;  %3428 = vst [vmem:[#allocation2 + $0x98] sm:$0xf] %v7349_v16 }
 0x2c9   : >> { %v7592_v23 = vpop.f32.mrb[67].mxu1  ;;  %v3205_v9 = vadd.f32 %v3204_v47, %v3044_v53  ;;  %v7723_v12 = vpop.f32.mrb[70].mxu0 }
 0x2ca   : >> { %v7593_v40 = vadd.f32 %v7592_v23, %v7591_v39  ;;  %v3060_v54 = vadd.f32 %v7590_v61, %v2899_v45  ;;  %v3273_v57 = vmax.f32 %v3213_v49, 0.0  ;;  %v3216_v27 = vadd.f32 %v7723_v12, %v3055_v63  ;;  %v3207_v32 = vpop.f32.mrb[71].mxu0 }
 0x2cb   : >> { %v3271_v59 = vmax.f32 %v3205_v9, 0.0  ;;  %v3208_v25 = vadd.f32 %v3207_v32, %v3047_v24  ;;  %v2910_v24 = vadd.f32 %v9448_v6, %v9466_v43  ;;  %v2915_v6 = vadd.f32 %v9450_v36, %v9466_v43 }
 0x2cc   : >> { %v3063_v44 = vadd.f32 %v7593_v40, %v2902_v21  ;;  %v7354_v31 = vpack.c.bf16 %v3273_v57, %v3273_v57  ;;  %v3274_v56 = vmax.f32 %v3216_v27, 0.0  ;;  %v2926_v32 = vadd.f32 %v9458_v5, %v9466_v43  ;;  %v3475_v5 = vld [vmem:[%s11267_s5] sm:$0xff] (%p1004_p4) }
 0x2cd   : >> { %v7352_v55 = vpack.c.bf16 %v3271_v59, %v3271_v59  ;;  %v3272_v50 = vmax.f32 %v3208_v25, 0.0 }
 0x2ce   : >> { %v7594_v62 = vpop.f32.mrb[68].mxu1  ;;  %3433 = vst [vmem:[#allocation2 + $0xc4] sm:$0xf] %v7354_v31  ;;  %v7355_v53 = vpack.c.bf16 %v3274_v56, %v3274_v56 }
 0x2cf   : >> { %v7595_v14 = vpop.f32.mrb[69].mxu1  ;;  %3431 = vst [vmem:[#allocation2 + $0xb4] sm:$0xf] %v7352_v55  ;;  %v7353_v34 = vpack.c.bf16 %v3272_v50, %v3272_v50 }
 0x2d0   : >> { %v7596_v15 = vadd.f32 %v7595_v14, %v7594_v62  ;;  %v7597_v42 = vpop.f32.mrb[70].mxu1  ;;  %3434 = vst [vmem:[#allocation2 + $0xc8] sm:$0xf] %v7355_v53 }
 0x2d1   : >> { %v7598_v17 = vpop.f32.mrb[71].mxu1  ;;  %v7726_v8 = vpop.f32.mrb[72].mxu0  ;;  %3432 = vst [vmem:[#allocation2 + $0xb8] sm:$0xf] %v7353_v34 }
 0x2d2   : >> { %v7599_v10 = vadd.f32 %v7598_v17, %v7597_v42  ;;  %v3068_v51 = vadd.f32 %v7596_v15, %v2907_v41  ;;  %v3220_v19 = vpop.f32.mrb[73].mxu0  ;;  %v3483_v41 = vld [vmem:[%s11267_s5 + $0x40] sm:$0xff] (%p1004_p4)  ;;  %v11365_v15 = vmov (%p1004_p4), 0  }
 0x2d3   : >> { %v3221_v46 = vadd.f32 %v3220_v19, %v3060_v54  ;;  %v7727_v2 = vpop.f32.mrb[74].mxu0  ;;  %v2923_v54 = vadd.f32 %v9454_v33, %v9466_v43  ;;  %v3479_v43 = vld [vmem:[%s11267_s5 + $0x20] sm:$0xff] (%p1004_p4)  ;;  %4029 = vmatprep.mubr.bf16.mxu1 (%p1004_p4), %v11365_v15  ;;  %4415 = vmatprep.mubr.bf16.mxu0 (%p1004_p4), %v11365_v15 }
 0x2d4   : >> { %v3229_v52 = vadd.f32 %v7726_v8, %v3068_v51  ;;  %v3071_v13 = vadd.f32 %v7599_v10, %v2910_v24  ;;  %v3223_v26 = vpop.f32.mrb[75].mxu0  ;;  %v7105_v42 = vcombine.high (%p1004_p4), %v3475_v5, %v3479_v43  ;;  %v7104_v53 = vcombine.low (%p1004_p4), %v3475_v5, %v3479_v43  ;;  %v3487_v17 = vld [vmem:[%s11267_s5 + $0x60] sm:$0xff] (%p1004_p4) }
 0x2d5   : >> { %v3275_v20 = vmax.f32 %v3221_v46, 0.0  ;;  %v3224_v7 = vadd.f32 %v3223_v26, %v3063_v44  ;;  %v7113_v34 = vcombine.high (%p1004_p4), %v3483_v41, %v3487_v17  ;;  %v3491_v8 = vld [vmem:[%s11267_s5 + $0x80] sm:$0xff] (%p1004_p4)  ;;  %v7112_v10 = vcombine.low (%p1004_p4), %v3483_v41, %v3487_v17  ;;  %v9729_v17 = vld [vmem:[#allocation2 + $0x54] sm:$0xff] (%p1004_p4)  }
 0x2d6   : >> { %v7600_v29 = vpop.f32.mrb[72].mxu1  ;;  %v3277_v37 = vmax.f32 %v3229_v52, 0.0  ;;  %v3232_v1 = vadd.f32 %v7727_v2, %v3071_v13  ;;  %v3495_v24 = vld [vmem:[%s11267_s5 + $0xa0] sm:$0xff] (%p1004_p4)  ;;  %3997 = vmatprep.subr.bf16.mxu1 (%p1004_p4), %v7105_v42 }
 0x2d7   : >> { %v7601_v48 = vpop.f32.mrb[73].mxu1  ;;  %v7356_v35 = vpack.c.bf16 %v3275_v20, %v3275_v20  ;;  %v3276_v63 = vmax.f32 %v3224_v7, 0.0  ;;  %3998 = vmatpush1.bf16.msra.mxu1 (%p1004_p4), %v7104_v53  ;;  %v7121_v51 = vcombine.high (%p1004_p4), %v3491_v8, %v3495_v24  ;;  %v3499_v19 = vld [vmem:[%s11267_s5 + $0xc0] sm:$0xff] (%p1004_p4)  ;;  %v7120_v2 = vcombine.low (%p1004_p4), %v3491_v8, %v3495_v24  ;;  %v9737_v8 = vld [vmem:[#allocation2 + $0x74] sm:$0xff] (%p1004_p4)  }
 0x2d8   : >> { %v7358_v22 = vpack.c.bf16 %v3277_v37, %v3277_v37  ;;  %v7602_v3 = vadd.f32 %v7601_v48, %v7600_v29  ;;  %v7603_v58 = vpop.f32.mrb[74].mxu1  ;;  %v3278_v0 = vmax.f32 %v3232_v1, 0.0  ;;  %3999 = vmatprep.subr.bf16.mxu1 (%p1004_p4), %v7113_v34  ;;  %v3503_v46 = vld [vmem:[%s11267_s5 + $0xe0] sm:$0xff] (%p1004_p4) }
 0x2d9   : >> { %3435 = vst [vmem:[#allocation2 + $0xd4] sm:$0xf] %v7356_v35  ;;  %v7604_v11 = vpop.f32.mrb[75].mxu1  ;;  %v7357_v60 = vpack.c.bf16 %v3276_v63, %v3276_v63  ;;  %v7730_v38 = vpop.f32.mrb[76].mxu0  ;;  %v7129_v52 = vcombine.high (%p1004_p4), %v3499_v19, %v3503_v46  ;;  %v3507_v13 = vld [vmem:[%s11267_s5 + $0x100] sm:$0xff] (%p1004_p4)  ;;  %v7128_v20 = vcombine.low (%p1004_p4), %v3499_v19, %v3503_v46 }
 0x2da   : >> { %3437 = vst [vmem:[#allocation2 + $0xe4] sm:$0xf] %v7358_v22  ;;  %v7359_v45 = vpack.c.bf16 %v3278_v0, %v3278_v0  ;;  %v7605_v61 = vadd.f32 %v7604_v11, %v7603_v58  ;;  %v3076_v39 = vadd.f32 %v7602_v3, %v2915_v6  ;;  %v3236_v28 = vpop.f32.mrb[77].mxu0  ;;  %v3511_v26 = vld [vmem:[%s11267_s5 + $0x120] sm:$0xff] (%p1004_p4) }
 0x2db   : >> { %3436 = vst [vmem:[#allocation2 + $0xd8] sm:$0xf] %v7357_v60  ;;  %v7731_v23 = vpop.f32.mrb[78].mxu0  ;;  %4000 = vmatpush1.bf16.msra.mxu1 (%p1004_p4), %v7112_v10  ;;  %v7137_v7 = vcombine.high (%p1004_p4), %v3507_v13, %v3511_v26  ;;  %v3515_v29 = vld [vmem:[%s11267_s5 + $0x140] sm:$0xff] (%p1004_p4)  ;;  %v7136_v1 = vcombine.low (%p1004_p4), %v3507_v13, %v3511_v26  ;;  %v3476_v60 = vld [vmem:[%s11267_s5 + $0x8] sm:$0xff] (%p1004_p4)  ;;  %v3477_v10 = vld [vmem:[%s11267_s5 + $0x10] sm:$0xff] (%p1004_p4) }
 0x2dc   : >> { %3438 = vst [vmem:[#allocation2 + $0xe8] sm:$0xf] %v7359_v45  ;;  %v3237_v36 = vadd.f32 %v3236_v28, %v3076_v39  ;;  %v3079_v16 = vadd.f32 %v7605_v61, %v2918_v30  ;;  %v3239_v4 = vpop.f32.mrb[79].mxu0  ;;  %4001 = vmatprep.subr.bf16.mxu1 (%p1004_p4), %v7121_v51  ;;  %v3519_v37 = vld [vmem:[%s11267_s5 + $0x160] sm:$0xff] (%p1004_p4)  ;;  %v3484_v45 = vld [vmem:[%s11267_s5 + $0x48] sm:$0xff] (%p1004_p4)  ;;  %v9677_v39 = vld [vmem:[#allocation2 + $0x14] sm:$0xff] (%p1004_p4)  }
 0x2dd   : > { %v7145_v48 = vcombine.high (%p1004_p4), %v3515_v29, %v3519_v37  ;;  %v3523_v35 = vld [vmem:[%s11267_s5 + $0x180] sm:$0xff] (%p1004_p4)  ;;  %v7144_v6 = vcombine.low (%p1004_p4), %v3515_v29, %v3519_v37  ;;  %v3488_v61 = vld [vmem:[%s11267_s5 + $0x68] sm:$0xff] (%p1004_p4)  ;;  %v3481_v51 = vld [vmem:[%s11267_s5 + $0x30] sm:$0xff] (%p1004_p4) }
 0x2de   : >> { %v7606_v21 = vpop.f32.mrb[76].mxu1  ;;  %v3279_v40 = vmax.f32 %v3237_v36, 0.0  ;;  %v3240_v49 = vadd.f32 %v3239_v4, %v3079_v16  ;;  %v3527_v63 = vld [vmem:[%s11267_s5 + $0x1a0] sm:$0xff] (%p1004_p4)  ;;  %v3492_v36 = vld [vmem:[%s11267_s5 + $0x88] sm:$0xff] (%p1004_p4)  ;;  %v7115_v4 = vcombine.high (%p1004_p4), %v3484_v45, %v3488_v61  ;;  %v7109_v19 = vcombine.high (%p1004_p4), %v3477_v10, %v3481_v51  ;;  %v3489_v13 = vld [vmem:[%s11267_s5 + $0x70] sm:$0xff] (%p1004_p4) }
 0x2df   : >> { %v7607_v47 = vpop.f32.mrb[77].mxu1  ;;  %4002 = vmatpush1.bf16.msra.mxu1 (%p1004_p4), %v7120_v2  ;;  %v7153_v22 = vcombine.high (%p1004_p4), %v3523_v35, %v3527_v63  ;;  %v3531_v3 = vld [vmem:[%s11267_s5 + $0x1c0] sm:$0xff] (%p1004_p4)  ;;  %v7152_v0 = vcombine.low (%p1004_p4), %v3523_v35, %v3527_v63  ;;  %v3496_v16 = vld [vmem:[%s11267_s5 + $0xa8] sm:$0xff] (%p1004_p4)  ;;  %v7108_v46 = vcombine.low (%p1004_p4), %v3477_v10, %v3481_v51  ;;  %v9751_v2 = vld [vmem:[#allocation2 + $0x94] sm:$0xff] (%p1004_p4)  }
 0x2e0   : >> { %v7608_v9 = vadd.f32 %v7607_v47, %v7606_v21  ;;  %v7360_v18 = vpack.c.bf16 %v3279_v40, %v3279_v40  ;;  %v7609_v12 = vpop.f32.mrb[78].mxu1  ;;  %v3280_v57 = vmax.f32 %v3240_v49, 0.0  ;;  %4003 = vmatprep.subr.bf16.mxu1 (%p1004_p4), %v7129_v52  ;;  %v3535_v58 = vld [vmem:[%s11267_s5 + $0x1e0] sm:$0xff] (%p1004_p4)  ;;  %v7114_v21 = vcombine.low (%p1004_p4), %v3484_v45, %v3488_v61  ;;  %v3500_v40 = vld [vmem:[%s11267_s5 + $0xc8] sm:$0xff] (%p1004_p4)  ;;  %4383 = vmatprep.subr.bf16.mxu0 (%p1004_p4), %v7109_v19  ;;  %v3485_v52 = vld [vmem:[%s11267_s5 + $0x50] sm:$0xff] (%p1004_p4) }
 0x2e1   : >> { %v7610_v27 = vpop.f32.mrb[79].mxu1  ;;  %v7161_v11 = vcombine.high (%p1004_p4), %v3531_v3, %v3535_v58  ;;  %v7160_v30 = vcombine.low (%p1004_p4), %v3531_v3, %v3535_v58  ;;  %v3504_v49 = vld [vmem:[%s11267_s5 + $0xe8] sm:$0xff] (%p1004_p4)  ;;  %4384 = vmatpush1.bf16.msra.mxu0 (%p1004_p4), %v7108_v46  ;;  %v7117_v26 = vcombine.high (%p1004_p4), %v3485_v52, %v3489_v13  ;;  %v3497_v29 = vld [vmem:[%s11267_s5 + $0xb0] sm:$0xff] (%p1004_p4)  ;;  %v3494_v10 = vld [vmem:[%s11267_s5 + $0x98] sm:$0xff] (%p1004_p4) }
 0x2e2   : >> { %v3084_v44 = vadd.f32 %v7608_v9, %v2923_v54  ;;  %3439 = vst [vmem:[#allocation2 + $0xf4] sm:$0xf] %v7360_v18  ;;  %v7611_v59 = vadd.f32 %v7610_v27, %v7609_v12  ;;  %v7361_v25 = vpack.c.bf16 %v3280_v57, %v3280_v57  ;;  %v9693_v47 = vld [vmem:[#allocation2 + $0x24] sm:$0xff] (%p1004_p4)   ;;  %v7123_v54 = vcombine.high (%p1004_p4), %v3492_v36, %v3496_v16  ;;  %v3501_v35 = vld [vmem:[%s11267_s5 + $0xd0] sm:$0xff] (%p1004_p4)  ;;  %v3498_v51 = vld [vmem:[%s11267_s5 + $0xb8] sm:$0xff] (%p1004_p4) }
 0x2e3   : > { %4004 = vmatpush1.bf16.msra.mxu1 (%p1004_p4), %v7128_v20  ;;  %v7122_v9 = vcombine.low (%p1004_p4), %v3492_v36, %v3496_v16  ;;  %v3508_v18 = vld [vmem:[%s11267_s5 + $0x108] sm:$0xff] (%p1004_p4)  ;;  %v7131_v57 = vcombine.high (%p1004_p4), %v3500_v40, %v3504_v49  ;;  %v7130_v27 = vcombine.low (%p1004_p4), %v3500_v40, %v3504_v49  ;;  %v7116_v20 = vcombine.low (%p1004_p4), %v3485_v52, %v3489_v13  ;;  %v3505_v63 = vld [vmem:[%s11267_s5 + $0xf0] sm:$0xff] (%p1004_p4)  ;;  %v3502_v52 = vld [vmem:[%s11267_s5 + $0xd8] sm:$0xff] (%p1004_p4) }
 0x2e4   : >> { %v3245_v62 = vadd.f32 %v7730_v38, %v3084_v44  ;;  %v3087_v31 = vadd.f32 %v7611_v59, %v2926_v32  ;;  %3440 = vst [vmem:[#allocation2 + $0xf8] sm:$0xf] %v7361_v25  ;;  %4005 = vmatprep.subr.bf16.mxu1 (%p1004_p4), %v7137_v7  ;;  %v3480_v38 = vld [vmem:[%s11267_s5 + $0x28] sm:$0xff] (%p1004_p4)  ;;  %v9709_v59 = vld [vmem:[#allocation2 + $0x34] sm:$0xff] (%p1004_p4)   ;;  %4385 = vmatprep.subr.bf16.mxu0 (%p1004_p4), %v7117_v26 }
 0x2e5   : > { %v7107_v28 = vcombine.high (%p1004_p4), %v3476_v60, %v3480_v38  ;;  %v3512_v12 = vld [vmem:[%s11267_s5 + $0x128] sm:$0xff] (%p1004_p4)  ;;  %4386 = vmatpush1.bf16.msra.mxu0 (%p1004_p4), %v7116_v20  ;;  %v3493_v7 = vld [vmem:[%s11267_s5 + $0x90] sm:$0xff] (%p1004_p4)  ;;  %v7127_v46 = vcombine.high (%p1004_p4), %v3494_v10, %v3498_v51  ;;  %v3506_v13 = vld [vmem:[%s11267_s5 + $0xf8] sm:$0xff] (%p1004_p4)  ;;  %v7126_v20 = vcombine.low (%p1004_p4), %v3494_v10, %v3498_v51 }
 0x2e6   : >> { %v3281_v56 = vmax.f32 %v3245_v62, 0.0  ;;  %v3248_v14 = vadd.f32 %v7731_v23, %v3087_v31  ;;  %1006 = sbr.rel (!%p1004_p4) target bundleno = 317 (0x13d), region = 96  ;;  %v7106_v23 = vcombine.low (%p1004_p4), %v3476_v60, %v3480_v38  ;;  %v3516_v32 = vld [vmem:[%s11267_s5 + $0x148] sm:$0xff] (%p1004_p4)  ;;  %v7139_v25 = vcombine.high (%p1004_p4), %v3508_v18, %v3512_v12  ;;  %v3509_v3 = vld [vmem:[%s11267_s5 + $0x110] sm:$0xff] (%p1004_p4) }
 0x2e7   : > { %4006 = vmatpush1.bf16.msra.mxu1 (%p1004_p4), %v7136_v1  ;;  %v3520_v44 = vld [vmem:[%s11267_s5 + $0x168] sm:$0xff] (%p1004_p4)  ;;  %v7138_v62 = vcombine.low (%p1004_p4), %v3508_v18, %v3512_v12  ;;  %v7125_v37 = vcombine.high (%p1004_p4), %v3493_v7, %v3497_v29  ;;  %v7124_v1 = vcombine.low (%p1004_p4), %v3493_v7, %v3497_v29  ;;  %v3513_v58 = vld [vmem:[%s11267_s5 + $0x130] sm:$0xff] (%p1004_p4)  ;;  %v3478_v18 = vld [vmem:[%s11267_s5 + $0x18] sm:$0xff] (%p1004_p4)  ;;  %v7135_v7 = vcombine.high (%p1004_p4), %v3502_v52, %v3506_v13 }
 0x2e8   : >> { %v7362_v55 = vpack.c.bf16 %v3281_v56, %v3281_v56  ;;  %v3282_v50 = vmax.f32 %v3248_v14, 0.0  ;;  %4007 = vmatprep.subr.bf16.mxu1 (%p1004_p4), %v7145_v48  ;;  %v3524_v31 = vld [vmem:[%s11267_s5 + $0x188] sm:$0xff] (%p1004_p4)  ;;  %v7147_v14 = vcombine.high (%p1004_p4), %v3516_v32, %v3520_v44  ;;  %v9783_v60 = vld [vmem:[#allocation2 + $0xb4] sm:$0xff] (%p1004_p4)  }
 0x2e9   : > { %v3528_v56 = vld [vmem:[%s11267_s5 + $0x1a8] sm:$0xff] (%p1004_p4)  ;;  %4387 = vmatprep.subr.bf16.mxu0 (%p1004_p4), %v7125_v37  ;;  %v3517_v38 = vld [vmem:[%s11267_s5 + $0x150] sm:$0xff] (%p1004_p4)  ;;  %v3482_v12 = vld [vmem:[%s11267_s5 + $0x38] sm:$0xff] (%p1004_p4) }
 0x2ea   : >> { %3441 = vst [vmem:[#allocation2 + $0x104] sm:$0xf] %v7362_v55  ;;  %v7363_v33 = vpack.c.bf16 %v3282_v50, %v3282_v50  ;;  %v7146_v55 = vcombine.low (%p1004_p4), %v3516_v32, %v3520_v44  ;;  %v3532_v50 = vld [vmem:[%s11267_s5 + $0x1c8] sm:$0xff] (%p1004_p4)  ;;  %v7155_v43 = vcombine.high (%p1004_p4), %v3524_v31, %v3528_v56  ;;  %v7154_v41 = vcombine.low (%p1004_p4), %v3524_v31, %v3528_v56  ;;  %v3537_v40 = vld [vmem:[%s11267_s5 + $0x1f0] sm:$0xff] (%p1004_p4)  ;;  %v3510_v29 = vld [vmem:[%s11267_s5 + $0x118] sm:$0xff] (%p1004_p4) }
 0x2eb   : > { %4008 = vmatpush1.bf16.msra.mxu1 (%p1004_p4), %v7144_v6  ;;  %v9725_v5 = vld [vmem:[#allocation2 + $0x44] sm:$0xff] (%p1004_p4)   ;;  %4388 = vmatpush1.bf16.msra.mxu0 (%p1004_p4), %v7124_v1  ;;  %v7133_v6 = vcombine.high (%p1004_p4), %v3501_v35, %v3505_v63  ;;  %v9840_v31 = vld [vmem:[#allocation2 + $0xf4] sm:$0xff] (%p1004_p4)   ;;  %v7134_v1 = vcombine.low (%p1004_p4), %v3502_v52, %v3506_v13 }
 0x2ec   : >> { %3442 = vst [vmem:[#allocation2 + $0x108] sm:$0xf] %v7363_v33  ;;  %4009 = vmatprep.subr.bf16.mxu1 (%p1004_p4), %v7153_v22  ;;  %v3536_v33 = vld [vmem:[%s11267_s5 + $0x1e8] sm:$0xff] (%p1004_p4)  ;;  %v7132_v22 = vcombine.low (%p1004_p4), %v3501_v35, %v3505_v63  ;;  %v3514_v37 = vld [vmem:[%s11267_s5 + $0x138] sm:$0xff] (%p1004_p4) }
 0x2ed   : > { %v7163_v42 = vcombine.high %v3532_v50, %v3536_v33  ;;  %v7162_v53 = vcombine.low %v3532_v50, %v3536_v33  ;;  %v9733_v34 = vld [vmem:[#allocation2 + $0x64] sm:$0xff]   ;;  %4389 = vmatprep.subr.bf16.mxu0 %v7133_v6  ;;  %v3486_v50 = vld [vmem:[%s11267_s5 + $0x58] sm:$0xff]  ;;  %v7143_v35 = vcombine.high %v3510_v29, %v3514_v37 }
 0x2ee   : > { %v9741_v24 = vld [vmem:[#allocation2 + $0x84] sm:$0xff]   ;;  %v3490_v33 = vld [vmem:[%s11267_s5 + $0x78] sm:$0xff] }
 0x2ef   : > { %4010 = vmatpush1.bf16.msra.mxu1 %v7152_v0  ;;  %v9767_v48 = vld [vmem:[#allocation2 + $0xa4] sm:$0xff]   ;;  %4390 = vmatpush1.bf16.msra.mxu0 %v7132_v22  ;;  %v7141_v0 = vcombine.high %v3509_v3, %v3513_v58  ;;  %v7118_v19 = vcombine.low %v3486_v50, %v3490_v33  ;;  %v3518_v63 = vld [vmem:[%s11267_s5 + $0x158] sm:$0xff] }
 0x2f0   : > { %4011 = vmatprep.subr.bf16.mxu1 %v7161_v11  ;;  %v7140_v11 = vcombine.low %v3509_v3, %v3513_v58  ;;  %v8151_v32 = vld [vmem:[%s11269_s7 + $0x104] ss:$8 sps:$4 sm:$0xff]   ;;  %v8155_v56 = vld [vmem:[%s11269_s7 + $0x120] ss:$8 sps:$4 sm:$0xff]   ;;  %v3522_v6 = vld [vmem:[%s11267_s5 + $0x178] sm:$0xff]  ;;  %v7142_v3 = vcombine.low %v3510_v29, %v3514_v37 }
 0x2f1   : > { %4391 = vmatprep.subr.bf16.mxu0 %v7141_v0  ;;  %v9828_v44 = vld [vmem:[#allocation2 + $0xe4] sm:$0xff]   ;;  %v8164_v22 = vld [vmem:[%s11269_s7 + $0x150] ss:$8 sps:$4 sm:$0xff]   ;;  %v7151_v58 = vcombine.high %v3518_v63, %v3522_v6 }
 0x2f2   : > { %v8161_v26 = vld [vmem:[%s11269_s7 + $0x140] ss:$8 sps:$4 sm:$0xff]   ;;  %v3526_v0 = vld [vmem:[%s11267_s5 + $0x198] sm:$0xff] }
 0x2f3   : > { %4012 = vmatpush1.bf16.msra.mxu1 %v7160_v30  ;;  %4392 = vmatpush1.bf16.msra.mxu0 %v7140_v11  ;;  %v3521_v30 = vld [vmem:[%s11267_s5 + $0x170] sm:$0xff]  ;;  %v3530_v11 = vld [vmem:[%s11267_s5 + $0x1b8] sm:$0xff] }
 0x2f4   : > { %4190 = vmatprep.subr.bf16.mxu1 %v7107_v28  ;;  %v7149_v45 = vcombine.high %v3517_v38, %v3521_v30  ;;  %v7148_v61 = vcombine.low %v3517_v38, %v3521_v30  ;;  %v3525_v28 = vld [vmem:[%s11267_s5 + $0x190] sm:$0xff]  ;;  %v7150_v38 = vcombine.low %v3518_v63, %v3522_v6  ;;  %v7159_v30 = vcombine.high %v3526_v0, %v3530_v11 }
 0x2f5   : > { %v8212_v6 = vld [vmem:[%s11269_s7 + $0x1f0] ss:$8 sps:$4 sm:$0xff]  }
 0x2f6   : > { %4030 = vmatmul.mubr.bf16.vlgmr.msra.gmra.mrb[0].mxu1 %v9677_v39  ;;  %4393 = vmatprep.subr.bf16.mxu0 %v7149_v45  ;;  %v3534_v45 = vld [vmem:[%s11267_s5 + $0x1d8] sm:$0xff] }
 0x2f7   : > { %4191 = vmatpush1.bf16.msra.mxu1 %v7106_v23  ;;  %4039 = vmatprep.mubr.bf16.mxu1 %v11365_v15  ;;  %v3529_v23 = vld [vmem:[%s11267_s5 + $0x1b0] sm:$0xff] }
 0x2f8   : > { %4192 = vmatprep.subr.bf16.mxu1 %v7115_v4  ;;  %4394 = vmatpush1.bf16.msra.mxu0 %v7148_v61  ;;  %v7157_v36 = vcombine.high %v3525_v28, %v3529_v23  ;;  %v7156_v16 = vcombine.low %v3525_v28, %v3529_v23  ;;  %v9799_v4 = vld [vmem:[#allocation2 + $0xc4] sm:$0xff]   ;;  %v3538_v61 = vld [vmem:[%s11267_s5 + $0x1f8] sm:$0xff] }
 0x2f9   : > { %v8167_v28 = vld [vmem:[%s11269_s7 + $0x160] ss:$8 sps:$4 sm:$0xff]   ;;  %v8169_v23 = vld [vmem:[%s11269_s7 + $0x164] ss:$8 sps:$4 sm:$0xff]  }
 0x2fa   : > { %4395 = vmatprep.subr.bf16.mxu0 %v7157_v36  ;;  %v7158_v36 = vcombine.low %v3526_v0, %v3530_v11 }
 0x2fb   : > { %4193 = vmatpush1.bf16.msra.mxu1 %v7114_v21  ;;  %v3533_v21 = vld [vmem:[%s11267_s5 + $0x1d0] sm:$0xff] }
 0x2fc   : > { %4194 = vmatprep.subr.bf16.mxu1 %v7123_v54  ;;  %4396 = vmatpush1.bf16.msra.mxu0 %v7156_v16  ;;  %v7165_v49 = vcombine.high %v3533_v21, %v3537_v40  ;;  %v7164_v54 = vcombine.low %v3533_v21, %v3537_v40  ;;  %v7167_v16 = vcombine.high %v3534_v45, %v3538_v61  ;;  %v8170_v40 = vld [vmem:[%s11269_s7 + $0x170] ss:$8 sps:$4 sm:$0xff]  }
 0x2fd   : > { %v7166_v21 = vcombine.low %v3534_v45, %v3538_v61 }
 0x2fe   : > { %4040 = vmatmul.mubr.bf16.gmra.mrb[4].mxu1 %v9693_v47  ;;  %4397 = vmatprep.subr.bf16.mxu0 %v7165_v49  ;;  %v8172_v49 = vld [vmem:[%s11269_s7 + $0x174] ss:$8 sps:$4 sm:$0xff]  }
 0x2ff   : > { %4049 = vmatprep.mubr.bf16.mxu1 %v11365_v15  ;;  %4195 = vmatpush1.bf16.msra.mxu1 %v7122_v9  ;;  %v9810_v9 = vld [vmem:[#allocation2 + $0xd4] sm:$0xff]  }
 0x300   : > { %4196 = vmatprep.subr.bf16.mxu1 %v7131_v57  ;;  %4398 = vmatpush1.bf16.msra.mxu0 %v7164_v54  ;;  %v7111_v57 = vcombine.high %v3478_v18, %v3482_v12  ;;  %v8173_v54 = vld [vmem:[%s11269_s7 + $0x180] ss:$8 sps:$4 sm:$0xff]  }
 0x301   : > { %6126 = vmatprep.subr.bf16.mxu0 %v8151_v32  ;;  %v8181_v32 = vld [vmem:[%s11269_s7 + $0x1a4] ss:$8 sps:$4 sm:$0xff]  }
 0x303   : > { %4197 = vmatpush1.bf16.msra.mxu1 %v7130_v27  ;;  %4416 = vmatmul.mubr.bf16.vlgmr.msra.gmra.mrb[0].mxu0 %v9677_v39  ;;  %v8149_v27 = vld [vmem:[%s11269_s7 + $0x100] ss:$8 sps:$4 sm:$0xff]  }
 0x304   : > { %4198 = vmatprep.subr.bf16.mxu1 %v7139_v25  ;;  %4425 = vmatprep.mubr.bf16.mxu0 %v11365_v15  ;;  %v8152_v25 = vld [vmem:[%s11269_s7 + $0x110] ss:$8 sps:$4 sm:$0xff]  }
 0x305   : > { %6127 = vmatpush1.bf16.msra.mxu0 %v8149_v27  ;;  %v8179_v27 = vld [vmem:[%s11269_s7 + $0x1a0] ss:$8 sps:$4 sm:$0xff]  }
 0x306   : > { %4050 = vmatmul.mubr.bf16.gmra.mrb[8].mxu1 %v9709_v59 }
 0x307   : > { %4059 = vmatprep.mubr.bf16.mxu1 %v11365_v15  ;;  %4199 = vmatpush1.bf16.msra.mxu1 %v7138_v62  ;;  %v8154_v62 = vld [vmem:[%s11269_s7 + $0x114] ss:$8 sps:$4 sm:$0xff]  }
 0x308   : > { %4200 = vmatprep.subr.bf16.mxu1 %v7147_v14  ;;  %6128 = vmatprep.subr.bf16.mxu0 %v8154_v62  ;;  %v8157_v14 = vld [vmem:[%s11269_s7 + $0x124] ss:$8 sps:$4 sm:$0xff]   ;;  %v8184_v62 = vld [vmem:[%s11269_s7 + $0x1b4] ss:$8 sps:$4 sm:$0xff]  }
 0x309   : > { %6129 = vmatpush1.bf16.msra.mxu0 %v8152_v25  ;;  %v8182_v25 = vld [vmem:[%s11269_s7 + $0x1b0] ss:$8 sps:$4 sm:$0xff]  }
 0x30a   : > { %6130 = vmatprep.subr.bf16.mxu0 %v8157_v14  ;;  %v8187_v14 = vld [vmem:[%s11269_s7 + $0x1c4] ss:$8 sps:$4 sm:$0xff]  }
 0x30b   : > { %4201 = vmatpush1.bf16.msra.mxu1 %v7146_v55  ;;  %4426 = vmatmul.mubr.bf16.gmra.mrb[4].mxu0 %v9693_v47  ;;  %v9852_v55 = vld [vmem:[#allocation2 + $0x104] sm:$0xff]  }
 0x30c   : > { %4202 = vmatprep.subr.bf16.mxu1 %v7155_v43  ;;  %4435 = vmatprep.mubr.bf16.mxu0 %v11365_v15  ;;  %v8158_v43 = vld [vmem:[%s11269_s7 + $0x130] ss:$8 sps:$4 sm:$0xff]  }
 0x30d   : > { %6131 = vmatpush1.bf16.msra.mxu0 %v8155_v56  ;;  %v8185_v56 = vld [vmem:[%s11269_s7 + $0x1c0] ss:$8 sps:$4 sm:$0xff]  }
 0x30e   : > { %4060 = vmatmul.mubr.bf16.gmra.mrb[12].mxu1 %v9725_v5 }
 0x30f   : > { %4069 = vmatprep.mubr.bf16.mxu1 %v11365_v15  ;;  %4203 = vmatpush1.bf16.msra.mxu1 %v7154_v41  ;;  %v8160_v41 = vld [vmem:[%s11269_s7 + $0x134] ss:$8 sps:$4 sm:$0xff]  }
 0x310   : > { %4204 = vmatprep.subr.bf16.mxu1 %v7163_v42  ;;  %v7110_v42 = vcombine.low %v3478_v18, %v3482_v12  ;;  %6132 = vmatprep.subr.bf16.mxu0 %v8160_v41  ;;  %v8175_v18 = vld [vmem:[%s11269_s7 + $0x184] ss:$8 sps:$4 sm:$0xff]   ;;  %v8176_v12 = vld [vmem:[%s11269_s7 + $0x190] ss:$8 sps:$4 sm:$0xff]  }
 0x311   : > { %6133 = vmatpush1.bf16.msra.mxu0 %v8158_v43  ;;  %v8196_v43 = vld [vmem:[%s11269_s7 + $0x1d4] ss:$8 sps:$4 sm:$0xff]  }
 0x313   : > { %4205 = vmatpush1.bf16.msra.mxu1 %v7162_v53  ;;  %4436 = vmatmul.mubr.bf16.gmra.mrb[8].mxu0 %v9709_v59  ;;  %v7119_v53 = vcombine.high %v3486_v50, %v3490_v33  ;;  %v3541_v50 = vlaneseq  ;;  %v8194_v33 = vld [vmem:[%s11269_s7 + $0x1d0] ss:$8 sps:$4 sm:$0xff]  }
 0x314   : > { %4576 = vmatprep.subr.bf16.mxu1 %v7111_v57  ;;  %4445 = vmatprep.mubr.bf16.mxu0 %v11365_v15  ;;  %v8178_v57 = vld [vmem:[%s11269_s7 + $0x194] ss:$8 sps:$4 sm:$0xff]  }
 0x316   : > { %4070 = vmatmul.mubr.bf16.gmra.mrb[16].mxu1 %v9729_v17 }
 0x317   : > { %4079 = vmatprep.mubr.bf16.mxu1 %v11365_v15 }
 0x31b   : > { %4446 = vmatmul.mubr.bf16.gmra.mrb[12].mxu0 %v9725_v5 }
 0x31c   : > { %4455 = vmatprep.mubr.bf16.mxu0 %v11365_v15 }
 0x31e   : > { %4080 = vmatmul.mubr.bf16.gmra.mrb[20].mxu1 %v9733_v34 }
 0x31f   : > { %4089 = vmatprep.mubr.bf16.mxu1 %v11365_v15 }
 0x323   : > { %4456 = vmatmul.mubr.bf16.gmra.mrb[16].mxu0 %v9729_v17 }
 0x324   : > { %4465 = vmatprep.mubr.bf16.mxu0 %v11365_v15 }
 0x326   : > { %4090 = vmatmul.mubr.bf16.gmra.mrb[24].mxu1 %v9737_v8 }
 0x327   : > { %4099 = vmatprep.mubr.bf16.mxu1 %v11365_v15 }
 0x32b   : > { %4466 = vmatmul.mubr.bf16.gmra.mrb[20].mxu0 %v9733_v34 }
 0x32c   : > { %4475 = vmatprep.mubr.bf16.mxu0 %v11365_v15 }
 0x32e   : > { %4100 = vmatmul.mubr.bf16.gmra.mrb[28].mxu1 %v9741_v24 }
 0x32f   : > { %4109 = vmatprep.mubr.bf16.mxu1 %v11365_v15 }
 0x333   : > { %4476 = vmatmul.mubr.bf16.gmra.mrb[24].mxu0 %v9737_v8 }
 0x334   : > { %4485 = vmatprep.mubr.bf16.mxu0 %v11365_v15 }
 0x336   : > { %4110 = vmatmul.mubr.bf16.gmra.mrb[32].mxu1 %v9751_v2 }
 0x337   : > { %4119 = vmatprep.mubr.bf16.mxu1 %v11365_v15 }
 0x33b   : > { %4486 = vmatmul.mubr.bf16.gmra.mrb[28].mxu0 %v9741_v24 }
 0x33c   : > { %4495 = vmatprep.mubr.bf16.mxu0 %v11365_v15 }
 0x33e   : > { %4120 = vmatmul.mubr.bf16.gmra.mrb[36].mxu1 %v9767_v48 }
 0x33f   : > { %4129 = vmatprep.mubr.bf16.mxu1 %v11365_v15 }
 0x343   : > { %4496 = vmatmul.mubr.bf16.gmra.mrb[32].mxu0 %v9751_v2 }
 0x344   : > { %4505 = vmatprep.mubr.bf16.mxu0 %v11365_v15 }
 0x346   : > { %4130 = vmatmul.mubr.bf16.gmra.mrb[40].mxu1 %v9783_v60 }
 0x347   : > { %4139 = vmatprep.mubr.bf16.mxu1 %v11365_v15 }
 0x34b   : > { %4506 = vmatmul.mubr.bf16.gmra.mrb[36].mxu0 %v9767_v48 }
 0x34c   : > { %4515 = vmatprep.mubr.bf16.mxu0 %v11365_v15 }
 0x34e   : > { %4140 = vmatmul.mubr.bf16.gmra.mrb[44].mxu1 %v9799_v4 }
 0x34f   : > { %4149 = vmatprep.mubr.bf16.mxu1 %v11365_v15 }
 0x353   : > { %4516 = vmatmul.mubr.bf16.gmra.mrb[40].mxu0 %v9783_v60 }
 0x354   : > { %4525 = vmatprep.mubr.bf16.mxu0 %v11365_v15 }
 0x356   : > { %4150 = vmatmul.mubr.bf16.gmra.mrb[48].mxu1 %v9810_v9 }
 0x357   : > { %4159 = vmatprep.mubr.bf16.mxu1 %v11365_v15 }
 0x35b   : > { %4526 = vmatmul.mubr.bf16.gmra.mrb[44].mxu0 %v9799_v4 }
 0x35c   : > { %4535 = vmatprep.mubr.bf16.mxu0 %v11365_v15 }
 0x35e   : > { %4160 = vmatmul.mubr.bf16.gmra.mrb[52].mxu1 %v9828_v44 }
 0x35f   : > { %4169 = vmatprep.mubr.bf16.mxu1 %v11365_v15 }
 0x363   : > { %4536 = vmatmul.mubr.bf16.gmra.mrb[48].mxu0 %v9810_v9 }
 0x364   : > { %4545 = vmatprep.mubr.bf16.mxu0 %v11365_v15 }
 0x366   : > { %4170 = vmatmul.mubr.bf16.gmra.mrb[56].mxu1 %v9840_v31 }
 0x367   : > { %4179 = vmatprep.mubr.bf16.mxu1 %v11365_v15 }
 0x36b   : > { %4546 = vmatmul.mubr.bf16.gmra.mrb[52].mxu0 %v9828_v44 }
 0x36c   : > { %4555 = vmatprep.mubr.bf16.mxu0 %v11365_v15 }
 0x36e   : > { %4180 = vmatmul.mubr.bf16.gmra.mrb[60].mxu1 %v9852_v55 }
 0x36f   : > { %4222 = vmatprep.mubr.bf16.mxu1 %v11365_v15 }
 0x373   : > { %4556 = vmatmul.mubr.bf16.gmra.mrb[56].mxu0 %v9840_v31 }
 0x374   : > { %4565 = vmatprep.mubr.bf16.mxu0 %v11365_v15 }
 0x376   : > { %4223 = vmatmul.mubr.bf16.vlgmr.msra.gmra.mrb[64].mxu1 %v9677_v39  ;;  %v8163_v39 = vld [vmem:[%s11269_s7 + $0x144] ss:$8 sps:$4 sm:$0xff]  }
 0x377   : > { %4232 = vmatprep.mubr.bf16.mxu1 %v11365_v15  ;;  %4577 = vmatpush1.bf16.msra.mxu1 %v7110_v42 }
 0x378   : > { %4578 = vmatprep.subr.bf16.mxu1 %v7119_v53  ;;  %6134 = vmatprep.subr.bf16.mxu0 %v8163_v39 }
 0x379   : > { %6135 = vmatpush1.bf16.msra.mxu0 %v8161_v26 }
 0x37b   : > { %4579 = vmatpush1.bf16.msra.mxu1 %v7118_v19  ;;  %v8203_v19 = vld [vmem:[%s11269_s7 + $0x1e0] ss:$8 sps:$4 sm:$0xff]   ;;  %4566 = vmatmul.mubr.bf16.gmra.mrb[60].mxu0 %v9852_v55 }
 0x37c   : > { %4580 = vmatprep.subr.bf16.mxu1 %v7127_v46 }
 0x37e   : > { %4233 = vmatmul.mubr.bf16.gmra.mrb[68].mxu1 %v9693_v47  ;;  %v8166_v47 = vld [vmem:[%s11269_s7 + $0x154] ss:$8 sps:$4 sm:$0xff]  }
 0x37f   : > { %4242 = vmatprep.mubr.bf16.mxu1 %v11365_v15  ;;  %4581 = vmatpush1.bf16.msra.mxu1 %v7126_v20 }
 0x380   : > { %4582 = vmatprep.subr.bf16.mxu1 %v7135_v7  ;;  %6136 = vmatprep.subr.bf16.mxu0 %v8166_v47 }
 0x381   : > { %6137 = vmatpush1.bf16.msra.mxu0 %v8164_v22 }
 0x382   : > { %6138 = vmatprep.subr.bf16.mxu0 %v8169_v23 }
 0x383   : > { %4583 = vmatpush1.bf16.msra.mxu1 %v7134_v1  ;;  %v8214_v1 = vld [vmem:[%s11269_s7 + $0x1f4] ss:$8 sps:$4 sm:$0xff]  }
 0x384   : > { %4584 = vmatprep.subr.bf16.mxu1 %v7143_v35 }
 0x385   : > { %6139 = vmatpush1.bf16.msra.mxu0 %v8167_v28 }
 0x386   : > { %4243 = vmatmul.mubr.bf16.gmra.mrb[72].mxu1 %v9709_v59  ;;  %6140 = vmatprep.subr.bf16.mxu0 %v8172_v49  ;;  %v8223_v49 = vld [vmem:[%s11269_s7 + $0x204] ss:$8 sps:$4 sm:$0xff]  }
 0x387   : > { %4252 = vmatprep.mubr.bf16.mxu1 %v11365_v15  ;;  %4585 = vmatpush1.bf16.msra.mxu1 %v7142_v3 }
 0x388   : > { %4586 = vmatprep.subr.bf16.mxu1 %v7151_v58 }
 0x389   : > { %6141 = vmatpush1.bf16.msra.mxu0 %v8170_v40 }
 0x38a   : > { %6142 = vmatprep.subr.bf16.mxu0 %v8175_v18 }
 0x38b   : > { %4587 = vmatpush1.bf16.msra.mxu1 %v7150_v38 }
 0x38c   : > { %4588 = vmatprep.subr.bf16.mxu1 %v7159_v30 }
 0x38d   : > { %6143 = vmatpush1.bf16.msra.mxu0 %v8173_v54 }
 0x38e   : > { %4253 = vmatmul.mubr.bf16.gmra.mrb[76].mxu1 %v9725_v5  ;;  %6144 = vmatprep.subr.bf16.mxu0 %v8178_v57 }
 0x38f   : > { %4262 = vmatprep.mubr.bf16.mxu1 %v11365_v15  ;;  %4589 = vmatpush1.bf16.msra.mxu1 %v7158_v36 }
 0x390   : > { %4590 = vmatprep.subr.bf16.mxu1 %v7167_v16 }
 0x391   : > { %6145 = vmatpush1.bf16.msra.mxu0 %v8176_v12 }
 0x392   : > { %6146 = vmatprep.subr.bf16.mxu0 %v8181_v32 }
 0x393   : > { %4591 = vmatpush1.bf16.msra.mxu1 %v7166_v21 }
 0x395   : > { %6147 = vmatpush1.bf16.msra.mxu0 %v8179_v27 }
 0x396   : > { %4263 = vmatmul.mubr.bf16.gmra.mrb[80].mxu1 %v9729_v17  ;;  %6148 = vmatprep.subr.bf16.mxu0 %v8184_v62 }
 0x397   : > { %4272 = vmatprep.mubr.bf16.mxu1 %v11365_v15 }
 0x399   : > { %6149 = vmatpush1.bf16.msra.mxu0 %v8182_v25 }
 0x39a   : > { %6150 = vmatprep.subr.bf16.mxu0 %v8187_v14 }
 0x39d   : > { %6151 = vmatpush1.bf16.msra.mxu0 %v8185_v56 }
 0x39e   : > { %4273 = vmatmul.mubr.bf16.gmra.mrb[84].mxu1 %v9733_v34  ;;  %6152 = vmatprep.subr.bf16.mxu0 %v8196_v43 }
 0x39f   : > { %4282 = vmatprep.mubr.bf16.mxu1 %v11365_v15 }
 0x3a1   : > { %6153 = vmatpush1.bf16.msra.mxu0 %v8194_v33 }
 0x3a6   : > { %4283 = vmatmul.mubr.bf16.gmra.mrb[88].mxu1 %v9737_v8 }
 0x3a7   : > { %4292 = vmatprep.mubr.bf16.mxu1 %v11365_v15 }
 0x3ae   : > { %4293 = vmatmul.mubr.bf16.gmra.mrb[92].mxu1 %v9741_v24  ;;  %v8190_v24 = vld [vmem:[%s11269_s7 + $0x4] ss:$8 sps:$4 sm:$0xff]  }
 0x3af   : > { %4302 = vmatprep.mubr.bf16.mxu1 %v11365_v15  ;;  %5933 = vmatprep.subr.bf16.mxu1 %v8190_v24 }
 0x3b6   : > { %4303 = vmatmul.mubr.bf16.gmra.mrb[96].mxu1 %v9751_v2  ;;  %v10001_v2 = vshrl.u32 %v3541_v50, 7 }
 0x3b7   : > { %4312 = vmatprep.mubr.bf16.mxu1 %v11365_v15 }
 0x3b8   : > { %v11315_v41 = vsub.s32 0, %v10001_v2  ;;  %v11314_v42 = vsub.s32 1, %v10001_v2 }
 0x3be   : > { %4313 = vmatmul.mubr.bf16.gmra.mrb[100].mxu1 %v9767_v48  ;;  %v10016_v48 = vld [vmem:[%s11268_s6] sm:$0xff] }
 0x3bf   : > { %4322 = vmatprep.mubr.bf16.mxu1 %v11365_v15  ;;  %v10023_v53 = vrot.slane %v10016_v48, %v11315_v41  ;;  %v10028_v10 = vrot.slane %v10016_v48, %v11314_v42 }
 0x3c6   : > { %4323 = vmatmul.mubr.bf16.gmra.mrb[104].mxu1 %v9783_v60  ;;  %v8205_v60 = vld [vmem:[%s11269_s7 + $0x1e4] ss:$8 sps:$4 sm:$0xff]  }
 0x3c7   : > { %4332 = vmatprep.mubr.bf16.mxu1 %v11365_v15  ;;  %6154 = vmatprep.subr.bf16.mxu0 %v8205_v60 }
 0x3c8   : > { %6155 = vmatpush1.bf16.msra.mxu0 %v8203_v19 }
 0x3c9   : > { %v4031_v51 = vpop.f32.mrb[0].mxu1  ;;  %6156 = vmatprep.subr.bf16.mxu0 %v8214_v1 }
 0x3ca   : > { %v4032_v46 = vadd.f32 %v4031_v51, %v10023_v53  ;;  %v4033_v52 = vpop.f32.mrb[1].mxu1 }
 0x3cb   : > { %v4034_v13 = vadd.f32 %v4033_v52, %v10028_v10  ;;  %v4035_v26 = vpop.f32.mrb[2].mxu1 }
 0x3cc   : > { %v4036_v39 = vadd.f32 %v4035_v26, %v10023_v53  ;;  %v4037_v20 = vpop.f32.mrb[3].mxu1  ;;  %v4769_v29 = vmax.f32 %v4032_v46, 0.0  ;;  %6157 = vmatpush1.bf16.msra.mxu0 %v8212_v6 }
 0x3cd   : > { %v4038_v7 = vadd.f32 %v4037_v20, %v10028_v10  ;;  %v4770_v35 = vmax.f32 %v4034_v13, 0.0  ;;  %6319 = vmatprep.subr.bf16.mxu0 %v8223_v49  ;;  %v8188_v49 = vld [vmem:[%s11269_s7] ss:$8 sps:$4 sm:$0xff]  }
 0x3ce   : > { %v4777_v37 = vmax.f32 %v4036_v39, 0.0  ;;  %4333 = vmatmul.mubr.bf16.gmra.mrb[108].mxu1 %v9799_v4 }
 0x3cf   : > { %v4778_v63 = vmax.f32 %v4038_v7, 0.0  ;;  %4342 = vmatprep.mubr.bf16.mxu1 %v11365_v15 }
 0x3d0   : > { %v10050_v22 = vpack.c.bf16 %v4777_v37, %v4769_v29 }
 0x3d1   : > { %v10052_v47 = vpack.c.bf16 %v4778_v63, %v4770_v35  ;;  %v4041_v3 = vpop.f32.mrb[4].mxu1 }
 0x3d2   : > { %v4042_v4 = vadd.f32 %v4041_v3, %v10023_v53  ;;  %v4043_v58 = vpop.f32.mrb[5].mxu1 }
 0x3d3   : > { %v4044_v0 = vadd.f32 %v4043_v58, %v10028_v10  ;;  %v4045_v11 = vpop.f32.mrb[6].mxu1 }
 0x3d4   : > { %v4046_v38 = vadd.f32 %v4045_v11, %v10023_v53  ;;  %v4047_v30 = vpop.f32.mrb[7].mxu1  ;;  %v4785_v61 = vmax.f32 %v4042_v4, 0.0 }
 0x3d5   : > { %v4048_v45 = vadd.f32 %v4047_v30, %v10028_v10  ;;  %v4786_v23 = vmax.f32 %v4044_v0, 0.0 }
 0x3d6   : > { %v4793_v28 = vmax.f32 %v4046_v38, 0.0  ;;  %4343 = vmatmul.mubr.bf16.gmra.mrb[112].mxu1 %v9810_v9 }
 0x3d7   : > { %v4794_v36 = vmax.f32 %v4048_v45, 0.0  ;;  %4352 = vmatprep.mubr.bf16.mxu1 %v11365_v15 }
 0x3d8   : > { %v10060_v16 = vpack.c.bf16 %v4793_v28, %v4785_v61 }
 0x3d9   : > { %v10062_v21 = vpack.c.bf16 %v4794_v36, %v4786_v23  ;;  %v4051_v40 = vpop.f32.mrb[8].mxu1 }
 0x3da   : > { %v4052_v54 = vadd.f32 %v4051_v40, %v10023_v53  ;;  %v4053_v18 = vpop.f32.mrb[9].mxu1 }
 0x3db   : > { %v4054_v12 = vadd.f32 %v4053_v18, %v10028_v10  ;;  %v4055_v57 = vpop.f32.mrb[10].mxu1  ;;  %v8193_v18 = vld [vmem:[%s11269_s7 + $0x14] ss:$8 sps:$4 sm:$0xff]  }
 0x3dc   : > { %v4056_v9 = vadd.f32 %v4055_v57, %v10023_v53  ;;  %v4057_v27 = vpop.f32.mrb[11].mxu1  ;;  %v4801_v25 = vmax.f32 %v4052_v54, 0.0 }
 0x3dd   : > { %v4058_v32 = vadd.f32 %v4057_v27, %v10028_v10  ;;  %v4802_v24 = vmax.f32 %v4054_v12, 0.0  ;;  %v8341_v27 = vld [vmem:[#allocation2 + $0x14] sm:$0xff]  }
 0x3de   : > { %v4809_v62 = vmax.f32 %v4056_v9, 0.0  ;;  %4353 = vmatmul.mubr.bf16.gmra.mrb[116].mxu1 %v9828_v44 }
 0x3df   : > { %v4810_v56 = vmax.f32 %v4058_v32, 0.0  ;;  %4362 = vmatprep.mubr.bf16.mxu1 %v11365_v15 }
 0x3e0   : > { %v10073_v14 = vpack.c.bf16 %v4809_v62, %v4801_v25  ;;  %v8191_v62 = vld [vmem:[%s11269_s7 + $0x10] ss:$8 sps:$4 sm:$0xff]  }
 0x3e1   : > { %v10075_v50 = vpack.c.bf16 %v4810_v56, %v4802_v24  ;;  %v4061_v33 = vpop.f32.mrb[12].mxu1  ;;  %v8199_v56 = vld [vmem:[%s11269_s7 + $0x24] ss:$8 sps:$4 sm:$0xff]  }
 0x3e2   : > { %v4062_v43 = vadd.f32 %v4061_v33, %v10023_v53  ;;  %v4063_v51 = vpop.f32.mrb[13].mxu1 }
 0x3e3   : > { %v4064_v19 = vadd.f32 %v4063_v51, %v10028_v10  ;;  %v4065_v60 = vpop.f32.mrb[14].mxu1 }
 0x3e4   : > { %v4066_v46 = vadd.f32 %v4065_v60, %v10023_v53  ;;  %v4067_v52 = vpop.f32.mrb[15].mxu1  ;;  %v4817_v13 = vmax.f32 %v4062_v43, 0.0 }
 0x3e5   : > { %v4068_v44 = vadd.f32 %v4067_v52, %v10028_v10  ;;  %v4818_v39 = vmax.f32 %v4064_v19, 0.0  ;;  %v8197_v52 = vld [vmem:[%s11269_s7 + $0x20] ss:$8 sps:$4 sm:$0xff]  }
 0x3e6   : > { %v4825_v26 = vmax.f32 %v4066_v46, 0.0  ;;  %4363 = vmatmul.mubr.bf16.gmra.mrb[120].mxu1 %v9840_v31 }
 0x3e7   : > { %v4826_v20 = vmax.f32 %v4068_v44, 0.0  ;;  %4372 = vmatprep.mubr.bf16.mxu1 %v11365_v15 }
 0x3e8   : > { %v10083_v7 = vpack.c.bf16 %v4825_v26, %v4817_v13  ;;  %v8202_v26 = vld [vmem:[%s11269_s7 + $0x34] ss:$8 sps:$4 sm:$0xff]  }
 0x3e9   : > { %v10085_v29 = vpack.c.bf16 %v4826_v20, %v4818_v39  ;;  %v4071_v37 = vpop.f32.mrb[16].mxu1 }
 0x3ea   : > { %v4072_v1 = vadd.f32 %v4071_v37, %v10023_v53  ;;  %v4073_v35 = vpop.f32.mrb[17].mxu1 }
 0x3eb   : > { %v4074_v63 = vadd.f32 %v4073_v35, %v10028_v10  ;;  %v4075_v6 = vpop.f32.mrb[18].mxu1 }
 0x3ec   : > { %v4076_v3 = vadd.f32 %v4075_v6, %v10023_v53  ;;  %v4077_v4 = vpop.f32.mrb[19].mxu1  ;;  %v4833_v58 = vmax.f32 %v4072_v1, 0.0  ;;  %v8342_v1 = vld [vmem:[#allocation2 + $0x24] sm:$0xff]   ;;  %v8200_v6 = vld [vmem:[%s11269_s7 + $0x30] ss:$8 sps:$4 sm:$0xff]  }
 0x3ed   : > { %v4078_v31 = vadd.f32 %v4077_v4, %v10028_v10  ;;  %v4834_v11 = vmax.f32 %v4074_v63, 0.0  ;;  %v8208_v4 = vld [vmem:[%s11269_s7 + $0x44] ss:$8 sps:$4 sm:$0xff]  }
 0x3ee   : > { %v4841_v0 = vmax.f32 %v4076_v3, 0.0  ;;  %4373 = vmatmul.mubr.bf16.gmra.mrb[124].mxu1 %v9852_v55 }
 0x3ef   : > { %v4842_v38 = vmax.f32 %v4078_v31, 0.0  ;;  %4608 = vmatprep.mubr.bf16.mxu1 %v11365_v15 }
 0x3f0   : > { %v10093_v30 = vpack.c.bf16 %v4841_v0, %v4833_v58 }
 0x3f1   : > { %v10095_v45 = vpack.c.bf16 %v4842_v38, %v4834_v11  ;;  %v4081_v61 = vpop.f32.mrb[20].mxu1 }
 0x3f2   : > { %v4082_v28 = vadd.f32 %v4081_v61, %v10023_v53  ;;  %v4083_v23 = vpop.f32.mrb[21].mxu1 }
 0x3f3   : > { %v4084_v36 = vadd.f32 %v4083_v23, %v10028_v10  ;;  %v4085_v40 = vpop.f32.mrb[22].mxu1 }
 0x3f4   : > { %v4086_v55 = vadd.f32 %v4085_v40, %v10023_v53  ;;  %v4087_v54 = vpop.f32.mrb[23].mxu1  ;;  %v4849_v57 = vmax.f32 %v4082_v28, 0.0  ;;  %v8206_v28 = vld [vmem:[%s11269_s7 + $0x40] ss:$8 sps:$4 sm:$0xff]   ;;  %v8211_v40 = vld [vmem:[%s11269_s7 + $0x54] ss:$8 sps:$4 sm:$0xff]  }
 0x3f5   : > { %v4088_v12 = vadd.f32 %v4087_v54, %v10028_v10  ;;  %v4850_v32 = vmax.f32 %v4084_v36, 0.0 }
 0x3f6   : > { %v4857_v9 = vmax.f32 %v4086_v55, 0.0  ;;  %4609 = vmatmul.mubr.bf16.vlgmr.msra.gmra.mrb[128].mxu1 %v8341_v27  ;;  %v8217_v27 = vld [vmem:[%s11269_s7 + $0x64] ss:$8 sps:$4 sm:$0xff]  }
 0x3f7   : > { %v4858_v25 = vmax.f32 %v4088_v12, 0.0  ;;  %4618 = vmatprep.mubr.bf16.mxu1 %v11365_v15  ;;  %5934 = vmatpush1.bf16.msra.mxu1 %v8188_v49 }
 0x3f8   : > { %v10111_v24 = vpack.c.bf16 %v4857_v9, %v4849_v57  ;;  %5935 = vmatprep.subr.bf16.mxu1 %v8193_v18  ;;  %v8209_v57 = vld [vmem:[%s11269_s7 + $0x50] ss:$8 sps:$4 sm:$0xff]  }
 0x3f9   : > { %v10116_v33 = vpack.c.bf16 %v4858_v25, %v4850_v32  ;;  %v4091_v43 = vpop.f32.mrb[24].mxu1 }
 0x3fa   : > { %v4092_v51 = vadd.f32 %v4091_v43, %v10023_v53  ;;  %v4093_v19 = vpop.f32.mrb[25].mxu1 }
 0x3fb   : > { %v4094_v60 = vadd.f32 %v4093_v19, %v10028_v10  ;;  %v4095_v46 = vpop.f32.mrb[26].mxu1  ;;  %5936 = vmatpush1.bf16.msra.mxu1 %v8191_v62 }
 0x3fc   : > { %v4096_v44 = vadd.f32 %v4095_v46, %v10023_v53  ;;  %v4097_v13 = vpop.f32.mrb[27].mxu1  ;;  %5937 = vmatprep.subr.bf16.mxu1 %v8199_v56  ;;  %v4865_v20 = vmax.f32 %v4092_v51, 0.0  ;;  %v8215_v51 = vld [vmem:[%s11269_s7 + $0x60] ss:$8 sps:$4 sm:$0xff]   ;;  %v8220_v46 = vld [vmem:[%s11269_s7 + $0x74] ss:$8 sps:$4 sm:$0xff]  }
 0x3fd   : > { %v4098_v39 = vadd.f32 %v4097_v13, %v10028_v10  ;;  %v4866_v35 = vmax.f32 %v4094_v60, 0.0 }
 0x3fe   : > { %v4873_v37 = vmax.f32 %v4096_v44, 0.0  ;;  %4619 = vmatmul.mubr.bf16.gmra.mrb[132].mxu1 %v8342_v1  ;;  %v8226_v1 = vld [vmem:[%s11269_s7 + $0x84] ss:$8 sps:$4 sm:$0xff]  }
 0x3ff   : > { %v4874_v63 = vmax.f32 %v4098_v39, 0.0  ;;  %4628 = vmatprep.mubr.bf16.mxu1 %v11365_v15  ;;  %5938 = vmatpush1.bf16.msra.mxu1 %v8197_v52 }
 0x400   : > { %v10132_v3 = vpack.c.bf16 %v4873_v37, %v4865_v20  ;;  %5939 = vmatprep.subr.bf16.mxu1 %v8202_v26  ;;  %v8218_v20 = vld [vmem:[%s11269_s7 + $0x70] ss:$8 sps:$4 sm:$0xff]  }
 0x401   : > { %v10137_v31 = vpack.c.bf16 %v4874_v63, %v4866_v35  ;;  %v4101_v58 = vpop.f32.mrb[28].mxu1 }
 0x402   : > { %v4102_v0 = vadd.f32 %v4101_v58, %v10023_v53  ;;  %v4103_v11 = vpop.f32.mrb[29].mxu1 }
 0x403   : > { %v4104_v38 = vadd.f32 %v4103_v11, %v10028_v10  ;;  %v4105_v61 = vpop.f32.mrb[30].mxu1  ;;  %5940 = vmatpush1.bf16.msra.mxu1 %v8200_v6 }
 0x404   : > { %v4106_v23 = vadd.f32 %v4105_v61, %v10023_v53  ;;  %v4107_v36 = vpop.f32.mrb[31].mxu1  ;;  %5941 = vmatprep.subr.bf16.mxu1 %v8208_v4  ;;  %v4881_v55 = vmax.f32 %v4102_v0, 0.0  ;;  %v8224_v0 = vld [vmem:[%s11269_s7 + $0x80] ss:$8 sps:$4 sm:$0xff]   ;;  %v8229_v61 = vld [vmem:[%s11269_s7 + $0x94] ss:$8 sps:$4 sm:$0xff]  }
 0x405   : > { %v4108_v49 = vadd.f32 %v4107_v36, %v10028_v10  ;;  %v4882_v18 = vmax.f32 %v4104_v38, 0.0 }
 0x406   : > { %v4889_v54 = vmax.f32 %v4106_v23, 0.0  ;;  %4629 = vmatmul.mubr.bf16.gmra.mrb[136].mxu1 %v9709_v59 }
 0x407   : > { %v4890_v12 = vmax.f32 %v4108_v49, 0.0  ;;  %4638 = vmatprep.mubr.bf16.mxu1 %v11365_v15  ;;  %5942 = vmatpush1.bf16.msra.mxu1 %v8206_v28 }
 0x408   : > { %v10154_v9 = vpack.c.bf16 %v4889_v54, %v4881_v55  ;;  %5943 = vmatprep.subr.bf16.mxu1 %v8211_v40  ;;  %v8227_v55 = vld [vmem:[%s11269_s7 + $0x90] ss:$8 sps:$4 sm:$0xff]  }
 0x409   : > { %v10159_v32 = vpack.c.bf16 %v4890_v12, %v4882_v18  ;;  %v4111_v25 = vpop.f32.mrb[32].mxu1  ;;  %v8235_v18 = vld [vmem:[%s11269_s7 + $0xa4] ss:$8 sps:$4 sm:$0xff]  }
 0x40a   : > { %v4112_v59 = vadd.f32 %v4111_v25, %v10023_v53  ;;  %v4113_v62 = vpop.f32.mrb[33].mxu1 }
 0x40b   : > { %v4114_v56 = vadd.f32 %v4113_v62, %v10028_v10  ;;  %v4115_v43 = vpop.f32.mrb[34].mxu1  ;;  %5944 = vmatpush1.bf16.msra.mxu1 %v8209_v57  ;;  %v8233_v62 = vld [vmem:[%s11269_s7 + $0xa0] ss:$8 sps:$4 sm:$0xff]  }
 0x40c   : > { %v4116_v19 = vadd.f32 %v4115_v43, %v10023_v53  ;;  %v4117_v60 = vpop.f32.mrb[35].mxu1  ;;  %5945 = vmatprep.subr.bf16.mxu1 %v8217_v27  ;;  %v4897_v44 = vmax.f32 %v4112_v59, 0.0 }
 0x40d   : > { %v4118_v52 = vadd.f32 %v4117_v60, %v10028_v10  ;;  %v4898_v26 = vmax.f32 %v4114_v56, 0.0 }
 0x40e   : > { %v4905_v13 = vmax.f32 %v4116_v19, 0.0  ;;  %4639 = vmatmul.mubr.bf16.gmra.mrb[140].mxu1 %v9725_v5 }
 0x40f   : > { %v4906_v39 = vmax.f32 %v4118_v52, 0.0  ;;  %4648 = vmatprep.mubr.bf16.mxu1 %v11365_v15  ;;  %5946 = vmatpush1.bf16.msra.mxu1 %v8215_v51  ;;  %v8238_v51 = vld [vmem:[%s11269_s7 + $0xb4] ss:$8 sps:$4 sm:$0xff]  }
 0x410   : > { %v10176_v37 = vpack.c.bf16 %v4905_v13, %v4897_v44  ;;  %5947 = vmatprep.subr.bf16.mxu1 %v8220_v46  ;;  %v8236_v13 = vld [vmem:[%s11269_s7 + $0xb0] ss:$8 sps:$4 sm:$0xff]  }
 0x411   : > { %v10181_v35 = vpack.c.bf16 %v4906_v39, %v4898_v26  ;;  %v4121_v63 = vpop.f32.mrb[36].mxu1  ;;  %v8244_v39 = vld [vmem:[%s11269_s7 + $0xc4] ss:$8 sps:$4 sm:$0xff]  }
 0x412   : > { %v4122_v5 = vadd.f32 %v4121_v63, %v10023_v53  ;;  %v4123_v6 = vpop.f32.mrb[37].mxu1 }
 0x413   : > { %v4124_v4 = vadd.f32 %v4123_v6, %v10028_v10  ;;  %v4125_v58 = vpop.f32.mrb[38].mxu1  ;;  %5948 = vmatpush1.bf16.msra.mxu1 %v8218_v20 }
 0x414   : > { %v4126_v11 = vadd.f32 %v4125_v58, %v10023_v53  ;;  %v4127_v38 = vpop.f32.mrb[39].mxu1  ;;  %5949 = vmatprep.subr.bf16.mxu1 %v8226_v1  ;;  %v4913_v23 = vmax.f32 %v4122_v5, 0.0 }
 0x415   : > { %v4128_v28 = vadd.f32 %v4127_v38, %v10028_v10  ;;  %v4914_v40 = vmax.f32 %v4124_v4, 0.0  ;;  %v8242_v4 = vld [vmem:[%s11269_s7 + $0xc0] ss:$8 sps:$4 sm:$0xff]   ;;  %v3559_v38 = vsub.s32 4, %v10001_v2 }
 0x416   : > { %v4921_v36 = vmax.f32 %v4126_v11, 0.0  ;;  %4649 = vmatmul.mubr.bf16.gmra.mrb[144].mxu1 %v9729_v17  ;;  %v8247_v11 = vld [vmem:[%s11269_s7 + $0xd4] ss:$8 sps:$4 sm:$0xff]  }
 0x417   : > { %v4922_v49 = vmax.f32 %v4128_v28, 0.0  ;;  %4658 = vmatprep.mubr.bf16.mxu1 %v11365_v15  ;;  %5950 = vmatpush1.bf16.msra.mxu1 %v8224_v0  ;;  %v3563_v28 = vsub.s32 5, %v10001_v2 }
 0x418   : > { %v10198_v54 = vpack.c.bf16 %v4921_v36, %v4913_v23  ;;  %5951 = vmatprep.subr.bf16.mxu1 %v8229_v61  ;;  %v4417_v61 = vpop.f32.mrb[0].mxu0 }
 0x419   : > { %v10203_v12 = vpack.c.bf16 %v4922_v49, %v4914_v40  ;;  %v4131_v57 = vpop.f32.mrb[40].mxu1  ;;  %v4419_v36 = vpop.f32.mrb[1].mxu0 }
 0x41a   : > { %v4132_v17 = vadd.f32 %v4131_v57, %v10023_v53  ;;  %v4133_v27 = vpop.f32.mrb[41].mxu1  ;;  %v4421_v57 = vpop.f32.mrb[2].mxu0 }
 0x41b   : > { %v4134_v25 = vadd.f32 %v4133_v27, %v10028_v10  ;;  %v4135_v59 = vpop.f32.mrb[42].mxu1  ;;  %5952 = vmatpush1.bf16.msra.mxu1 %v8227_v55  ;;  %v10241_v55 = vrot.slane %v10016_v48, %v3559_v38 }
 0x41c   : > { %v4136_v56 = vadd.f32 %v4135_v59, %v10023_v53  ;;  %v4137_v43 = vpop.f32.mrb[43].mxu1  ;;  %5953 = vmatprep.subr.bf16.mxu1 %v8235_v18  ;;  %v4929_v60 = vmax.f32 %v4132_v17, 0.0  ;;  %v10244_v18 = vrot.slane %v10016_v48, %v3563_v28  ;;  %v4423_v59 = vpop.f32.mrb[3].mxu0 }
 0x41d   : > { %v4138_v19 = vadd.f32 %v4137_v43, %v10028_v10  ;;  %v4930_v52 = vmax.f32 %v4134_v25, 0.0  ;;  %v8245_v25 = vld [vmem:[%s11269_s7 + $0xd0] ss:$8 sps:$4 sm:$0xff]   ;;  %v4427_v38 = vpop.f32.mrb[4].mxu0 }
 0x41e   : > { %v4937_v46 = vmax.f32 %v4136_v56, 0.0  ;;  %4659 = vmatmul.mubr.bf16.gmra.mrb[148].mxu1 %v9733_v34  ;;  %v4418_v56 = vadd.f32 %v4417_v61, %v10241_v55  ;;  %v4420_v43 = vadd.f32 %v4419_v36, %v10244_v18 }
 0x41f   : > { %v4938_v44 = vmax.f32 %v4138_v19, 0.0  ;;  %4668 = vmatprep.mubr.bf16.mxu1 %v11365_v15  ;;  %5954 = vmatpush1.bf16.msra.mxu1 %v8233_v62 }
 0x420   : > { %v10220_v26 = vpack.c.bf16 %v4937_v46, %v4929_v60  ;;  %5955 = vmatprep.subr.bf16.mxu1 %v8238_v51  ;;  %v4422_v51 = vadd.f32 %v4421_v57, %v10241_v55  ;;  %v4424_v46 = vadd.f32 %v4423_v59, %v10244_v18 }
 0x421   : > { %v10225_v20 = vpack.c.bf16 %v4938_v44, %v4930_v52  ;;  %v4141_v1 = vpop.f32.mrb[44].mxu1 }
 0x422   : > { %v4142_v34 = vadd.f32 %v4141_v1, %v10023_v53  ;;  %v4143_v63 = vpop.f32.mrb[45].mxu1  ;;  %v4781_v1 = vmax.f32 %v4422_v51, 0.0 }
 0x423   : > { %v4144_v5 = vadd.f32 %v4143_v63, %v10028_v10  ;;  %v4145_v6 = vpop.f32.mrb[46].mxu1  ;;  %5956 = vmatpush1.bf16.msra.mxu1 %v8236_v13  ;;  %v4773_v13 = vmax.f32 %v4418_v56, 0.0  ;;  %v4428_v56 = vadd.f32 %v4427_v38, %v10241_v55 }
 0x424   : > { %v4146_v58 = vadd.f32 %v4145_v6, %v10023_v53  ;;  %v4147_v0 = vpop.f32.mrb[47].mxu1  ;;  %5957 = vmatprep.subr.bf16.mxu1 %v8244_v39  ;;  %v4945_v40 = vmax.f32 %v4142_v34, 0.0  ;;  %v4774_v39 = vmax.f32 %v4420_v43, 0.0  ;;  %v4782_v6 = vmax.f32 %v4424_v46, 0.0 }
 0x425   : > { %v4148_v23 = vadd.f32 %v4147_v0, %v10028_v10  ;;  %v4946_v17 = vmax.f32 %v4144_v5, 0.0  ;;  %v8251_v5 = vld [vmem:[%s11269_s7 + $0xe0] ss:$8 sps:$4 sm:$0xff]   ;;  %v8256_v0 = vld [vmem:[%s11269_s7 + $0xf4] ss:$8 sps:$4 sm:$0xff]  }
 0x426   : > { %v4953_v49 = vmax.f32 %v4146_v58, 0.0  ;;  %4669 = vmatmul.mubr.bf16.gmra.mrb[152].mxu1 %v9737_v8  ;;  %v8253_v8 = vld [vmem:[%s11269_s7 + $0xe4] ss:$8 sps:$4 sm:$0xff]   ;;  %v10273_v28 = vpack.c.bf16 %v4782_v6, %v4774_v39  ;;  %v4789_v39 = vmax.f32 %v4428_v56, 0.0 }
 0x427   : > { %v4954_v27 = vmax.f32 %v4148_v23, 0.0  ;;  %4678 = vmatprep.mubr.bf16.mxu1 %v11365_v15  ;;  %5958 = vmatpush1.bf16.msra.mxu1 %v8242_v4  ;;  %v4429_v23 = vpop.f32.mrb[5].mxu0 }
 0x428   : > { %v10250_v62 = vpack.c.bf16 %v4953_v49, %v4945_v40  ;;  %5959 = vmatprep.subr.bf16.mxu1 %v8247_v11  ;;  %v10270_v11 = vpack.c.bf16 %v4781_v1, %v4773_v13  ;;  %v8343_v49 = vld [vmem:[#allocation2 + $0x84] sm:$0xff]   ;;  %v4431_v57 = vpop.f32.mrb[6].mxu0  ;;  %v4430_v43 = vadd.f32 %v4429_v23, %v10244_v18 }
 0x429   : > { %v10258_v19 = vpack.c.bf16 %v4954_v27, %v4946_v17  ;;  %v4151_v60 = vpop.f32.mrb[48].mxu1  ;;  %v4433_v59 = vpop.f32.mrb[7].mxu0  ;;  %v4432_v51 = vadd.f32 %v4431_v57, %v10241_v55  ;;  %v8344_v57 = vld [vmem:[#allocation2 + $0x94] sm:$0xff]  }
 0x42a   : > { %v4152_v52 = vadd.f32 %v4151_v60, %v10023_v53  ;;  %v4153_v44 = vpop.f32.mrb[49].mxu1  ;;  %v4790_v1 = vmax.f32 %v4430_v43, 0.0  ;;  %v4437_v38 = vpop.f32.mrb[8].mxu0 }
 0x42b   : > { %v4154_v34 = vadd.f32 %v4153_v44, %v10028_v10  ;;  %v4155_v63 = vpop.f32.mrb[50].mxu1  ;;  %5960 = vmatpush1.bf16.msra.mxu1 %v8245_v25  ;;  %v8254_v25 = vld [vmem:[%s11269_s7 + $0xf0] ss:$8 sps:$4 sm:$0xff]   ;;  %v4438_v43 = vadd.f32 %v4437_v38, %v10241_v55 }
 0x42c   : > { %v4156_v4 = vadd.f32 %v4155_v63, %v10023_v53  ;;  %v4157_v58 = vpop.f32.mrb[51].mxu1  ;;  %5961 = vmatprep.subr.bf16.mxu1 %v8253_v8  ;;  %v4961_v36 = vmax.f32 %v4152_v52, 0.0  ;;  %v4434_v52 = vadd.f32 %v4433_v59, %v10244_v18 }
 0x42d   : > { %v4158_v61 = vadd.f32 %v4157_v58, %v10028_v10  ;;  %v4962_v17 = vmax.f32 %v4154_v34, 0.0  ;;  %v4797_v34 = vmax.f32 %v4432_v51, 0.0 }
 0x42e   : > { %v4969_v40 = vmax.f32 %v4156_v4, 0.0  ;;  %4679 = vmatmul.mubr.bf16.gmra.mrb[156].mxu1 %v8343_v49  ;;  %v4798_v6 = vmax.f32 %v4434_v52, 0.0 }
 0x42f   : > { %v4970_v27 = vmax.f32 %v4158_v61, 0.0  ;;  %4688 = vmatprep.mubr.bf16.mxu1 %v11365_v15  ;;  %5962 = vmatpush1.bf16.msra.mxu1 %v8251_v5 }
 0x430   : > { %v10279_v8 = vpack.c.bf16 %v4969_v40, %v4961_v36  ;;  %5963 = vmatprep.subr.bf16.mxu1 %v8256_v0  ;;  %v10290_v0 = vpack.c.bf16 %v4797_v34, %v4789_v39  ;;  %v10293_v23 = vpack.c.bf16 %v4798_v6, %v4790_v1  ;;  %v4439_v36 = vpop.f32.mrb[9].mxu0  ;;  %v4805_v34 = vmax.f32 %v4438_v43, 0.0 }
 0x431   : > { %v10284_v60 = vpack.c.bf16 %v4970_v27, %v4962_v17  ;;  %v4161_v46 = vpop.f32.mrb[52].mxu1  ;;  %v4441_v17 = vpop.f32.mrb[10].mxu0  ;;  %v4440_v51 = vadd.f32 %v4439_v36, %v10244_v18 }
 0x432   : > { %v4162_v44 = vadd.f32 %v4161_v46, %v10023_v53  ;;  %v4163_v13 = vpop.f32.mrb[53].mxu1  ;;  %v4442_v46 = vadd.f32 %v4441_v17, %v10241_v55 }
 0x433   : > { %v4164_v63 = vadd.f32 %v4163_v13, %v10028_v10  ;;  %v4165_v5 = vpop.f32.mrb[54].mxu1  ;;  %5964 = vmatpush1.bf16.msra.mxu1 %v8254_v25  ;;  %v4443_v25 = vpop.f32.mrb[11].mxu0 }
 0x434   : > { %v4166_v4 = vadd.f32 %v4165_v5, %v10023_v53  ;;  %v4167_v58 = vpop.f32.mrb[55].mxu1  ;;  %v4977_v40 = vmax.f32 %v4162_v44, 0.0  ;;  %v4444_v13 = vadd.f32 %v4443_v25, %v10244_v18  ;;  %v4813_v5 = vmax.f32 %v4442_v46, 0.0  ;;  %v8345_v25 = vld [vmem:[#allocation2 + $0xa4] sm:$0xff]  }
 0x435   : > { %v4168_v61 = vadd.f32 %v4167_v58, %v10028_v10  ;;  %v4978_v27 = vmax.f32 %v4164_v63, 0.0  ;;  %v4806_v63 = vmax.f32 %v4440_v51, 0.0 }
 0x436   : > { %v4985_v49 = vmax.f32 %v4166_v4, 0.0  ;;  %4689 = vmatmul.mubr.bf16.gmra.mrb[160].mxu1 %v8344_v57  ;;  %v4814_v58 = vmax.f32 %v4444_v13, 0.0  ;;  %v10307_v36 = vpack.c.bf16 %v4813_v5, %v4805_v34 }
 0x437   : > { %v4986_v59 = vmax.f32 %v4168_v61, 0.0  ;;  %4698 = vmatprep.mubr.bf16.mxu1 %v11365_v15 }
 0x438   : > { %v10296_v56 = vpack.c.bf16 %v4985_v49, %v4977_v40  ;;  %11366 = vst [vmem:[#allocation3_spill] sm:$0xff] %v10307_v36  ;;  %v4447_v40 = vpop.f32.mrb[12].mxu0  ;;  %v10310_v57 = vpack.c.bf16 %v4814_v58, %v4806_v63 }
 0x439   : > { %v10301_v52 = vpack.c.bf16 %v4986_v59, %v4978_v27  ;;  %v4171_v44 = vpop.f32.mrb[56].mxu1  ;;  %v4449_v17 = vpop.f32.mrb[13].mxu0 }
 0x43a   : > { %v4172_v39 = vadd.f32 %v4171_v44, %v10023_v53  ;;  %v4173_v1 = vpop.f32.mrb[57].mxu1  ;;  %v4451_v43 = vpop.f32.mrb[14].mxu0  ;;  %v4450_v34 = vadd.f32 %v4449_v17, %v10244_v18  ;;  %v3555_v17 = vsub.s32 3, %v10001_v2 }
 0x43b   : > { %v4174_v6 = vadd.f32 %v4173_v1, %v10028_v10  ;;  %v4175_v4 = vpop.f32.mrb[58].mxu1  ;;  %v4453_v44 = vpop.f32.mrb[15].mxu0  ;;  %v4448_v1 = vadd.f32 %v4447_v40, %v10241_v55  ;;  %v4452_v63 = vadd.f32 %v4451_v43, %v10241_v55 }
 0x43c   : > { %v4176_v38 = vadd.f32 %v4175_v4, %v10023_v53  ;;  %v4177_v61 = vpop.f32.mrb[59].mxu1  ;;  %v4993_v27 = vmax.f32 %v4172_v39, 0.0  ;;  %v3551_v4 = vsub.s32 2, %v10001_v2  ;;  %v4454_v58 = vadd.f32 %v4453_v44, %v10244_v18  ;;  %v4457_v42 = vpop.f32.mrb[16].mxu0 }
 0x43d   : > { %v4178_v49 = vadd.f32 %v4177_v61, %v10028_v10  ;;  %v4994_v51 = vmax.f32 %v4174_v6, 0.0  ;;  %v4821_v61 = vmax.f32 %v4448_v1, 0.0 }
 0x43e   : > { %v5001_v59 = vmax.f32 %v4176_v38, 0.0  ;;  %4699 = vmatmul.mubr.bf16.gmra.mrb[164].mxu1 %v8345_v25  ;;  %v4830_v25 = vmax.f32 %v4454_v58, 0.0 }
 0x43f   : > { %v5002_v46 = vmax.f32 %v4178_v49, 0.0  ;;  %4708 = vmatprep.mubr.bf16.mxu1 %v11365_v15  ;;  %v4822_v49 = vmax.f32 %v4450_v34, 0.0 }
 0x440   : > { %v10313_v13 = vpack.c.bf16 %v5001_v59, %v4993_v27  ;;  %v4829_v27 = vmax.f32 %v4452_v63, 0.0  ;;  %v8346_v63 = vld [vmem:[#allocation2 + $0xb4] sm:$0xff]  }
 0x441   : > { %v10318_v5 = vpack.c.bf16 %v5002_v46, %v4994_v51  ;;  %v4181_v39 = vpop.f32.mrb[60].mxu1  ;;  %v10329_v41 = vpack.c.bf16 %v4830_v25, %v4822_v49  ;;  %v4458_v49 = vadd.f32 %v4457_v42, %v10241_v55 }
 0x442   : > { %11367 = vst [vmem:[#allocation4_spill] sm:$0xff] %v10313_v13  ;;  %v4182_v6 = vadd.f32 %v4181_v39, %v10023_v53  ;;  %v4183_v38 = vpop.f32.mrb[61].mxu1  ;;  %v10326_v46 = vpack.c.bf16 %v4829_v27, %v4821_v61  ;;  %v4459_v39 = vpop.f32.mrb[17].mxu0 }
 0x443   : > { %v4184_v59 = vadd.f32 %v4183_v38, %v10028_v10  ;;  %v4185_v40 = vpop.f32.mrb[62].mxu1  ;;  %v10332_v38 = vrot.slane %v10016_v48, %v3551_v4  ;;  %v4461_v13 = vpop.f32.mrb[18].mxu0 }
 0x444   : > { %v4186_v43 = vadd.f32 %v4185_v40, %v10023_v53  ;;  %v4187_v51 = vpop.f32.mrb[63].mxu1  ;;  %v5009_v1 = vmax.f32 %v4182_v6, 0.0  ;;  %v10335_v53 = vrot.slane %v10016_v48, %v3555_v17  ;;  %v4463_v61 = vpop.f32.mrb[19].mxu0  ;;  %v4460_v6 = vadd.f32 %v4459_v39, %v10244_v18 }
 0x445   : > { %v4188_v44 = vadd.f32 %v4187_v51, %v10028_v10  ;;  %v5010_v58 = vmax.f32 %v4184_v59, 0.0  ;;  %v4462_v27 = vadd.f32 %v4461_v13, %v10241_v55  ;;  %v4464_v59 = vadd.f32 %v4463_v61, %v10244_v18 }
 0x446   : > { %v5017_v34 = vmax.f32 %v4186_v43, 0.0  ;;  %4709 = vmatmul.mubr.bf16.gmra.mrb[168].mxu1 %v8346_v63  ;;  %v4837_v17 = vmax.f32 %v4458_v49, 0.0  ;;  %v4838_v43 = vmax.f32 %v4460_v6, 0.0 }
 0x447   : > { %v5018_v36 = vmax.f32 %v4188_v44, 0.0  ;;  %4718 = vmatprep.mubr.bf16.mxu1 %v11365_v15  ;;  %v4845_v51 = vmax.f32 %v4462_v27, 0.0 }
 0x448   : > { %v10338_v10 = vpack.c.bf16 %v5017_v34, %v5009_v1  ;;  %v4846_v34 = vmax.f32 %v4464_v59, 0.0 }
 0x449   : > { %v10343_v40 = vpack.c.bf16 %v5018_v36, %v5010_v58  ;;  %v4224_v4 = vpop.f32.mrb[64].mxu1  ;;  %v10349_v63 = vpack.c.bf16 %v4845_v51, %v4837_v17  ;;  %v4467_v58 = vpop.f32.mrb[20].mxu0 }
 0x44a   : > { %11368 = vst [vmem:[#allocation5_spill] sm:$0xff] %v10338_v10  ;;  %v4225_v25 = vadd.f32 %v4224_v4, %v10332_v38  ;;  %v4226_v48 = vpop.f32.mrb[65].mxu1  ;;  %v10352_v13 = vpack.c.bf16 %v4846_v34, %v4838_v43  ;;  %v8347_v10 = vld [vmem:[#allocation2 + $0xc4] sm:$0xff]   ;;  %v4468_v49 = vadd.f32 %v4467_v58, %v10241_v55  ;;  %v4469_v6 = vpop.f32.mrb[21].mxu0 }
 0x44b   : > { %v4227_v44 = vadd.f32 %v4226_v48, %v10335_v53  ;;  %v4228_v1 = vpop.f32.mrb[66].mxu1  ;;  %11369 = vst [vmem:[#allocation6_spill] sm:$0xff] %v10349_v63  ;;  %v4470_v59 = vadd.f32 %v4469_v6, %v10244_v18  ;;  %v4471_v17 = vpop.f32.mrb[22].mxu0 }
 0x44c   : > { %v4229_v42 = vadd.f32 %v4228_v1, %v10332_v38  ;;  %v4230_v39 = vpop.f32.mrb[67].mxu1  ;;  %11370 = vst [vmem:[#allocation7_spill] sm:$0xff] %v10352_v13  ;;  %v4771_v61 = vmax.f32 %v4225_v25, 0.0  ;;  %v4853_v1 = vmax.f32 %v4468_v49, 0.0  ;;  %v4472_v43 = vadd.f32 %v4471_v17, %v10241_v55  ;;  %v4473_v34 = vpop.f32.mrb[23].mxu0 }
 0x44d   : > { %v4231_v36 = vadd.f32 %v4230_v39, %v10335_v53  ;;  %v4772_v27 = vmax.f32 %v4227_v44, 0.0  ;;  %v4474_v44 = vadd.f32 %v4473_v34, %v10244_v18 }
 0x44e   : > { %v4779_v4 = vmax.f32 %v4229_v42, 0.0  ;;  %4719 = vmatmul.mubr.bf16.gmra.mrb[172].mxu1 %v8347_v10  ;;  %v8221_v10 = vld [vmem:[%s11269_s7 + $0x200] ss:$8 sps:$4 sm:$0xff]   ;;  %v4854_v42 = vmax.f32 %v4470_v59, 0.0 }
 0x44f   : > { %v4780_v48 = vmax.f32 %v4231_v36, 0.0  ;;  %4728 = vmatprep.mubr.bf16.mxu1 %v11365_v15 }
 0x450   : > { %v5027_v51 = vpack.c.bf16 %v4779_v4, %v4771_v61  ;;  %v8232_v61 = vld [vmem:[%s11269_s7 + $0x214] ss:$8 sps:$4 sm:$0xff]   ;;  %v4861_v4 = vmax.f32 %v4472_v43, 0.0  ;;  %v4477_v43 = vpop.f32.mrb[24].mxu0 }
 0x451   : > { %v5028_v39 = vpack.c.bf16 %v4780_v48, %v4772_v27  ;;  %v4234_v25 = vpop.f32.mrb[68].mxu1  ;;  %v4862_v27 = vmax.f32 %v4474_v44, 0.0  ;;  %v4479_v44 = vpop.f32.mrb[25].mxu0 }
 0x452   : > { %v4235_v36 = vadd.f32 %v4234_v25, %v10332_v38  ;;  %v4236_v58 = vpop.f32.mrb[69].mxu1  ;;  %v10368_v59 = vpack.c.bf16 %v4861_v4, %v4853_v1  ;;  %v8230_v25 = vld [vmem:[%s11269_s7 + $0x210] ss:$8 sps:$4 sm:$0xff]   ;;  %v4478_v1 = vadd.f32 %v4477_v43, %v10241_v55  ;;  %v8239_v43 = vld [vmem:[%s11269_s7 + $0x220] ss:$8 sps:$4 sm:$0xff]  }
 0x453   : > { %v4237_v49 = vadd.f32 %v4236_v58, %v10335_v53  ;;  %v4238_v6 = vpop.f32.mrb[70].mxu1  ;;  %6158 = vmatprep.mubr.bf16.mxu0 %v5028_v39  ;;  %v10374_v63 = vpack.c.bf16 %v4862_v27, %v4854_v42  ;;  %v8348_v39 = vld [vmem:[#allocation2 + $0xd4] sm:$0xff]   ;;  %v4480_v42 = vadd.f32 %v4479_v44, %v10244_v18 }
 0x454   : > { %v4239_v48 = vadd.f32 %v4238_v6, %v10332_v38  ;;  %v4240_v17 = vpop.f32.mrb[71].mxu1  ;;  %6159 = vmatmul.mubr.bf16.vlgmr.msra.gmra.mrb[64].mxu0 %v5027_v51  ;;  %11371 = vst [vmem:[#allocation8_spill] sm:$0xff] %v10368_v59  ;;  %v4787_v58 = vmax.f32 %v4235_v36, 0.0  ;;  %v8241_v51 = vld [vmem:[%s11269_s7 + $0x224] ss:$8 sps:$4 sm:$0xff]   ;;  %v4481_v6 = vpop.f32.mrb[26].mxu0 }
 0x455   : > { %v4241_v34 = vadd.f32 %v4240_v17, %v10335_v53  ;;  %6320 = vmatpush1.bf16.msra.mxu0 %v8221_v10  ;;  %11372 = vst [vmem:[#allocation9_spill] sm:$0xff] %v10374_v63  ;;  %v4788_v10 = vmax.f32 %v4237_v49, 0.0  ;;  %v4869_v36 = vmax.f32 %v4478_v1, 0.0  ;;  %v4483_v17 = vpop.f32.mrb[27].mxu0  ;;  %v4870_v59 = vmax.f32 %v4480_v42, 0.0 }
 0x456   : > { %v4795_v13 = vmax.f32 %v4239_v48, 0.0  ;;  %4729 = vmatmul.mubr.bf16.gmra.mrb[176].mxu1 %v8348_v39  ;;  %6321 = vmatprep.subr.bf16.mxu0 %v8232_v61  ;;  %v4482_v48 = vadd.f32 %v4481_v6, %v10241_v55  ;;  %v4484_v49 = vadd.f32 %v4483_v17, %v10244_v18 }
 0x457   : > { %v4796_v4 = vmax.f32 %v4241_v34, 0.0  ;;  %4738 = vmatprep.mubr.bf16.mxu1 %v11365_v15 }
 0x458   : > { %v5035_v27 = vpack.c.bf16 %v4795_v13, %v4787_v58  ;;  %v8250_v13 = vld [vmem:[%s11269_s7 + $0x234] ss:$8 sps:$4 sm:$0xff]   ;;  %v4877_v58 = vmax.f32 %v4482_v48, 0.0  ;;  %v4487_v48 = vpop.f32.mrb[28].mxu0 }
 0x459   : > { %v5036_v61 = vpack.c.bf16 %v4796_v4, %v4788_v10  ;;  %v4244_v39 = vpop.f32.mrb[72].mxu1  ;;  %6322 = vmatpush1.bf16.msra.mxu0 %v8230_v25  ;;  %v4878_v25 = vmax.f32 %v4484_v49, 0.0  ;;  %v4489_v49 = vpop.f32.mrb[29].mxu0 }
 0x45a   : > { %v4245_v34 = vadd.f32 %v4244_v39, %v10332_v38  ;;  %v4246_v63 = vpop.f32.mrb[73].mxu1  ;;  %6323 = vmatprep.subr.bf16.mxu0 %v8241_v51  ;;  %v10393_v42 = vpack.c.bf16 %v4877_v58, %v4869_v36  ;;  %v8248_v51 = vld [vmem:[%s11269_s7 + $0x230] ss:$8 sps:$4 sm:$0xff]   ;;  %v4488_v36 = vadd.f32 %v4487_v48, %v10241_v55  ;;  %v8257_v48 = vld [vmem:[%s11269_s7 + $0x240] ss:$8 sps:$4 sm:$0xff]  }
 0x45b   : > { %v4247_v1 = vadd.f32 %v4246_v63, %v10335_v53  ;;  %v4248_v44 = vpop.f32.mrb[74].mxu1  ;;  %6168 = vmatprep.mubr.bf16.mxu0 %v5036_v61  ;;  %v10399_v17 = vpack.c.bf16 %v4878_v25, %v4870_v59  ;;  %v8349_v61 = vld [vmem:[#allocation2 + $0xe4] sm:$0xff]   ;;  %v4490_v59 = vadd.f32 %v4489_v49, %v10244_v18 }
 0x45c   : > { %v4249_v10 = vadd.f32 %v4248_v44, %v10332_v38  ;;  %v4250_v4 = vpop.f32.mrb[75].mxu1  ;;  %6169 = vmatmul.mubr.bf16.gmra.mrb[68].mxu0 %v5035_v27  ;;  %11373 = vst [vmem:[#allocation10_spill] sm:$0xff] %v10393_v42  ;;  %v4803_v63 = vmax.f32 %v4245_v34, 0.0  ;;  %v8259_v27 = vld [vmem:[%s11269_s7 + $0x244] ss:$8 sps:$4 sm:$0xff]   ;;  %v4491_v44 = vpop.f32.mrb[30].mxu0 }
 0x45d   : > { %v4251_v6 = vadd.f32 %v4250_v4, %v10335_v53  ;;  %6324 = vmatpush1.bf16.msra.mxu0 %v8239_v43  ;;  %11374 = vst [vmem:[#allocation11_spill] sm:$0xff] %v10399_v17  ;;  %v4804_v43 = vmax.f32 %v4247_v1, 0.0  ;;  %v4885_v34 = vmax.f32 %v4488_v36, 0.0  ;;  %v4493_v4 = vpop.f32.mrb[31].mxu0  ;;  %v4886_v42 = vmax.f32 %v4490_v59, 0.0 }
 0x45e   : > { %v4811_v39 = vmax.f32 %v4249_v10, 0.0  ;;  %4739 = vmatmul.mubr.bf16.gmra.mrb[180].mxu1 %v8349_v61  ;;  %6325 = vmatprep.subr.bf16.mxu0 %v8250_v13  ;;  %v4492_v10 = vadd.f32 %v4491_v44, %v10241_v55  ;;  %v4494_v1 = vadd.f32 %v4493_v4, %v10244_v18 }
 0x45f   : > { %v4812_v58 = vmax.f32 %v4251_v6, 0.0  ;;  %4748 = vmatprep.mubr.bf16.mxu1 %v11365_v15 }
 0x460   : > { %v5043_v25 = vpack.c.bf16 %v4811_v39, %v4803_v63  ;;  %v8262_v63 = vld [vmem:[%s11269_s7 + $0x254] ss:$8 sps:$4 sm:$0xff]   ;;  %v4893_v39 = vmax.f32 %v4492_v10, 0.0  ;;  %v4497_v10 = vpop.f32.mrb[32].mxu0 }
 0x461   : > { %v5044_v13 = vpack.c.bf16 %v4812_v58, %v4804_v43  ;;  %v4254_v61 = vpop.f32.mrb[76].mxu1  ;;  %6326 = vmatpush1.bf16.msra.mxu0 %v8248_v51  ;;  %v4894_v51 = vmax.f32 %v4494_v1, 0.0  ;;  %v4499_v1 = vpop.f32.mrb[33].mxu0 }
 0x462   : > { %v4255_v6 = vadd.f32 %v4254_v61, %v10332_v38  ;;  %v4256_v17 = vpop.f32.mrb[77].mxu1  ;;  %6327 = vmatprep.subr.bf16.mxu0 %v8259_v27  ;;  %v10418_v59 = vpack.c.bf16 %v4893_v39, %v4885_v34  ;;  %v8260_v27 = vld [vmem:[%s11269_s7 + $0x250] ss:$8 sps:$4 sm:$0xff]   ;;  %v4498_v34 = vadd.f32 %v4497_v10, %v10241_v55  ;;  %v8263_v10 = vld [vmem:[%s11269_s7 + $0x260] ss:$8 sps:$4 sm:$0xff]  }
 0x463   : > { %v4257_v36 = vadd.f32 %v4256_v17, %v10335_v53  ;;  %v4258_v49 = vpop.f32.mrb[78].mxu1  ;;  %6178 = vmatprep.mubr.bf16.mxu0 %v5044_v13  ;;  %v10424_v4 = vpack.c.bf16 %v4894_v51, %v4886_v42  ;;  %v8350_v13 = vld [vmem:[#allocation2 + $0xf4] sm:$0xff]   ;;  %v4500_v42 = vadd.f32 %v4499_v1, %v10244_v18 }
 0x464   : > { %v4259_v43 = vadd.f32 %v4258_v49, %v10332_v38  ;;  %v4260_v58 = vpop.f32.mrb[79].mxu1  ;;  %6179 = vmatmul.mubr.bf16.gmra.mrb[72].mxu0 %v5043_v25  ;;  %11375 = vst [vmem:[#allocation12_spill] sm:$0xff] %v10418_v59  ;;  %v4819_v17 = vmax.f32 %v4255_v6, 0.0  ;;  %v8265_v25 = vld [vmem:[%s11269_s7 + $0x264] ss:$8 sps:$4 sm:$0xff]   ;;  %v4501_v49 = vpop.f32.mrb[34].mxu0 }
 0x465   : > { %v4261_v44 = vadd.f32 %v4260_v58, %v10335_v53  ;;  %6328 = vmatpush1.bf16.msra.mxu0 %v8257_v48  ;;  %v4820_v48 = vmax.f32 %v4257_v36, 0.0  ;;  %v4901_v6 = vmax.f32 %v4498_v34, 0.0  ;;  %v4503_v58 = vpop.f32.mrb[35].mxu0  ;;  %v4902_v59 = vmax.f32 %v4500_v42, 0.0 }
 0x466   : > { %v4827_v61 = vmax.f32 %v4259_v43, 0.0  ;;  %4749 = vmatmul.mubr.bf16.gmra.mrb[184].mxu1 %v8350_v13  ;;  %6329 = vmatprep.subr.bf16.mxu0 %v8262_v63  ;;  %v4502_v43 = vadd.f32 %v4501_v49, %v10241_v55  ;;  %v4504_v36 = vadd.f32 %v4503_v58, %v10244_v18 }
 0x467   : > { %v4828_v39 = vmax.f32 %v4261_v44, 0.0  ;;  %4758 = vmatprep.mubr.bf16.mxu1 %v11365_v15 }
 0x468   : > { %v5051_v51 = vpack.c.bf16 %v4827_v61, %v4819_v17  ;;  %v8268_v17 = vld [vmem:[%s11269_s7 + $0x274] ss:$8 sps:$4 sm:$0xff]   ;;  %v4909_v61 = vmax.f32 %v4502_v43, 0.0  ;;  %v4507_v43 = vpop.f32.mrb[36].mxu0 }
 0x469   : > { %v5052_v63 = vpack.c.bf16 %v4828_v39, %v4820_v48  ;;  %v4264_v13 = vpop.f32.mrb[80].mxu1  ;;  %6330 = vmatpush1.bf16.msra.mxu0 %v8260_v27  ;;  %v4910_v27 = vmax.f32 %v4504_v36, 0.0  ;;  %v4509_v36 = vpop.f32.mrb[37].mxu0 }
 0x46a   : > { %v4265_v15 = vadd.f32 %v4264_v13, %v10332_v38  ;;  %v4266_v44 = vpop.f32.mrb[81].mxu1  ;;  %6331 = vmatprep.subr.bf16.mxu0 %v8265_v25  ;;  %v10443_v42 = vpack.c.bf16 %v4909_v61, %v4901_v6  ;;  %v8266_v25 = vld [vmem:[%s11269_s7 + $0x270] ss:$8 sps:$4 sm:$0xff]   ;;  %v4508_v6 = vadd.f32 %v4507_v43, %v10241_v55  ;;  %v8269_v43 = vld [vmem:[%s11269_s7 + $0x280] ss:$8 sps:$4 sm:$0xff]  }
 0x46b   : > { %v4267_v34 = vadd.f32 %v4266_v44, %v10335_v53  ;;  %v4268_v1 = vpop.f32.mrb[82].mxu1  ;;  %6188 = vmatprep.mubr.bf16.mxu0 %v5052_v63  ;;  %v10449_v58 = vpack.c.bf16 %v4910_v27, %v4902_v59  ;;  %v8351_v63 = vld [vmem:[#allocation2 + $0x104] sm:$0xff]   ;;  %v4510_v59 = vadd.f32 %v4509_v36, %v10244_v18 }
 0x46c   : > { %v4269_v48 = vadd.f32 %v4268_v1, %v10332_v38  ;;  %v4270_v39 = vpop.f32.mrb[83].mxu1  ;;  %6189 = vmatmul.mubr.bf16.gmra.mrb[76].mxu0 %v5051_v51  ;;  %11376 = vst [vmem:[#allocation13_spill] sm:$0xff] %v10443_v42  ;;  %v4835_v13 = vmax.f32 %v4265_v15, 0.0  ;;  %v8271_v51 = vld [vmem:[%s11269_s7 + $0x284] ss:$8 sps:$4 sm:$0xff]   ;;  %v4511_v1 = vpop.f32.mrb[38].mxu0 }
 0x46d   : > { %v4271_v49 = vadd.f32 %v4270_v39, %v10335_v53  ;;  %6332 = vmatpush1.bf16.msra.mxu0 %v8263_v10  ;;  %v4836_v10 = vmax.f32 %v4267_v34, 0.0  ;;  %v4917_v15 = vmax.f32 %v4508_v6, 0.0  ;;  %v4513_v39 = vpop.f32.mrb[39].mxu0  ;;  %v4918_v42 = vmax.f32 %v4510_v59, 0.0 }
 0x46e   : > { %v4843_v44 = vmax.f32 %v4269_v48, 0.0  ;;  %4759 = vmatmul.mubr.bf16.gmra.mrb[188].mxu1 %v8351_v63  ;;  %6333 = vmatprep.subr.bf16.mxu0 %v8268_v17  ;;  %v4512_v48 = vadd.f32 %v4511_v1, %v10241_v55  ;;  %v4514_v34 = vadd.f32 %v4513_v39, %v10244_v18 }
 0x46f   : > { %v4844_v61 = vmax.f32 %v4271_v49, 0.0  ;;  %5965 = vmatprep.mubr.bf16.mxu1 %v10052_v47 }
 0x470   : > { %v5059_v27 = vpack.c.bf16 %v4843_v44, %v4835_v13  ;;  %v8274_v13 = vld [vmem:[%s11269_s7 + $0x294] ss:$8 sps:$4 sm:$0xff]   ;;  %v4925_v44 = vmax.f32 %v4512_v48, 0.0  ;;  %v4517_v48 = vpop.f32.mrb[40].mxu0 }
 0x471   : > { %v5060_v17 = vpack.c.bf16 %v4844_v61, %v4836_v10  ;;  %v4274_v63 = vpop.f32.mrb[84].mxu1  ;;  %6334 = vmatpush1.bf16.msra.mxu0 %v8266_v25  ;;  %v4926_v25 = vmax.f32 %v4514_v34, 0.0 }
 0x472   : > { %v4275_v47 = vadd.f32 %v4274_v63, %v10332_v38  ;;  %v4276_v49 = vpop.f32.mrb[85].mxu1  ;;  %6335 = vmatprep.subr.bf16.mxu0 %v8271_v51  ;;  %v10468_v59 = vpack.c.bf16 %v4925_v44, %v4917_v15  ;;  %v8272_v51 = vld [vmem:[%s11269_s7 + $0x290] ss:$8 sps:$4 sm:$0xff]   ;;  %v4518_v15 = vadd.f32 %v4517_v48, %v10241_v55 }
 0x473   : > { %v4277_v6 = vadd.f32 %v4276_v49, %v10335_v53  ;;  %v4278_v36 = vpop.f32.mrb[86].mxu1  ;;  %6198 = vmatprep.mubr.bf16.mxu0 %v5060_v17  ;;  %v10474_v39 = vpack.c.bf16 %v4926_v25, %v4918_v42  ;;  %v4519_v17 = vpop.f32.mrb[41].mxu0 }
 0x474   : > { %v4279_v10 = vadd.f32 %v4278_v36, %v10332_v38  ;;  %v4280_v61 = vpop.f32.mrb[87].mxu1  ;;  %6199 = vmatmul.mubr.bf16.gmra.mrb[80].mxu0 %v5059_v27  ;;  %v4851_v63 = vmax.f32 %v4275_v47, 0.0  ;;  %v8277_v27 = vld [vmem:[%s11269_s7 + $0x2a4] ss:$8 sps:$4 sm:$0xff]   ;;  %v4520_v42 = vadd.f32 %v4519_v17, %v10244_v18  ;;  %v4521_v44 = vpop.f32.mrb[42].mxu0  ;;  %v4933_v47 = vmax.f32 %v4518_v15, 0.0 }
 0x475   : > { %v4281_v1 = vadd.f32 %v4280_v61, %v10335_v53  ;;  %6336 = vmatpush1.bf16.msra.mxu0 %v8269_v43  ;;  %v4852_v43 = vmax.f32 %v4277_v6, 0.0  ;;  %v4522_v25 = vadd.f32 %v4521_v44, %v10241_v55  ;;  %v8275_v61 = vld [vmem:[%s11269_s7 + $0x2a0] ss:$8 sps:$4 sm:$0xff]  }
 0x476   : > { %v4859_v49 = vmax.f32 %v4279_v10, 0.0  ;;  %5966 = vmatmul.mubr.bf16.vlgmr.msra.gmra.mrb[192].mxu1 %v10050_v22  ;;  %6337 = vmatprep.subr.bf16.mxu0 %v8274_v13  ;;  %v4523_v22 = vpop.f32.mrb[43].mxu0  ;;  %v4934_v48 = vmax.f32 %v4520_v42, 0.0 }
 0x477   : > { %v4860_v34 = vmax.f32 %v4281_v1, 0.0  ;;  %5975 = vmatprep.mubr.bf16.mxu1 %v10062_v21  ;;  %v4524_v6 = vadd.f32 %v4523_v22, %v10244_v18 }
 0x478   : > { %v5067_v36 = vpack.c.bf16 %v4859_v49, %v4851_v63  ;;  %v8280_v63 = vld [vmem:[%s11269_s7 + $0x2b4] ss:$8 sps:$4 sm:$0xff]   ;;  %v4941_v49 = vmax.f32 %v4522_v25, 0.0  ;;  %v4527_v25 = vpop.f32.mrb[44].mxu0 }
 0x479   : > { %v5068_v13 = vpack.c.bf16 %v4860_v34, %v4852_v43  ;;  %v4284_v10 = vpop.f32.mrb[88].mxu1  ;;  %6338 = vmatpush1.bf16.msra.mxu0 %v8272_v51  ;;  %v4942_v51 = vmax.f32 %v4524_v6, 0.0 }
 0x47a   : > { %v4285_v21 = vadd.f32 %v4284_v10, %v10332_v38  ;;  %v4286_v1 = vpop.f32.mrb[89].mxu1  ;;  %6339 = vmatprep.subr.bf16.mxu0 %v8277_v27  ;;  %v10494_v42 = vpack.c.bf16 %v4941_v49, %v4933_v47  ;;  %v8278_v27 = vld [vmem:[%s11269_s7 + $0x2b0] ss:$8 sps:$4 sm:$0xff]   ;;  %v4528_v47 = vadd.f32 %v4527_v25, %v10241_v55 }
 0x47b   : > { %v4287_v15 = vadd.f32 %v4286_v1, %v10335_v53  ;;  %v4288_v17 = vpop.f32.mrb[90].mxu1  ;;  %6208 = vmatprep.mubr.bf16.mxu0 %v5068_v13  ;;  %v10500_v22 = vpack.c.bf16 %v4942_v51, %v4934_v48  ;;  %v4529_v13 = vpop.f32.mrb[45].mxu0 }
 0x47c   : > { %v4289_v43 = vadd.f32 %v4288_v17, %v10332_v38  ;;  %v4290_v34 = vpop.f32.mrb[91].mxu1  ;;  %6209 = vmatmul.mubr.bf16.gmra.mrb[84].mxu0 %v5067_v36  ;;  %v4867_v10 = vmax.f32 %v4285_v21, 0.0  ;;  %v8283_v36 = vld [vmem:[%s11269_s7 + $0x2c4] ss:$8 sps:$4 sm:$0xff]   ;;  %v4530_v48 = vadd.f32 %v4529_v13, %v10244_v18  ;;  %v4531_v49 = vpop.f32.mrb[46].mxu0  ;;  %v4949_v21 = vmax.f32 %v4528_v47, 0.0 }
 0x47d   : > { %v4291_v44 = vadd.f32 %v4290_v34, %v10335_v53  ;;  %6340 = vmatpush1.bf16.msra.mxu0 %v8275_v61  ;;  %v4868_v61 = vmax.f32 %v4287_v15, 0.0  ;;  %v4532_v51 = vadd.f32 %v4531_v49, %v10241_v55  ;;  %v8281_v34 = vld [vmem:[%s11269_s7 + $0x2c0] ss:$8 sps:$4 sm:$0xff]  }
 0x47e   : > { %v4875_v1 = vmax.f32 %v4289_v43, 0.0  ;;  %5976 = vmatmul.mubr.bf16.gmra.mrb[196].mxu1 %v10060_v16  ;;  %6341 = vmatprep.subr.bf16.mxu0 %v8280_v63  ;;  %v4533_v16 = vpop.f32.mrb[47].mxu0  ;;  %v4950_v25 = vmax.f32 %v4530_v48, 0.0 }
 0x47f   : > { %v4876_v6 = vmax.f32 %v4291_v44, 0.0  ;;  %5985 = vmatprep.mubr.bf16.mxu1 %v10075_v50  ;;  %v4534_v15 = vadd.f32 %v4533_v16, %v10244_v18 }
 0x480   : > { %v5075_v17 = vpack.c.bf16 %v4875_v1, %v4867_v10  ;;  %v8286_v10 = vld [vmem:[%s11269_s7 + $0x2d4] ss:$8 sps:$4 sm:$0xff]   ;;  %v4957_v1 = vmax.f32 %v4532_v51, 0.0  ;;  %v4537_v51 = vpop.f32.mrb[48].mxu0 }
 0x481   : > { %v5076_v63 = vpack.c.bf16 %v4876_v6, %v4868_v61  ;;  %v4294_v43 = vpop.f32.mrb[92].mxu1  ;;  %6342 = vmatpush1.bf16.msra.mxu0 %v8278_v27  ;;  %v4958_v27 = vmax.f32 %v4534_v15, 0.0 }
 0x482   : > { %v4295_v50 = vadd.f32 %v4294_v43, %v10332_v38  ;;  %v4296_v44 = vpop.f32.mrb[93].mxu1  ;;  %6343 = vmatprep.subr.bf16.mxu0 %v8283_v36  ;;  %v10520_v48 = vpack.c.bf16 %v4957_v1, %v4949_v21  ;;  %v8284_v36 = vld [vmem:[%s11269_s7 + $0x2d0] ss:$8 sps:$4 sm:$0xff]   ;;  %v4538_v21 = vadd.f32 %v4537_v51, %v10241_v55 }
 0x483   : > { %v4297_v47 = vadd.f32 %v4296_v44, %v10335_v53  ;;  %v4298_v13 = vpop.f32.mrb[94].mxu1  ;;  %6218 = vmatprep.mubr.bf16.mxu0 %v5076_v63  ;;  %v10526_v16 = vpack.c.bf16 %v4958_v27, %v4950_v25  ;;  %v4539_v63 = vpop.f32.mrb[49].mxu0 }
 0x484   : > { %v4299_v61 = vadd.f32 %v4298_v13, %v10332_v38  ;;  %v4300_v6 = vpop.f32.mrb[95].mxu1  ;;  %6219 = vmatmul.mubr.bf16.gmra.mrb[88].mxu0 %v5075_v17  ;;  %v4883_v43 = vmax.f32 %v4295_v50, 0.0  ;;  %v8289_v17 = vld [vmem:[%s11269_s7 + $0x2e4] ss:$8 sps:$4 sm:$0xff]   ;;  %v4540_v25 = vadd.f32 %v4539_v63, %v10244_v18  ;;  %v4541_v1 = vpop.f32.mrb[50].mxu0  ;;  %v4965_v50 = vmax.f32 %v4538_v21, 0.0 }
 0x485   : > { %v4301_v49 = vadd.f32 %v4300_v6, %v10335_v53  ;;  %6344 = vmatpush1.bf16.msra.mxu0 %v8281_v34  ;;  %v4884_v34 = vmax.f32 %v4297_v47, 0.0  ;;  %v4542_v27 = vadd.f32 %v4541_v1, %v10241_v55  ;;  %v8287_v6 = vld [vmem:[%s11269_s7 + $0x2e0] ss:$8 sps:$4 sm:$0xff]  }
 0x486   : > { %v4891_v44 = vmax.f32 %v4299_v61, 0.0  ;;  %5986 = vmatmul.mubr.bf16.gmra.mrb[200].mxu1 %v10073_v14  ;;  %6345 = vmatprep.subr.bf16.mxu0 %v8286_v10  ;;  %v4543_v14 = vpop.f32.mrb[51].mxu0  ;;  %v4966_v51 = vmax.f32 %v4540_v25, 0.0 }
 0x487   : > { %v4892_v15 = vmax.f32 %v4301_v49, 0.0  ;;  %5995 = vmatprep.mubr.bf16.mxu1 %v10085_v29  ;;  %v4544_v47 = vadd.f32 %v4543_v14, %v10244_v18 }
 0x488   : > { %v5083_v13 = vpack.c.bf16 %v4891_v44, %v4883_v43  ;;  %v8292_v43 = vld [vmem:[%s11269_s7 + $0x2f4] ss:$8 sps:$4 sm:$0xff]   ;;  %v4973_v44 = vmax.f32 %v4542_v27, 0.0  ;;  %v4547_v27 = vpop.f32.mrb[52].mxu0 }
 0x489   : > { %v5084_v10 = vpack.c.bf16 %v4892_v15, %v4884_v34  ;;  %v4304_v61 = vpop.f32.mrb[96].mxu1  ;;  %6346 = vmatpush1.bf16.msra.mxu0 %v8284_v36  ;;  %v4974_v36 = vmax.f32 %v4544_v47, 0.0 }
 0x48a   : > { %v4305_v29 = vadd.f32 %v4304_v61, %v10332_v38  ;;  %v4306_v49 = vpop.f32.mrb[97].mxu1  ;;  %6347 = vmatprep.subr.bf16.mxu0 %v8289_v17  ;;  %v10546_v25 = vpack.c.bf16 %v4973_v44, %v4965_v50  ;;  %v8290_v17 = vld [vmem:[%s11269_s7 + $0x2f0] ss:$8 sps:$4 sm:$0xff]   ;;  %v4548_v50 = vadd.f32 %v4547_v27, %v10241_v55 }
 0x48b   : > { %v4307_v21 = vadd.f32 %v4306_v49, %v10335_v53  ;;  %v4308_v63 = vpop.f32.mrb[98].mxu1  ;;  %6228 = vmatprep.mubr.bf16.mxu0 %v5084_v10  ;;  %v10552_v14 = vpack.c.bf16 %v4974_v36, %v4966_v51  ;;  %v4549_v10 = vpop.f32.mrb[53].mxu0 }
 0x48c   : > { %v4309_v34 = vadd.f32 %v4308_v63, %v10332_v38  ;;  %v4310_v15 = vpop.f32.mrb[99].mxu1  ;;  %6229 = vmatmul.mubr.bf16.gmra.mrb[92].mxu0 %v5083_v13  ;;  %11377 = vst [vmem:[#allocation14_spill] sm:$0xff] %v10546_v25  ;;  %v4899_v61 = vmax.f32 %v4305_v29, 0.0  ;;  %v8295_v13 = vld [vmem:[%s11269_s7 + $0x304] ss:$8 sps:$4 sm:$0xff]   ;;  %v4550_v51 = vadd.f32 %v4549_v10, %v10244_v18  ;;  %v4551_v44 = vpop.f32.mrb[54].mxu0 }
 0x48d   : > { %v4311_v1 = vadd.f32 %v4310_v15, %v10335_v53  ;;  %6348 = vmatpush1.bf16.msra.mxu0 %v8287_v6  ;;  %v4900_v6 = vmax.f32 %v4307_v21, 0.0  ;;  %v4981_v29 = vmax.f32 %v4548_v50, 0.0  ;;  %v4552_v36 = vadd.f32 %v4551_v44, %v10241_v55 }
 0x48e   : > { %v4907_v49 = vmax.f32 %v4309_v34, 0.0  ;;  %5996 = vmatmul.mubr.bf16.gmra.mrb[204].mxu1 %v10083_v7  ;;  %6349 = vmatprep.subr.bf16.mxu0 %v8292_v43  ;;  %v4553_v7 = vpop.f32.mrb[55].mxu0  ;;  %v4982_v15 = vmax.f32 %v4550_v51, 0.0 }
 0x48f   : > { %v4908_v47 = vmax.f32 %v4311_v1, 0.0  ;;  %6005 = vmatprep.mubr.bf16.mxu1 %v10095_v45  ;;  %v4554_v25 = vadd.f32 %v4553_v7, %v10244_v18  ;;  %v4989_v1 = vmax.f32 %v4552_v36, 0.0  ;;  %v4557_v51 = vpop.f32.mrb[56].mxu0 }
 0x490   : > { %v5091_v63 = vpack.c.bf16 %v4907_v49, %v4899_v61  ;;  %v4559_v36 = vpop.f32.mrb[57].mxu0 }
 0x491   : > { %v5092_v43 = vpack.c.bf16 %v4908_v47, %v4900_v6  ;;  %v4314_v34 = vpop.f32.mrb[100].mxu1  ;;  %6350 = vmatpush1.bf16.msra.mxu0 %v8290_v17  ;;  %v4990_v61 = vmax.f32 %v4554_v25, 0.0  ;;  %v10566_v6 = vpack.c.bf16 %v4989_v1, %v4981_v29  ;;  %v4561_v29 = vpop.f32.mrb[58].mxu0 }
 0x492   : > { %v4315_v27 = vadd.f32 %v4314_v34, %v10332_v38  ;;  %v4316_v21 = vpop.f32.mrb[101].mxu1  ;;  %6512 = vmatprep.subr.bf16.mxu0 %v8295_v13  ;;  %v4558_v13 = vadd.f32 %v4557_v51, %v10241_v55  ;;  %v4563_v1 = vpop.f32.mrb[59].mxu0 }
 0x493   : > { %v4317_v45 = vadd.f32 %v4316_v21, %v10335_v53  ;;  %v4318_v10 = vpop.f32.mrb[102].mxu1  ;;  %6238 = vmatprep.mubr.bf16.mxu0 %v5092_v43  ;;  %v10569_v47 = vpack.c.bf16 %v4990_v61, %v4982_v15  ;;  %v4562_v15 = vadd.f32 %v4561_v29, %v10241_v55 }
 0x494   : > { %v4319_v49 = vadd.f32 %v4318_v10, %v10332_v38  ;;  %v4320_v50 = vpop.f32.mrb[103].mxu1  ;;  %6239 = vmatmul.mubr.bf16.gmra.mrb[96].mxu0 %v5091_v63  ;;  %v4915_v44 = vmax.f32 %v4315_v27, 0.0  ;;  %v4560_v63 = vadd.f32 %v4559_v36, %v10244_v18  ;;  %v4997_v21 = vmax.f32 %v4558_v13, 0.0 }
 0x495   : > { %v4321_v17 = vadd.f32 %v4320_v50, %v10335_v53  ;;  %v4916_v43 = vmax.f32 %v4317_v45, 0.0  ;;  %v5005_v45 = vmax.f32 %v4562_v15, 0.0 }
 0x496   : > { %v4923_v7 = vmax.f32 %v4319_v49, 0.0  ;;  %6006 = vmatmul.mubr.bf16.gmra.mrb[208].mxu1 %v10093_v30  ;;  %v4998_v61 = vmax.f32 %v4560_v63, 0.0  ;;  %v4564_v30 = vadd.f32 %v4563_v1, %v10244_v18 }
 0x497   : > { %v4924_v25 = vmax.f32 %v4321_v17, 0.0  ;;  %6015 = vmatprep.mubr.bf16.mxu1 %v10116_v33  ;;  %v10580_v13 = vpack.c.bf16 %v5005_v45, %v4997_v21 }
 0x498   : > { %v5099_v34 = vpack.c.bf16 %v4923_v7, %v4915_v44  ;;  %v5006_v51 = vmax.f32 %v4564_v30, 0.0 }
 0x499   : > { %v5100_v10 = vpack.c.bf16 %v4924_v25, %v4916_v43  ;;  %v4324_v27 = vpop.f32.mrb[104].mxu1  ;;  %v4567_v25 = vpop.f32.mrb[60].mxu0 }
 0x49a   : > { %v4325_v49 = vadd.f32 %v4324_v27, %v10332_v38  ;;  %v4326_v50 = vpop.f32.mrb[105].mxu1  ;;  %v10583_v43 = vpack.c.bf16 %v5006_v51, %v4998_v61  ;;  %v4568_v15 = vadd.f32 %v4567_v25, %v10241_v55  ;;  %v4569_v1 = vpop.f32.mrb[61].mxu0 }
 0x49b   : > { %v4327_v17 = vadd.f32 %v4326_v50, %v10335_v53  ;;  %v4328_v33 = vpop.f32.mrb[106].mxu1  ;;  %6248 = vmatprep.mubr.bf16.mxu0 %v5100_v10  ;;  %v4571_v21 = vpop.f32.mrb[62].mxu0 }
 0x49c   : > { %v4329_v44 = vadd.f32 %v4328_v33, %v10332_v38  ;;  %v4330_v7 = vpop.f32.mrb[107].mxu1  ;;  %6249 = vmatmul.mubr.bf16.gmra.mrb[100].mxu0 %v5099_v34  ;;  %v4931_v63 = vmax.f32 %v4325_v49, 0.0  ;;  %v4570_v34 = vadd.f32 %v4569_v1, %v10244_v18  ;;  %v5013_v50 = vmax.f32 %v4568_v15, 0.0  ;;  %v4573_v45 = vpop.f32.mrb[63].mxu0 }
 0x49d   : > { %v4331_v36 = vadd.f32 %v4330_v7, %v10335_v53  ;;  %v4932_v10 = vmax.f32 %v4327_v17, 0.0  ;;  %v4572_v61 = vadd.f32 %v4571_v21, %v10241_v55 }
 0x49e   : > { %v4939_v29 = vmax.f32 %v4329_v44, 0.0  ;;  %6016 = vmatmul.mubr.bf16.gmra.mrb[212].mxu1 %v10111_v24  ;;  %v5014_v51 = vmax.f32 %v4570_v34, 0.0  ;;  %v4574_v24 = vadd.f32 %v4573_v45, %v10244_v18 }
 0x49f   : > { %v4940_v27 = vmax.f32 %v4331_v36, 0.0  ;;  %6025 = vmatprep.mubr.bf16.mxu1 %v10137_v31  ;;  %v5021_v17 = vmax.f32 %v4572_v61, 0.0 }
 0x4a0   : > { %v5107_v30 = vpack.c.bf16 %v4939_v29, %v4931_v63  ;;  %v5022_v25 = vmax.f32 %v4574_v24, 0.0 }
 0x4a1   : > { %v5108_v33 = vpack.c.bf16 %v4940_v27, %v4932_v10  ;;  %v4334_v49 = vpop.f32.mrb[108].mxu1  ;;  %v10594_v55 = vpack.c.bf16 %v5021_v17, %v5013_v50 }
 0x4a2   : > { %v4335_v44 = vadd.f32 %v4334_v49, %v10332_v38  ;;  %v4336_v7 = vpop.f32.mrb[109].mxu1  ;;  %v10597_v1 = vpack.c.bf16 %v5022_v25, %v5014_v51 }
 0x4a3   : > { %v4337_v36 = vadd.f32 %v4336_v7, %v10335_v53  ;;  %v4338_v31 = vpop.f32.mrb[110].mxu1  ;;  %6258 = vmatprep.mubr.bf16.mxu0 %v5108_v33 }
 0x4a4   : > { %v4339_v63 = vadd.f32 %v4338_v31, %v10332_v38  ;;  %v4340_v29 = vpop.f32.mrb[111].mxu1  ;;  %6259 = vmatmul.mubr.bf16.gmra.mrb[104].mxu0 %v5107_v30  ;;  %v4947_v18 = vmax.f32 %v4335_v44, 0.0 }
 0x4a5   : > { %v4341_v15 = vadd.f32 %v4340_v29, %v10335_v53  ;;  %v4948_v27 = vmax.f32 %v4337_v36, 0.0 }
 0x4a6   : > { %v4955_v10 = vmax.f32 %v4339_v63, 0.0  ;;  %6026 = vmatmul.mubr.bf16.gmra.mrb[216].mxu1 %v10132_v3 }
 0x4a7   : > { %v4956_v34 = vmax.f32 %v4341_v15, 0.0  ;;  %6035 = vmatprep.mubr.bf16.mxu1 %v10159_v32 }
 0x4a8   : > { %v5115_v21 = vpack.c.bf16 %v4955_v10, %v4947_v18 }
 0x4a9   : > { %v5116_v61 = vpack.c.bf16 %v4956_v34, %v4948_v27  ;;  %v4344_v45 = vpop.f32.mrb[112].mxu1 }
 0x4aa   : > { %v4345_v33 = vadd.f32 %v4344_v45, %v10332_v38  ;;  %v4346_v30 = vpop.f32.mrb[113].mxu1 }
 0x4ab   : > { %v4347_v50 = vadd.f32 %v4346_v30, %v10335_v53  ;;  %v4348_v49 = vpop.f32.mrb[114].mxu1  ;;  %6268 = vmatprep.mubr.bf16.mxu0 %v5116_v61 }
 0x4ac   : > { %v4349_v51 = vadd.f32 %v4348_v49, %v10332_v38  ;;  %v4350_v24 = vpop.f32.mrb[115].mxu1  ;;  %6269 = vmatmul.mubr.bf16.gmra.mrb[108].mxu0 %v5115_v21  ;;  %v4963_v44 = vmax.f32 %v4345_v33, 0.0 }
 0x4ad   : > { %v4351_v3 = vadd.f32 %v4350_v24, %v10335_v53  ;;  %v4964_v32 = vmax.f32 %v4347_v50, 0.0 }
 0x4ae   : > { %v4971_v7 = vmax.f32 %v4349_v51, 0.0  ;;  %6036 = vmatmul.mubr.bf16.gmra.mrb[220].mxu1 %v10154_v9 }
 0x4af   : > { %v4972_v17 = vmax.f32 %v4351_v3, 0.0  ;;  %6045 = vmatprep.mubr.bf16.mxu1 %v10181_v35 }
 0x4b0   : > { %v5123_v36 = vpack.c.bf16 %v4971_v7, %v4963_v44 }
 0x4b1   : > { %v5124_v31 = vpack.c.bf16 %v4972_v17, %v4964_v32  ;;  %v4354_v25 = vpop.f32.mrb[116].mxu1 }
 0x4b2   : > { %v4355_v63 = vadd.f32 %v4354_v25, %v10332_v38  ;;  %v4356_v29 = vpop.f32.mrb[117].mxu1 }
 0x4b3   : > { %v4357_v15 = vadd.f32 %v4356_v29, %v10335_v53  ;;  %v4358_v18 = vpop.f32.mrb[118].mxu1  ;;  %6278 = vmatprep.mubr.bf16.mxu0 %v5124_v31 }
 0x4b4   : > { %v4359_v10 = vadd.f32 %v4358_v18, %v10332_v38  ;;  %v4360_v27 = vpop.f32.mrb[119].mxu1  ;;  %6279 = vmatmul.mubr.bf16.gmra.mrb[112].mxu0 %v5123_v36  ;;  %v4979_v34 = vmax.f32 %v4355_v63, 0.0 }
 0x4b5   : > { %v4361_v9 = vadd.f32 %v4360_v27, %v10335_v53  ;;  %v4980_v35 = vmax.f32 %v4357_v15, 0.0  ;;  %v3567_v15 = vsub.s32 6, %v10001_v2  ;;  %v3571_v27 = vsub.s32 7, %v10001_v2 }
 0x4b6   : > { %v4987_v21 = vmax.f32 %v4359_v10, 0.0  ;;  %6046 = vmatmul.mubr.bf16.gmra.mrb[224].mxu1 %v10176_v37 }
 0x4b7   : > { %v4988_v61 = vmax.f32 %v4361_v9, 0.0  ;;  %6055 = vmatprep.mubr.bf16.mxu1 %v10203_v12 }
 0x4b8   : > { %v5131_v45 = vpack.c.bf16 %v4987_v21, %v4979_v34 }
 0x4b9   : > { %v5132_v33 = vpack.c.bf16 %v4988_v61, %v4980_v35  ;;  %v4364_v30 = vpop.f32.mrb[120].mxu1  ;;  %v8352_v35 = vld [vmem:[%s11268_s6] sm:$0xff] }
 0x4ba   : > { %v4365_v50 = vadd.f32 %v4364_v30, %v10332_v38  ;;  %v4366_v49 = vpop.f32.mrb[121].mxu1  ;;  %v10629_v61 = vrot.slane %v8352_v35, %v3567_v15  ;;  %v10632_v30 = vrot.slane %v8352_v35, %v3571_v27  ;;  %v8296_v27 = vld [vmem:[%s11269_s7 + $0x310] ss:$8 sps:$4 sm:$0xff]  }
 0x4bb   : > { %v4367_v51 = vadd.f32 %v4366_v49, %v10335_v53  ;;  %v4368_v24 = vpop.f32.mrb[122].mxu1  ;;  %6288 = vmatprep.mubr.bf16.mxu0 %v5132_v33 }
 0x4bc   : > { %v4369_v3 = vadd.f32 %v4368_v24, %v10332_v38  ;;  %v4370_v44 = vpop.f32.mrb[123].mxu1  ;;  %6289 = vmatmul.mubr.bf16.gmra.mrb[116].mxu0 %v5131_v45  ;;  %v4995_v7 = vmax.f32 %v4365_v50, 0.0 }
 0x4bd   : > { %v4371_v37 = vadd.f32 %v4370_v44, %v10335_v53  ;;  %v4996_v12 = vmax.f32 %v4367_v51, 0.0 }
 0x4be   : > { %v5003_v32 = vmax.f32 %v4369_v3, 0.0  ;;  %6056 = vmatmul.mubr.bf16.gmra.mrb[228].mxu1 %v10198_v54 }
 0x4bf   : > { %v5004_v17 = vmax.f32 %v4371_v37, 0.0  ;;  %6065 = vmatprep.mubr.bf16.mxu1 %v10225_v20 }
 0x4c0   : > { %v5139_v36 = vpack.c.bf16 %v5003_v32, %v4995_v7 }
 0x4c1   : > { %v5140_v31 = vpack.c.bf16 %v5004_v17, %v4996_v12  ;;  %v4374_v25 = vpop.f32.mrb[124].mxu1 }
 0x4c2   : > { %v4375_v63 = vadd.f32 %v4374_v25, %v10332_v38  ;;  %v4376_v29 = vpop.f32.mrb[125].mxu1 }
 0x4c3   : > { %v4377_v18 = vadd.f32 %v4376_v29, %v10335_v53  ;;  %v4378_v10 = vpop.f32.mrb[126].mxu1  ;;  %6298 = vmatprep.mubr.bf16.mxu0 %v5140_v31 }
 0x4c4   : > { %v4379_v54 = vadd.f32 %v4378_v10, %v10332_v38  ;;  %v4380_v9 = vpop.f32.mrb[127].mxu1  ;;  %6299 = vmatmul.mubr.bf16.gmra.mrb[120].mxu0 %v5139_v36  ;;  %v5011_v34 = vmax.f32 %v4375_v63, 0.0  ;;  %v8293_v36 = vld [vmem:[%s11269_s7 + $0x300] ss:$8 sps:$4 sm:$0xff]  }
 0x4c5   : > { %v4381_v20 = vadd.f32 %v4380_v9, %v10335_v53  ;;  %v5012_v45 = vmax.f32 %v4377_v18, 0.0 }
 0x4c6   : > { %v5019_v21 = vmax.f32 %v4379_v54, 0.0  ;;  %6066 = vmatmul.mubr.bf16.gmra.mrb[232].mxu1 %v10220_v26 }
 0x4c7   : > { %v5020_v33 = vmax.f32 %v4381_v20, 0.0  ;;  %6075 = vmatprep.mubr.bf16.mxu1 %v10258_v19 }
 0x4c8   : > { %v5147_v38 = vpack.c.bf16 %v5019_v21, %v5011_v34  ;;  %v8299_v21 = vld [vmem:[%s11269_s7 + $0x320] ss:$8 sps:$4 sm:$0xff]  }
 0x4c9   : > { %v5148_v50 = vpack.c.bf16 %v5020_v33, %v5012_v45  ;;  %v4610_v49 = vpop.f32.mrb[128].mxu1 }
 0x4ca   : > { %v4611_v53 = vadd.f32 %v4610_v49, %v10629_v61  ;;  %v4612_v51 = vpop.f32.mrb[129].mxu1 }
 0x4cb   : > { %6308 = vmatprep.mubr.bf16.mxu0 %v5148_v50  ;;  %v4613_v26 = vadd.f32 %v4612_v51, %v10632_v30  ;;  %v4614_v24 = vpop.f32.mrb[130].mxu1 }
 0x4cc   : > { %6309 = vmatmul.mubr.bf16.gmra.mrb[124].mxu0 %v5147_v38  ;;  %v4775_v3 = vmax.f32 %v4611_v53, 0.0  ;;  %v4615_v44 = vadd.f32 %v4614_v24, %v10629_v61  ;;  %v4616_v37 = vpop.f32.mrb[131].mxu1 }
 0x4cd   : > { %6351 = vmatprep.mubr.bf16.mxu0 %v10273_v28  ;;  %v4776_v19 = vmax.f32 %v4613_v26, 0.0  ;;  %v4617_v7 = vadd.f32 %v4616_v37, %v10632_v30  ;;  %v8298_v28 = vld [vmem:[%s11269_s7 + $0x314] ss:$8 sps:$4 sm:$0xff]   ;;  %v8302_v26 = vld [vmem:[%s11269_s7 + $0x330] ss:$8 sps:$4 sm:$0xff]  }
 0x4ce   : > { %6076 = vmatmul.mubr.bf16.gmra.mrb[236].mxu1 %v10250_v62  ;;  %v4783_v32 = vmax.f32 %v4615_v44, 0.0 }
 0x4cf   : > { %6085 = vmatprep.mubr.bf16.mxu1 %v10284_v60  ;;  %v4784_v12 = vmax.f32 %v4617_v7, 0.0 }
 0x4d0   : > { %v10641_v17 = vpack.c.bf16 %v4783_v32, %v4775_v3 }
 0x4d1   : > { %v10646_v31 = vpack.c.bf16 %v4784_v12, %v4776_v19  ;;  %v4620_v25 = vpop.f32.mrb[132].mxu1  ;;  %v8305_v19 = vld [vmem:[%s11269_s7 + $0x340] ss:$8 sps:$4 sm:$0xff]  }
 0x4d2   : > { %v4621_v63 = vadd.f32 %v4620_v25, %v10629_v61  ;;  %v4622_v62 = vpop.f32.mrb[133].mxu1 }
 0x4d3   : > { %v4623_v29 = vadd.f32 %v4622_v62, %v10632_v30  ;;  %v4624_v60 = vpop.f32.mrb[134].mxu1 }
 0x4d4   : > { %6352 = vmatmul.mubr.bf16.vlgmr.msra.gmra.mrb[64].mxu0 %v10270_v11  ;;  %v4791_v15 = vmax.f32 %v4621_v63, 0.0  ;;  %v4625_v18 = vadd.f32 %v4624_v60, %v10629_v61  ;;  %v4626_v10 = vpop.f32.mrb[135].mxu1  ;;  %v8301_v11 = vld [vmem:[%s11269_s7 + $0x324] ss:$8 sps:$4 sm:$0xff]   ;;  %v8308_v60 = vld [vmem:[%s11269_s7 + $0x350] ss:$8 sps:$4 sm:$0xff]  }
 0x4d5   : > { %6361 = vmatprep.mubr.bf16.mxu0 %v10293_v23  ;;  %6513 = vmatpush1.bf16.msra.mxu0 %v8293_v36  ;;  %v4792_v54 = vmax.f32 %v4623_v29, 0.0  ;;  %v4627_v9 = vadd.f32 %v4626_v10, %v10632_v30  ;;  %v11379_v10 = vld [vmem:[#allocation4_spill] sm:$0xff] }
 0x4d6   : > { %6086 = vmatmul.mubr.bf16.gmra.mrb[240].mxu1 %v10279_v8  ;;  %6514 = vmatprep.subr.bf16.mxu0 %v8298_v28  ;;  %v4799_v20 = vmax.f32 %v4625_v18, 0.0  ;;  %v8304_v8 = vld [vmem:[%s11269_s7 + $0x334] ss:$8 sps:$4 sm:$0xff]  }
 0x4d7   : > { %6095 = vmatprep.mubr.bf16.mxu1 %v10301_v52  ;;  %v4800_v34 = vmax.f32 %v4627_v9, 0.0  ;;  %v11378_v28 = vld [vmem:[#allocation3_spill] sm:$0xff] }
 0x4d8   : > { %v10665_v23 = vpack.c.bf16 %v4799_v20, %v4791_v15 }
 0x4d9   : > { %6515 = vmatpush1.bf16.msra.mxu0 %v8296_v27  ;;  %v10670_v35 = vpack.c.bf16 %v4800_v34, %v4792_v54  ;;  %v4630_v45 = vpop.f32.mrb[136].mxu1  ;;  %v8313_v27 = vld [vmem:[%s11269_s7 + $0x364] ss:$8 sps:$4 sm:$0xff]  }
 0x4da   : > { %6516 = vmatprep.subr.bf16.mxu0 %v8301_v11  ;;  %v4631_v33 = vadd.f32 %v4630_v45, %v10629_v61  ;;  %v4632_v38 = vpop.f32.mrb[137].mxu1  ;;  %v8311_v11 = vld [vmem:[%s11269_s7 + $0x360] ss:$8 sps:$4 sm:$0xff]  }
 0x4db   : > { %v4633_v52 = vadd.f32 %v4632_v38, %v10632_v30  ;;  %v4634_v50 = vpop.f32.mrb[138].mxu1 }
 0x4dc   : > { %6362 = vmatmul.mubr.bf16.gmra.mrb[68].mxu0 %v10290_v0  ;;  %v4807_v49 = vmax.f32 %v4631_v33, 0.0  ;;  %v4635_v53 = vadd.f32 %v4634_v50, %v10629_v61  ;;  %v4636_v51 = vpop.f32.mrb[139].mxu1  ;;  %v8307_v0 = vld [vmem:[%s11269_s7 + $0x344] ss:$8 sps:$4 sm:$0xff]  }
 0x4dd   : > { %6371 = vmatprep.mubr.bf16.mxu0 %v10310_v57  ;;  %6517 = vmatpush1.bf16.msra.mxu0 %v8299_v21  ;;  %v4808_v24 = vmax.f32 %v4633_v52, 0.0  ;;  %v4637_v3 = vadd.f32 %v4636_v51, %v10632_v30  ;;  %v8316_v21 = vld [vmem:[%s11269_s7 + $0x374] ss:$8 sps:$4 sm:$0xff]  }
 0x4de   : > { %6096 = vmatmul.mubr.bf16.gmra.mrb[244].mxu1 %v10296_v56  ;;  %6518 = vmatprep.subr.bf16.mxu0 %v8304_v8  ;;  %v4815_v44 = vmax.f32 %v4635_v53, 0.0  ;;  %v8310_v56 = vld [vmem:[%s11269_s7 + $0x354] ss:$8 sps:$4 sm:$0xff]   ;;  %v8314_v53 = vld [vmem:[%s11269_s7 + $0x370] ss:$8 sps:$4 sm:$0xff]  }
 0x4df   : > { %6105 = vmatprep.mubr.bf16.mxu1 %v10318_v5  ;;  %v4816_v37 = vmax.f32 %v4637_v3, 0.0 }
 0x4e0   : > { %v10689_v57 = vpack.c.bf16 %v4815_v44, %v4807_v49  ;;  %v11380_v49 = vld [vmem:[#allocation7_spill] sm:$0xff] }
 0x4e1   : > { %6519 = vmatpush1.bf16.msra.mxu0 %v8302_v26  ;;  %v10694_v7 = vpack.c.bf16 %v4816_v37, %v4808_v24  ;;  %v4640_v32 = vpop.f32.mrb[140].mxu1  ;;  %v11381_v24 = vld [vmem:[#allocation5_spill] sm:$0xff] }
 0x4e2   : > { %6520 = vmatprep.subr.bf16.mxu0 %v8307_v0  ;;  %v4641_v12 = vadd.f32 %v4640_v32, %v10629_v61  ;;  %v4642_v36 = vpop.f32.mrb[141].mxu1  ;;  %v8317_v37 = vld [vmem:[%s11269_s7 + $0x380] ss:$8 sps:$4 sm:$0xff]  }
 0x4e3   : > { %v4643_v5 = vadd.f32 %v4642_v36, %v10632_v30  ;;  %v4644_v25 = vpop.f32.mrb[142].mxu1 }
 0x4e4   : > { %6372 = vmatmul.mubr.bf16.gmra.mrb[72].mxu0 %v11378_v28  ;;  %v4823_v63 = vmax.f32 %v4641_v12, 0.0  ;;  %v4645_v62 = vadd.f32 %v4644_v25, %v10629_v61  ;;  %v4646_v29 = vpop.f32.mrb[143].mxu1  ;;  %v11382_v28 = vld [vmem:[#allocation6_spill] sm:$0xff] }
 0x4e5   : > { %6381 = vmatprep.mubr.bf16.mxu0 %v10329_v41  ;;  %6521 = vmatpush1.bf16.msra.mxu0 %v8305_v19  ;;  %v4824_v15 = vmax.f32 %v4643_v5, 0.0  ;;  %v4647_v18 = vadd.f32 %v4646_v29, %v10632_v30 }
 0x4e6   : > { %6106 = vmatmul.mubr.bf16.gmra.mrb[248].mxu1 %v11379_v10  ;;  %6522 = vmatprep.subr.bf16.mxu0 %v8310_v56  ;;  %v4831_v54 = vmax.f32 %v4645_v62, 0.0  ;;  %v8322_v56 = vld [vmem:[%s11269_s7 + $0x394] ss:$8 sps:$4 sm:$0xff]  }
 0x4e7   : > { %6115 = vmatprep.mubr.bf16.mxu1 %v10343_v40  ;;  %v4832_v9 = vmax.f32 %v4647_v18, 0.0 }
 0x4e8   : > { %v10713_v41 = vpack.c.bf16 %v4831_v54, %v4823_v63  ;;  %v8325_v54 = vld [vmem:[%s11269_s7 + $0x3a4] ss:$8 sps:$4 sm:$0xff]  }
 0x4e9   : > { %6523 = vmatpush1.bf16.msra.mxu0 %v8308_v60  ;;  %v10718_v20 = vpack.c.bf16 %v4832_v9, %v4824_v15  ;;  %v4650_v34 = vpop.f32.mrb[144].mxu1  ;;  %v11383_v60 = vld [vmem:[#allocation9_spill] sm:$0xff]  ;;  %v8320_v15 = vld [vmem:[%s11269_s7 + $0x390] ss:$8 sps:$4 sm:$0xff]  }
 0x4ea   : > { %6524 = vmatprep.subr.bf16.mxu0 %v8313_v27  ;;  %v4651_v45 = vadd.f32 %v4650_v34, %v10629_v61  ;;  %v4652_v8 = vpop.f32.mrb[145].mxu1 }
 0x4eb   : > { %v4653_v40 = vadd.f32 %v4652_v8, %v10632_v30  ;;  %v4654_v33 = vpop.f32.mrb[146].mxu1 }
 0x4ec   : > { %6382 = vmatmul.mubr.bf16.gmra.mrb[76].mxu0 %v10326_v46  ;;  %v4839_v38 = vmax.f32 %v4651_v45, 0.0  ;;  %v4655_v52 = vadd.f32 %v4654_v33, %v10629_v61  ;;  %v4656_v50 = vpop.f32.mrb[147].mxu1  ;;  %v8319_v46 = vld [vmem:[%s11269_s7 + $0x384] ss:$8 sps:$4 sm:$0xff]   ;;  %v8323_v45 = vld [vmem:[%s11269_s7 + $0x3a0] ss:$8 sps:$4 sm:$0xff]  }
 0x4ed   : > { %6391 = vmatprep.mubr.bf16.mxu0 %v11380_v49  ;;  %6525 = vmatpush1.bf16.msra.mxu0 %v8311_v11  ;;  %v4840_v51 = vmax.f32 %v4653_v40, 0.0  ;;  %v4657_v26 = vadd.f32 %v4656_v50, %v10632_v30  ;;  %v8328_v33 = vld [vmem:[%s11269_s7 + $0x3b4] ss:$8 sps:$4 sm:$0xff]  }
 0x4ee   : > { %6116 = vmatmul.mubr.bf16.gmra.mrb[252].mxu1 %v11381_v24  ;;  %6526 = vmatprep.subr.bf16.mxu0 %v8316_v21  ;;  %v4847_v3 = vmax.f32 %v4655_v52, 0.0  ;;  %v11384_v50 = vld [vmem:[#allocation8_spill] sm:$0xff] }
 0x4ef   : > { %v4848_v0 = vmax.f32 %v4657_v26, 0.0  ;;  %v11385_v26 = vld [vmem:[#allocation11_spill] sm:$0xff] }
 0x4f0   : > { %v10736_v44 = vpack.c.bf16 %v4847_v3, %v4839_v38  ;;  %v8326_v3 = vld [vmem:[%s11269_s7 + $0x3b0] ss:$8 sps:$4 sm:$0xff]  }
 0x4f1   : > { %6527 = vmatpush1.bf16.msra.mxu0 %v8314_v53  ;;  %v10741_v19 = vpack.c.bf16 %v4848_v0, %v4840_v51  ;;  %v4660_v32 = vpop.f32.mrb[148].mxu1 }
 0x4f2   : > { %6528 = vmatprep.subr.bf16.mxu0 %v8319_v46  ;;  %v4661_v12 = vadd.f32 %v4660_v32, %v10629_v61  ;;  %v4662_v36 = vpop.f32.mrb[149].mxu1 }
 0x4f3   : > { %v4663_v5 = vadd.f32 %v4662_v36, %v10632_v30  ;;  %v4664_v25 = vpop.f32.mrb[150].mxu1 }
 0x4f4   : > { %6392 = vmatmul.mubr.bf16.gmra.mrb[80].mxu0 %v11382_v28  ;;  %v4855_v63 = vmax.f32 %v4661_v12, 0.0  ;;  %v4665_v62 = vadd.f32 %v4664_v25, %v10629_v61  ;;  %v4666_v29 = vpop.f32.mrb[151].mxu1 }
 0x4f5   : > { %6401 = vmatprep.mubr.bf16.mxu0 %v11383_v60  ;;  %6529 = vmatpush1.bf16.msra.mxu0 %v8317_v37  ;;  %v4856_v18 = vmax.f32 %v4663_v5, 0.0  ;;  %v4667_v10 = vadd.f32 %v4666_v29, %v10632_v30  ;;  %v8331_v37 = vld [vmem:[%s11269_s7 + $0x3c4] ss:$8 sps:$4 sm:$0xff]   ;;  %v8329_v5 = vld [vmem:[%s11269_s7 + $0x3c0] ss:$8 sps:$4 sm:$0xff]  }
 0x4f6   : > { %6530 = vmatprep.subr.bf16.mxu0 %v8322_v56  ;;  %v4863_v27 = vmax.f32 %v4665_v62, 0.0  ;;  %v11386_v60 = vld [vmem:[#allocation10_spill] sm:$0xff] }
 0x4f7   : > { %v4864_v9 = vmax.f32 %v4667_v10, 0.0 }
 0x4f8   : > { %v10758_v11 = vpack.c.bf16 %v4863_v27, %v4855_v63  ;;  %v8334_v63 = vld [vmem:[%s11269_s7 + $0x3d4] ss:$8 sps:$4 sm:$0xff]  }
 0x4f9   : > { %6531 = vmatpush1.bf16.msra.mxu0 %v8320_v15  ;;  %v10760_v34 = vpack.c.bf16 %v4864_v9, %v4856_v18  ;;  %v4670_v21 = vpop.f32.mrb[152].mxu1  ;;  %v8332_v9 = vld [vmem:[%s11269_s7 + $0x3d0] ss:$8 sps:$4 sm:$0xff]  }
 0x4fa   : > { %v4671_v8 = vadd.f32 %v4670_v21, %v10629_v61  ;;  %v4672_v40 = vpop.f32.mrb[153].mxu1  ;;  %6532 = vmatprep.subr.bf16.mxu0 %v8325_v54 }
 0x4fb   : > { %v4673_v38 = vadd.f32 %v4672_v40, %v10632_v30  ;;  %v4674_v52 = vpop.f32.mrb[154].mxu1 }
 0x4fc   : > { %6402 = vmatmul.mubr.bf16.gmra.mrb[84].mxu0 %v11384_v50  ;;  %v4871_v49 = vmax.f32 %v4671_v8, 0.0  ;;  %v4675_v53 = vadd.f32 %v4674_v52, %v10629_v61  ;;  %v4676_v51 = vpop.f32.mrb[155].mxu1 }
 0x4fd   : > { %6411 = vmatprep.mubr.bf16.mxu0 %v11385_v26  ;;  %v4872_v24 = vmax.f32 %v4673_v38, 0.0  ;;  %v4677_v46 = vadd.f32 %v4676_v51, %v10632_v30  ;;  %6533 = vmatpush1.bf16.msra.mxu0 %v8323_v45  ;;  %v8337_v45 = vld [vmem:[%s11269_s7 + $0x3e4] ss:$8 sps:$4 sm:$0xff]   ;;  %v8335_v38 = vld [vmem:[%s11269_s7 + $0x3e0] ss:$8 sps:$4 sm:$0xff]   ;;  %v11387_v26 = vld [vmem:[#allocation12_spill] sm:$0xff] }
 0x4fe   : > { %v4879_v0 = vmax.f32 %v4675_v53, 0.0  ;;  %6534 = vmatprep.subr.bf16.mxu0 %v8328_v33 }
 0x4ff   : > { %v4880_v32 = vmax.f32 %v4677_v46, 0.0 }
 0x500   : > { %v10780_v56 = vpack.c.bf16 %v4879_v0, %v4871_v49  ;;  %v8340_v49 = vld [vmem:[%s11269_s7 + $0x3f4] ss:$8 sps:$4 sm:$0xff]  }
 0x501   : > { %v10782_v12 = vpack.c.bf16 %v4880_v32, %v4872_v24  ;;  %v4680_v36 = vpop.f32.mrb[156].mxu1  ;;  %6535 = vmatpush1.bf16.msra.mxu0 %v8326_v3  ;;  %v8338_v32 = vld [vmem:[%s11269_s7 + $0x3f0] ss:$8 sps:$4 sm:$0xff]  }
 0x502   : > { %v4681_v25 = vadd.f32 %v4680_v36, %v10629_v61  ;;  %v4682_v28 = vpop.f32.mrb[157].mxu1  ;;  %6536 = vmatprep.subr.bf16.mxu0 %v8331_v37 }
 0x503   : > { %v4683_v62 = vadd.f32 %v4682_v28, %v10632_v30  ;;  %v4684_v29 = vpop.f32.mrb[158].mxu1 }
 0x504   : > { %6412 = vmatmul.mubr.bf16.gmra.mrb[88].mxu0 %v11386_v60  ;;  %v4887_v15 = vmax.f32 %v4681_v25, 0.0  ;;  %v4685_v18 = vadd.f32 %v4684_v29, %v10629_v61  ;;  %v4686_v10 = vpop.f32.mrb[159].mxu1 }
 0x505   : > { %6421 = vmatprep.mubr.bf16.mxu0 %v10424_v4  ;;  %v4888_v27 = vmax.f32 %v4683_v62, 0.0  ;;  %v4687_v54 = vadd.f32 %v4686_v10, %v10632_v30  ;;  %6537 = vmatpush1.bf16.msra.mxu0 %v8329_v5 }
 0x506   : > { %v4895_v21 = vmax.f32 %v4685_v18, 0.0  ;;  %6538 = vmatprep.subr.bf16.mxu0 %v8334_v63 }
 0x507   : > { %v4896_v8 = vmax.f32 %v4687_v54, 0.0 }
 0x508   : > { %v10802_v40 = vpack.c.bf16 %v4895_v21, %v4887_v15  ;;  %v11388_v15 = vld [vmem:[#allocation13_spill] sm:$0xff] }
 0x509   : > { %v10804_v33 = vpack.c.bf16 %v4896_v8, %v4888_v27  ;;  %v4690_v4 = vpop.f32.mrb[160].mxu1  ;;  %6539 = vmatpush1.bf16.msra.mxu0 %v8332_v9 }
 0x50a   : > { %v4691_v52 = vadd.f32 %v4690_v4, %v10629_v61  ;;  %v4692_v50 = vpop.f32.mrb[161].mxu1  ;;  %6540 = vmatprep.subr.bf16.mxu0 %v8337_v45 }
 0x50b   : > { %v4693_v53 = vadd.f32 %v4692_v50, %v10632_v30  ;;  %v4694_v51 = vpop.f32.mrb[162].mxu1 }
 0x50c   : > { %6422 = vmatmul.mubr.bf16.gmra.mrb[92].mxu0 %v11387_v26  ;;  %v4903_v24 = vmax.f32 %v4691_v52, 0.0  ;;  %v4695_v46 = vadd.f32 %v4694_v51, %v10629_v61  ;;  %v4696_v3 = vpop.f32.mrb[163].mxu1 }
 0x50d   : > { %6431 = vmatprep.mubr.bf16.mxu0 %v10449_v58  ;;  %v4904_v0 = vmax.f32 %v4693_v53, 0.0  ;;  %v4697_v37 = vadd.f32 %v4696_v3, %v10632_v30  ;;  %6541 = vmatpush1.bf16.msra.mxu0 %v8335_v38 }
 0x50e   : > { %v4911_v36 = vmax.f32 %v4695_v46, 0.0  ;;  %6542 = vmatprep.subr.bf16.mxu0 %v8340_v49 }
 0x50f   : > { %v4912_v5 = vmax.f32 %v4697_v37, 0.0 }
 0x510   : > { %v10821_v25 = vpack.c.bf16 %v4911_v36, %v4903_v24 }
 0x511   : > { %v10823_v28 = vpack.c.bf16 %v4912_v5, %v4904_v0  ;;  %v4700_v63 = vpop.f32.mrb[164].mxu1  ;;  %6543 = vmatpush1.bf16.msra.mxu0 %v8338_v32 }
 0x512   : > { %v4701_v62 = vadd.f32 %v4700_v63, %v10629_v61  ;;  %v4702_v58 = vpop.f32.mrb[165].mxu1 }
 0x513   : > { %v4703_v29 = vadd.f32 %v4702_v58, %v10632_v30  ;;  %v4704_v60 = vpop.f32.mrb[166].mxu1 }
 0x514   : > { %6432 = vmatmul.mubr.bf16.gmra.mrb[96].mxu0 %v11388_v15  ;;  %v4919_v18 = vmax.f32 %v4701_v62, 0.0  ;;  %v4705_v10 = vadd.f32 %v4704_v60, %v10629_v61  ;;  %v4706_v27 = vpop.f32.mrb[167].mxu1 }
 0x515   : > { %6441 = vmatprep.mubr.bf16.mxu0 %v10474_v39  ;;  %v4920_v54 = vmax.f32 %v4703_v29, 0.0  ;;  %v4707_v9 = vadd.f32 %v4706_v27, %v10632_v30 }
 0x516   : > { %v4927_v21 = vmax.f32 %v4705_v10, 0.0 }
 0x517   : > { %v4928_v45 = vmax.f32 %v4707_v9, 0.0 }
 0x518   : > { %v10831_v8 = vpack.c.bf16 %v4927_v21, %v4919_v18 }
 0x519   : > { %v10833_v4 = vpack.c.bf16 %v4928_v45, %v4920_v54  ;;  %v4710_v38 = vpop.f32.mrb[168].mxu1 }
 0x51a   : > { %v4711_v52 = vadd.f32 %v4710_v38, %v10629_v61  ;;  %v4712_v50 = vpop.f32.mrb[169].mxu1 }
 0x51b   : > { %v4713_v49 = vadd.f32 %v4712_v50, %v10632_v30  ;;  %v4714_v53 = vpop.f32.mrb[170].mxu1 }
 0x51c   : > { %6442 = vmatmul.mubr.bf16.gmra.mrb[100].mxu0 %v10468_v59  ;;  %v4935_v51 = vmax.f32 %v4711_v52, 0.0  ;;  %v4715_v39 = vadd.f32 %v4714_v53, %v10629_v61  ;;  %v4716_v26 = vpop.f32.mrb[171].mxu1 }
 0x51d   : > { %6451 = vmatprep.mubr.bf16.mxu0 %v10500_v22  ;;  %v4936_v24 = vmax.f32 %v4713_v49, 0.0  ;;  %v4717_v46 = vadd.f32 %v4716_v26, %v10632_v30 }
 0x51e   : > { %v4943_v3 = vmax.f32 %v4715_v39, 0.0 }
 0x51f   : > { %v4944_v0 = vmax.f32 %v4717_v46, 0.0 }
 0x520   : > { %v10841_v37 = vpack.c.bf16 %v4943_v3, %v4935_v51 }
 0x521   : > { %v10843_v32 = vpack.c.bf16 %v4944_v0, %v4936_v24  ;;  %v4720_v36 = vpop.f32.mrb[172].mxu1 }
 0x522   : > { %v4721_v5 = vadd.f32 %v4720_v36, %v10629_v61  ;;  %v4722_v63 = vpop.f32.mrb[173].mxu1 }
 0x523   : > { %v4723_v59 = vadd.f32 %v4722_v63, %v10632_v30  ;;  %v4724_v62 = vpop.f32.mrb[174].mxu1 }
 0x524   : > { %6452 = vmatmul.mubr.bf16.gmra.mrb[104].mxu0 %v10494_v42  ;;  %v4951_v58 = vmax.f32 %v4721_v5, 0.0  ;;  %v4725_v22 = vadd.f32 %v4724_v62, %v10629_v61  ;;  %v4726_v29 = vpop.f32.mrb[175].mxu1  ;;  %v11389_v5 = vld [vmem:[#allocation14_spill] sm:$0xff] }
 0x525   : > { %6461 = vmatprep.mubr.bf16.mxu0 %v10526_v16  ;;  %v4952_v60 = vmax.f32 %v4723_v59, 0.0  ;;  %v4727_v15 = vadd.f32 %v4726_v29, %v10632_v30 }
 0x526   : > { %v4959_v18 = vmax.f32 %v4725_v22, 0.0 }
 0x527   : > { %v4960_v10 = vmax.f32 %v4727_v15, 0.0 }
 0x528   : > { %v10851_v27 = vpack.c.bf16 %v4959_v18, %v4951_v58 }
 0x529   : > { %v10853_v54 = vpack.c.bf16 %v4960_v10, %v4952_v60  ;;  %v4730_v9 = vpop.f32.mrb[176].mxu1 }
 0x52a   : > { %v4731_v21 = vadd.f32 %v4730_v9, %v10629_v61  ;;  %v4732_v45 = vpop.f32.mrb[177].mxu1 }
 0x52b   : > { %v4733_v42 = vadd.f32 %v4732_v45, %v10632_v30  ;;  %v4734_v38 = vpop.f32.mrb[178].mxu1 }
 0x52c   : > { %6462 = vmatmul.mubr.bf16.gmra.mrb[108].mxu0 %v10520_v48  ;;  %v4967_v52 = vmax.f32 %v4731_v21, 0.0  ;;  %v4735_v16 = vadd.f32 %v4734_v38, %v10629_v61  ;;  %v4736_v50 = vpop.f32.mrb[179].mxu1 }
 0x52d   : > { %6471 = vmatprep.mubr.bf16.mxu0 %v10552_v14  ;;  %v4968_v49 = vmax.f32 %v4733_v42, 0.0  ;;  %v4737_v53 = vadd.f32 %v4736_v50, %v10632_v30 }
 0x52e   : > { %v4975_v51 = vmax.f32 %v4735_v16, 0.0 }
 0x52f   : > { %v4976_v39 = vmax.f32 %v4737_v53, 0.0 }
 0x530   : > { %v10861_v26 = vpack.c.bf16 %v4975_v51, %v4967_v52 }
 0x531   : > { %v10863_v24 = vpack.c.bf16 %v4976_v39, %v4968_v49  ;;  %v4740_v46 = vpop.f32.mrb[180].mxu1 }
 0x532   : > { %v4741_v3 = vadd.f32 %v4740_v46, %v10629_v61  ;;  %v4742_v0 = vpop.f32.mrb[181].mxu1 }
 0x533   : > { %v4743_v48 = vadd.f32 %v4742_v0, %v10632_v30  ;;  %v4744_v36 = vpop.f32.mrb[182].mxu1 }
 0x534   : > { %6472 = vmatmul.mubr.bf16.gmra.mrb[112].mxu0 %v11389_v5  ;;  %v4983_v63 = vmax.f32 %v4741_v3, 0.0  ;;  %v4745_v14 = vadd.f32 %v4744_v36, %v10629_v61  ;;  %v4746_v59 = vpop.f32.mrb[183].mxu1 }
 0x535   : > { %6481 = vmatprep.mubr.bf16.mxu0 %v10569_v47  ;;  %v4984_v62 = vmax.f32 %v4743_v48, 0.0  ;;  %v4747_v58 = vadd.f32 %v4746_v59, %v10632_v30 }
 0x536   : > { %v4991_v22 = vmax.f32 %v4745_v14, 0.0 }
 0x537   : > { %v4992_v29 = vmax.f32 %v4747_v58, 0.0 }
 0x538   : > { %v10871_v60 = vpack.c.bf16 %v4991_v22, %v4983_v63 }
 0x539   : > { %v10873_v15 = vpack.c.bf16 %v4992_v29, %v4984_v62  ;;  %v4750_v18 = vpop.f32.mrb[184].mxu1 }
 0x53a   : > { %v4751_v10 = vadd.f32 %v4750_v18, %v10629_v61  ;;  %v4752_v9 = vpop.f32.mrb[185].mxu1 }
 0x53b   : > { %v4753_v21 = vadd.f32 %v4752_v9, %v10632_v30  ;;  %v4754_v45 = vpop.f32.mrb[186].mxu1 }
 0x53c   : > { %6482 = vmatmul.mubr.bf16.gmra.mrb[116].mxu0 %v10566_v6  ;;  %v4999_v42 = vmax.f32 %v4751_v10, 0.0  ;;  %v4755_v47 = vadd.f32 %v4754_v45, %v10629_v61  ;;  %v4756_v38 = vpop.f32.mrb[187].mxu1 }
 0x53d   : > { %6491 = vmatprep.mubr.bf16.mxu0 %v10583_v43  ;;  %v5000_v52 = vmax.f32 %v4753_v21, 0.0  ;;  %v4757_v16 = vadd.f32 %v4756_v38, %v10632_v30 }
 0x53e   : > { %v5007_v50 = vmax.f32 %v4755_v47, 0.0 }
 0x53f   : > { %v5008_v49 = vmax.f32 %v4757_v16, 0.0 }
 0x540   : > { %v10881_v53 = vpack.c.bf16 %v5007_v50, %v4999_v42 }
 0x541   : > { %v10883_v51 = vpack.c.bf16 %v5008_v49, %v5000_v52  ;;  %v4760_v39 = vpop.f32.mrb[188].mxu1 }
 0x542   : > { %v4761_v46 = vadd.f32 %v4760_v39, %v10629_v61  ;;  %v4762_v3 = vpop.f32.mrb[189].mxu1 }
 0x543   : > { %v4763_v6 = vadd.f32 %v4762_v3, %v10632_v30  ;;  %v4764_v0 = vpop.f32.mrb[190].mxu1 }
 0x544   : > { %6492 = vmatmul.mubr.bf16.gmra.mrb[120].mxu0 %v10580_v13  ;;  %v5015_v48 = vmax.f32 %v4761_v46, 0.0  ;;  %v4765_v43 = vadd.f32 %v4764_v0, %v10629_v61  ;;  %v4766_v36 = vpop.f32.mrb[191].mxu1 }
 0x545   : > { %6501 = vmatprep.mubr.bf16.mxu0 %v10597_v1  ;;  %v5016_v5 = vmax.f32 %v4763_v6, 0.0  ;;  %v4767_v63 = vadd.f32 %v4766_v36, %v10632_v30 }
 0x546   : > { %v5023_v14 = vmax.f32 %v4765_v43, 0.0 }
 0x547   : > { %v5024_v59 = vmax.f32 %v4767_v63, 0.0 }
 0x548   : > { %v10891_v62 = vpack.c.bf16 %v5023_v14, %v5015_v48 }
 0x549   : > { %v10893_v58 = vpack.c.bf16 %v5024_v59, %v5016_v5  ;;  %v10895_v22 = vpop.f32.mrb[192].mxu1 }
 0x54a   : > { %v10897_v29 = vpop.f32.mrb[193].mxu1 }
 0x54b   : > { %v10899_v13 = vpop.f32.mrb[194].mxu1 }
 0x54c   : > { %v10901_v18 = vpop.f32.mrb[195].mxu1  ;;  %6502 = vmatmul.mubr.bf16.gmra.mrb[124].mxu0 %v10594_v55 }
 0x54d   : > { %6544 = vmatprep.mubr.bf16.mxu0 %v10646_v31 }
 0x551   : > { %v10905_v1 = vpop.f32.mrb[196].mxu1 }
 0x552   : > { %v10907_v61 = vpop.f32.mrb[197].mxu1 }
 0x553   : > { %v10909_v30 = vpop.f32.mrb[198].mxu1 }
 0x554   : > { %v10911_v10 = vpop.f32.mrb[199].mxu1  ;;  %6545 = vmatmul.mubr.bf16.vlgmr.msra.gmra.mrb[64].mxu0 %v10641_v17 }
 0x555   : > { %6554 = vmatprep.mubr.bf16.mxu0 %v10670_v35 }
 0x559   : > { %v10915_v9 = vpop.f32.mrb[200].mxu1 }
 0x55a   : > { %v10917_v21 = vpop.f32.mrb[201].mxu1 }
 0x55b   : > { %v10919_v45 = vpop.f32.mrb[202].mxu1 }
 0x55c   : > { %v10921_v55 = vpop.f32.mrb[203].mxu1  ;;  %6555 = vmatmul.mubr.bf16.gmra.mrb[68].mxu0 %v10665_v23 }
 0x55d   : > { %6564 = vmatprep.mubr.bf16.mxu0 %v10694_v7 }
 0x561   : > { %v10925_v31 = vpop.f32.mrb[204].mxu1 }
 0x562   : > { %v10927_v42 = vpop.f32.mrb[205].mxu1 }
 0x563   : > { %v10929_v47 = vpop.f32.mrb[206].mxu1 }
 0x564   : > { %v10931_v17 = vpop.f32.mrb[207].mxu1  ;;  %6565 = vmatmul.mubr.bf16.gmra.mrb[72].mxu0 %v10689_v57 }
 0x565   : > { %6574 = vmatprep.mubr.bf16.mxu0 %v10718_v20 }
 0x569   : > { %v10935_v35 = vpop.f32.mrb[208].mxu1 }
 0x56a   : > { %v10937_v38 = vpop.f32.mrb[209].mxu1 }
 0x56b   : > { %v10939_v52 = vpop.f32.mrb[210].mxu1 }
 0x56c   : > { %v10941_v23 = vpop.f32.mrb[211].mxu1  ;;  %6575 = vmatmul.mubr.bf16.gmra.mrb[76].mxu0 %v10713_v41 }
 0x56d   : > { %6584 = vmatprep.mubr.bf16.mxu0 %v10741_v19 }
 0x571   : > { %v10945_v7 = vpop.f32.mrb[212].mxu1 }
 0x572   : > { %v10947_v16 = vpop.f32.mrb[213].mxu1 }
 0x573   : > { %v10949_v50 = vpop.f32.mrb[214].mxu1 }
 0x574   : > { %v10951_v57 = vpop.f32.mrb[215].mxu1  ;;  %6585 = vmatmul.mubr.bf16.gmra.mrb[80].mxu0 %v10736_v44 }
 0x575   : > { %6594 = vmatprep.mubr.bf16.mxu0 %v10760_v34 }
 0x579   : > { %v10955_v20 = vpop.f32.mrb[216].mxu1 }
 0x57a   : > { %v10957_v49 = vpop.f32.mrb[217].mxu1 }
 0x57b   : > { %v10959_v39 = vpop.f32.mrb[218].mxu1 }
 0x57c   : > { %v10961_v41 = vpop.f32.mrb[219].mxu1  ;;  %6595 = vmatmul.mubr.bf16.gmra.mrb[84].mxu0 %v10758_v11 }
 0x57d   : > { %6604 = vmatprep.mubr.bf16.mxu0 %v10782_v12 }
 0x581   : > { %v10965_v19 = vpop.f32.mrb[220].mxu1 }
 0x582   : > { %v10967_v46 = vpop.f32.mrb[221].mxu1 }
 0x583   : > { %v10969_v3 = vpop.f32.mrb[222].mxu1 }
 0x584   : > { %v10971_v44 = vpop.f32.mrb[223].mxu1  ;;  %6605 = vmatmul.mubr.bf16.gmra.mrb[88].mxu0 %v10780_v56 }
 0x585   : > { %6614 = vmatprep.mubr.bf16.mxu0 %v10804_v33 }
 0x589   : > { %v10975_v34 = vpop.f32.mrb[224].mxu1 }
 0x58a   : > { %v10977_v6 = vpop.f32.mrb[225].mxu1 }
 0x58b   : > { %v10979_v0 = vpop.f32.mrb[226].mxu1 }
 0x58c   : > { %v10981_v11 = vpop.f32.mrb[227].mxu1  ;;  %6615 = vmatmul.mubr.bf16.gmra.mrb[92].mxu0 %v10802_v40 }
 0x58d   : > { %6624 = vmatprep.mubr.bf16.mxu0 %v10823_v28 }
 0x591   : > { %v10985_v12 = vpop.f32.mrb[228].mxu1 }
 0x592   : > { %v10987_v48 = vpop.f32.mrb[229].mxu1 }
 0x593   : > { %v10989_v43 = vpop.f32.mrb[230].mxu1 }
 0x594   : > { %v10991_v56 = vpop.f32.mrb[231].mxu1  ;;  %6625 = vmatmul.mubr.bf16.gmra.mrb[96].mxu0 %v10821_v25 }
 0x595   : > { %6634 = vmatprep.mubr.bf16.mxu0 %v10833_v4 }
 0x599   : > { %v10995_v33 = vpop.f32.mrb[232].mxu1 }
 0x59a   : > { %v10997_v36 = vpop.f32.mrb[233].mxu1 }
 0x59b   : > { %v10999_v5 = vpop.f32.mrb[234].mxu1 }
 0x59c   : > { %v11001_v40 = vpop.f32.mrb[235].mxu1  ;;  %6635 = vmatmul.mubr.bf16.gmra.mrb[100].mxu0 %v10831_v8 }
 0x59d   : > { %11390 = vst [vmem:[#allocation3_spill] sm:$0xff] %v11001_v40  ;;  %6644 = vmatprep.mubr.bf16.mxu0 %v10843_v32 }
 0x5a1   : > { %v11005_v28 = vpop.f32.mrb[236].mxu1 }
 0x5a2   : > { %v11007_v63 = vpop.f32.mrb[237].mxu1 }
 0x5a3   : > { %v11009_v14 = vpop.f32.mrb[238].mxu1 }
 0x5a4   : > { %11391 = vst [vmem:[#allocation4_spill] sm:$0xff] %v11009_v14  ;;  %v11011_v25 = vpop.f32.mrb[239].mxu1  ;;  %6645 = vmatmul.mubr.bf16.gmra.mrb[104].mxu0 %v10841_v37 }
 0x5a5   : > { %11392 = vst [vmem:[#allocation7_spill] sm:$0xff] %v11011_v25  ;;  %6654 = vmatprep.mubr.bf16.mxu0 %v10853_v54 }
 0x5a9   : > { %v11015_v4 = vpop.f32.mrb[240].mxu1 }
 0x5aa   : > { %v11017_v59 = vpop.f32.mrb[241].mxu1 }
 0x5ab   : > { %v11019_v40 = vpop.f32.mrb[242].mxu1 }
 0x5ac   : > { %11393 = vst [vmem:[#allocation5_spill] sm:$0xff] %v11019_v40  ;;  %v11021_v8 = vpop.f32.mrb[243].mxu1  ;;  %6655 = vmatmul.mubr.bf16.gmra.mrb[108].mxu0 %v10851_v27 }
 0x5ad   : > { %11394 = vst [vmem:[#allocation6_spill] sm:$0xff] %v11021_v8  ;;  %6664 = vmatprep.mubr.bf16.mxu0 %v10863_v24 }
 0x5b1   : > { %v11025_v32 = vpop.f32.mrb[244].mxu1 }
 0x5b2   : > { %v11027_v14 = vpop.f32.mrb[245].mxu1 }
 0x5b3   : > { %v11029_v25 = vpop.f32.mrb[246].mxu1 }
 0x5b4   : > { %11395 = vst [vmem:[#allocation9_spill] sm:$0xff] %v11029_v25  ;;  %v11031_v37 = vpop.f32.mrb[247].mxu1  ;;  %6665 = vmatmul.mubr.bf16.gmra.mrb[112].mxu0 %v10861_v26 }
 0x5b5   : > { %11396 = vst [vmem:[#allocation8_spill] sm:$0xff] %v11031_v37  ;;  %6674 = vmatprep.mubr.bf16.mxu0 %v10873_v15  ;;  %v11403_v15 = vsub.s32 0, %v10001_v2 }
 0x5b9   : > { %v11035_v54 = vpop.f32.mrb[248].mxu1 }
 0x5ba   : > { %v11037_v40 = vpop.f32.mrb[249].mxu1 }
 0x5bb   : > { %v11039_v8 = vpop.f32.mrb[250].mxu1 }
 0x5bc   : > { %11397 = vst [vmem:[#allocation11_spill] sm:$0xff] %v11039_v8  ;;  %v11041_v27 = vpop.f32.mrb[251].mxu1  ;;  %6675 = vmatmul.mubr.bf16.gmra.mrb[116].mxu0 %v10871_v60  ;;  %v5281_v60 = vld [vmem:[%s11270_s8] sm:$0x3] }
 0x5bd   : > { %11398 = vst [vmem:[#allocation10_spill] sm:$0xff] %v11041_v27  ;;  %6684 = vmatprep.mubr.bf16.mxu0 %v10883_v51  ;;  %v11061_v51 = vrot.slane %v5281_v60, %v11403_v15 }
 0x5c1   : > { %v11045_v24 = vpop.f32.mrb[252].mxu1 }
 0x5c2   : > { %11399 = vst [vmem:[#allocation12_spill] sm:$0xff] %v11045_v24  ;;  %v11047_v25 = vpop.f32.mrb[253].mxu1 }
 0x5c3   : > { %11400 = vst [vmem:[#allocation13_spill] sm:$0xff] %v11047_v25  ;;  %v11049_v37 = vpop.f32.mrb[254].mxu1  ;;  %v5972_v25 = vadd.f32 %v10899_v13, %v11061_v51 }
 0x5c4   : > { %11401 = vst [vmem:[#allocation14_spill] sm:$0xff] %v11049_v37  ;;  %v11051_v26 = vpop.f32.mrb[255].mxu1  ;;  %6685 = vmatmul.mubr.bf16.gmra.mrb[120].mxu0 %v10881_v53  ;;  %v11404_v37 = vsub.s32 1, %v10001_v2  ;;  %v5968_v53 = vadd.f32 %v10895_v22, %v11061_v51 }
 0x5c5   : > { %11402 = vst [vmem:[#allocation15_spill] sm:$0xff] %v11051_v26  ;;  %6694 = vmatprep.mubr.bf16.mxu0 %v10893_v58 }
 0x5c6   : > { %v11065_v26 = vrot.slane %v5281_v60, %v11404_v37 }
 0x5c8   : > { %v5974_v15 = vadd.f32 %v10901_v18, %v11065_v26  ;;  %v5980_v13 = vadd.f32 %v10907_v61, %v11065_v26  ;;  %v5988_v61 = vadd.f32 %v10915_v9, %v11061_v51 }
 0x5cc   : > { %6695 = vmatmul.mubr.bf16.gmra.mrb[124].mxu0 %v10891_v62  ;;  %v5970_v62 = vadd.f32 %v10897_v29, %v11065_v26  ;;  %v5978_v29 = vadd.f32 %v10905_v1, %v11061_v51 }
 0x627   : > { %v6546_v58 = vpop.f32.mrb[64].mxu0 }
 0x628   : > { %v7765_v24 = vadd.f32 %v6546_v58, %v5968_v53  ;;  %v6548_v27 = vpop.f32.mrb[65].mxu0 }
 0x629   : > { %v7767_v2 = vadd.f32 %v6548_v27, %v5970_v62  ;;  %v6550_v8 = vpop.f32.mrb[66].mxu0  ;;  %v5982_v27 = vadd.f32 %v10909_v30, %v11061_v51  ;;  %v5990_v30 = vadd.f32 %v10917_v21, %v11065_v26  ;;  %v5998_v21 = vadd.f32 %v10925_v31, %v11061_v51 }
 0x62a   : > { %6705 = vst [vmem:[%s8533_s29] sm:$0xff] %v7765_v24  ;;  %v7769_v37 = vadd.f32 %v6550_v8, %v5972_v25  ;;  %v6552_v60 = vpop.f32.mrb[67].mxu0  ;;  %v5984_v8 = vadd.f32 %v10911_v10, %v11065_v26 }
 0x62b   : > { %6706 = vst [vmem:[%s8533_s29 + $0x8] sm:$0xff] %v7767_v2  ;;  %v7771_v22 = vadd.f32 %v6552_v60, %v5974_v15  ;;  %v5992_v2 = vadd.f32 %v10919_v45, %v11061_v51  ;;  %v6000_v45 = vadd.f32 %v10927_v42, %v11065_v26  ;;  %v6008_v42 = vadd.f32 %v10935_v35, %v11061_v51 }
 0x62c   : > { %6707 = vst [vmem:[%s8533_s29 + $0x10] sm:$0xff] %v7769_v37 }
 0x62d   : > { %6708 = vst [vmem:[%s8533_s29 + $0x18] sm:$0xff] %v7771_v22  ;;  %v5994_v22 = vadd.f32 %v10921_v55, %v11065_v26 }
 0x62f   : > { %v6556_v18 = vpop.f32.mrb[68].mxu0 }
 0x630   : > { %v7773_v24 = vadd.f32 %v6556_v18, %v5978_v29  ;;  %v6558_v25 = vpop.f32.mrb[69].mxu0 }
 0x631   : > { %v7775_v53 = vadd.f32 %v6558_v25, %v5980_v13  ;;  %v6560_v62 = vpop.f32.mrb[70].mxu0 }
 0x632   : > { %6709 = vst [vmem:[%s8533_s29 + $0x20] sm:$0xff] %v7773_v24  ;;  %v7777_v58 = vadd.f32 %v6560_v62, %v5982_v27  ;;  %v6562_v15 = vpop.f32.mrb[71].mxu0  ;;  %v6002_v24 = vadd.f32 %v10929_v47, %v11061_v51  ;;  %v6010_v47 = vadd.f32 %v10937_v38, %v11065_v26  ;;  %v6018_v38 = vadd.f32 %v10945_v7, %v11061_v51 }
 0x633   : > { %6710 = vst [vmem:[%s8533_s29 + $0x28] sm:$0xff] %v7775_v53  ;;  %v7779_v1 = vadd.f32 %v6562_v15, %v5984_v8  ;;  %v6004_v53 = vadd.f32 %v10931_v17, %v11065_v26 }
 0x634   : > { %6711 = vst [vmem:[%s8533_s29 + $0x30] sm:$0xff] %v7777_v58 }
 0x635   : > { %6712 = vst [vmem:[%s8533_s29 + $0x38] sm:$0xff] %v7779_v1 }
 0x637   : > { %v6566_v10 = vpop.f32.mrb[72].mxu0 }
 0x638   : > { %v7781_v37 = vadd.f32 %v6566_v10, %v5988_v61  ;;  %v6568_v60 = vpop.f32.mrb[73].mxu0  ;;  %v6012_v61 = vadd.f32 %v10939_v52, %v11061_v51  ;;  %v6020_v52 = vadd.f32 %v10947_v16, %v11065_v26  ;;  %v6028_v16 = vadd.f32 %v10955_v20, %v11061_v51 }
 0x639   : > { %v7783_v29 = vadd.f32 %v6568_v60, %v5990_v30  ;;  %v6570_v13 = vpop.f32.mrb[74].mxu0 }
 0x63a   : > { %6713 = vst [vmem:[%s8533_s29 + $0x40] sm:$0xff] %v7781_v37  ;;  %v7785_v18 = vadd.f32 %v6570_v13, %v5992_v2  ;;  %v6572_v27 = vpop.f32.mrb[75].mxu0  ;;  %v6014_v2 = vadd.f32 %v10941_v23, %v11065_v26  ;;  %v6022_v13 = vadd.f32 %v10949_v50, %v11061_v51  ;;  %v6030_v50 = vadd.f32 %v10957_v49, %v11065_v26 }
 0x63b   : > { %6714 = vst [vmem:[%s8533_s29 + $0x48] sm:$0xff] %v7783_v29  ;;  %v7787_v9 = vadd.f32 %v6572_v27, %v5994_v22  ;;  %v6038_v49 = vadd.f32 %v10965_v19, %v11061_v51 }
 0x63c   : > { %6715 = vst [vmem:[%s8533_s29 + $0x50] sm:$0xff] %v7785_v18 }
 0x63d   : > { %6716 = vst [vmem:[%s8533_s29 + $0x58] sm:$0xff] %v7787_v9  ;;  %v6024_v9 = vadd.f32 %v10951_v57, %v11065_v26 }
 0x63f   : > { %v6576_v55 = vpop.f32.mrb[76].mxu0 }
 0x640   : > { %v7789_v25 = vadd.f32 %v6576_v55, %v5998_v21  ;;  %v6578_v8 = vpop.f32.mrb[77].mxu0 }
 0x641   : > { %v7791_v62 = vadd.f32 %v6578_v8, %v6000_v45  ;;  %v6580_v58 = vpop.f32.mrb[78].mxu0 }
 0x642   : > { %6717 = vst [vmem:[%s8533_s29 + $0x60] sm:$0xff] %v7789_v25  ;;  %v7793_v15 = vadd.f32 %v6580_v58, %v6002_v24  ;;  %v6582_v1 = vpop.f32.mrb[79].mxu0  ;;  %v6032_v25 = vadd.f32 %v10959_v39, %v11061_v51  ;;  %v6040_v39 = vadd.f32 %v10967_v46, %v11065_v26  ;;  %v6048_v46 = vadd.f32 %v10975_v34, %v11061_v51 }
 0x643   : > { %6718 = vst [vmem:[%s8533_s29 + $0x68] sm:$0xff] %v7791_v62  ;;  %v7795_v31 = vadd.f32 %v6582_v1, %v6004_v53  ;;  %v6034_v62 = vadd.f32 %v10961_v41, %v11065_v26 }
 0x644   : > { %6719 = vst [vmem:[%s8533_s29 + $0x70] sm:$0xff] %v7793_v15 }
 0x645   : > { %6720 = vst [vmem:[%s8533_s29 + $0x78] sm:$0xff] %v7795_v31 }
 0x647   : > { %v6586_v17 = vpop.f32.mrb[80].mxu0 }
 0x648   : > { %v7797_v30 = vadd.f32 %v6586_v17, %v6008_v42  ;;  %v6588_v10 = vpop.f32.mrb[81].mxu0  ;;  %v6042_v42 = vadd.f32 %v10969_v3, %v11061_v51  ;;  %v6050_v3 = vadd.f32 %v10977_v6, %v11065_v26  ;;  %v6058_v6 = vadd.f32 %v10985_v12, %v11061_v51 }
 0x649   : > { %v7799_v37 = vadd.f32 %v6588_v10, %v6010_v47  ;;  %v6590_v60 = vpop.f32.mrb[82].mxu0 }
 0x64a   : > { %6721 = vst [vmem:[%s8533_s29 + $0x80] sm:$0xff] %v7797_v30  ;;  %v7801_v22 = vadd.f32 %v6590_v60, %v6012_v61  ;;  %v6592_v29 = vpop.f32.mrb[83].mxu0  ;;  %v6044_v61 = vadd.f32 %v10971_v44, %v11065_v26  ;;  %v6052_v60 = vadd.f32 %v10979_v0, %v11061_v51  ;;  %v6060_v0 = vadd.f32 %v10987_v48, %v11065_v26 }
 0x64b   : > { %6722 = vst [vmem:[%s8533_s29 + $0x88] sm:$0xff] %v7799_v37  ;;  %v7803_v35 = vadd.f32 %v6592_v29, %v6014_v2  ;;  %v6068_v48 = vadd.f32 %v10995_v33, %v11061_v51 }
 0x64c   : > { %6723 = vst [vmem:[%s8533_s29 + $0x90] sm:$0xff] %v7801_v22 }
 0x64d   : > { %6724 = vst [vmem:[%s8533_s29 + $0x98] sm:$0xff] %v7803_v35  ;;  %v6054_v35 = vadd.f32 %v10981_v11, %v11065_v26 }
 0x64f   : > { %v6596_v23 = vpop.f32.mrb[84].mxu0 }
 0x650   : > { %v7805_v18 = vadd.f32 %v6596_v23, %v6018_v38  ;;  %v6598_v27 = vpop.f32.mrb[85].mxu0 }
 0x651   : > { %v7807_v21 = vadd.f32 %v6598_v27, %v6020_v52  ;;  %v6600_v45 = vpop.f32.mrb[86].mxu0 }
 0x652   : > { %6725 = vst [vmem:[%s8533_s29 + $0xa0] sm:$0xff] %v7805_v18  ;;  %v7809_v55 = vadd.f32 %v6600_v45, %v6022_v13  ;;  %v6602_v24 = vpop.f32.mrb[87].mxu0  ;;  %v6062_v18 = vadd.f32 %v10989_v43, %v11061_v51  ;;  %v6070_v43 = vadd.f32 %v10997_v36, %v11065_v26  ;;  %v6078_v36 = vadd.f32 %v11005_v28, %v11061_v51 }
 0x653   : > { %6726 = vst [vmem:[%s8533_s29 + $0xa8] sm:$0xff] %v7807_v21  ;;  %v7811_v7 = vadd.f32 %v6602_v24, %v6024_v9  ;;  %v6064_v21 = vadd.f32 %v10991_v56, %v11065_v26 }
 0x654   : > { %6727 = vst [vmem:[%s8533_s29 + $0xb0] sm:$0xff] %v7809_v55 }
 0x655   : > { %6728 = vst [vmem:[%s8533_s29 + $0xb8] sm:$0xff] %v7811_v7 }
 0x657   : > { %v6606_v57 = vpop.f32.mrb[88].mxu0 }
 0x658   : > { %v7813_v8 = vadd.f32 %v6606_v57, %v6028_v16  ;;  %v6608_v53 = vpop.f32.mrb[89].mxu0  ;;  %v6072_v16 = vadd.f32 %v10999_v5, %v11061_v51  ;;  %v6080_v5 = vadd.f32 %v11007_v63, %v11065_v26  ;;  %v6088_v63 = vadd.f32 %v11015_v4, %v11061_v51 }
 0x659   : > { %v7815_v58 = vadd.f32 %v6608_v53, %v6030_v50  ;;  %v6610_v15 = vpop.f32.mrb[90].mxu0 }
 0x65a   : > { %6729 = vst [vmem:[%s8533_s29 + $0xc0] sm:$0xff] %v7813_v8  ;;  %v7817_v1 = vadd.f32 %v6610_v15, %v6032_v25  ;;  %v6612_v31 = vpop.f32.mrb[91].mxu0  ;;  %v11405_v25 = vld [vmem:[#allocation3_spill] sm:$0xff] }
 0x65b   : > { %6730 = vst [vmem:[%s8533_s29 + $0xc8] sm:$0xff] %v7815_v58  ;;  %v7819_v20 = vadd.f32 %v6612_v31, %v6034_v62  ;;  %v6074_v8 = vadd.f32 %v11405_v25, %v11065_v26  ;;  %v11406_v31 = vld [vmem:[#allocation4_spill] sm:$0xff] }
 0x65c   : > { %6731 = vst [vmem:[%s8533_s29 + $0xd0] sm:$0xff] %v7817_v1 }
 0x65d   : > { %6732 = vst [vmem:[%s8533_s29 + $0xd8] sm:$0xff] %v7819_v20  ;;  %v6082_v20 = vadd.f32 %v11406_v31, %v11061_v51  ;;  %v11417_v31 = vld [vmem:[#allocation15_spill] sm:$0xff] }
 0x65f   : > { %v6616_v41 = vpop.f32.mrb[92].mxu0 }
 0x660   : > { %v7821_v47 = vadd.f32 %v6616_v41, %v6038_v49  ;;  %v6618_v17 = vpop.f32.mrb[93].mxu0  ;;  %v11407_v41 = vld [vmem:[#allocation7_spill] sm:$0xff] }
 0x661   : > { %v7823_v30 = vadd.f32 %v6618_v17, %v6040_v39  ;;  %v6620_v10 = vpop.f32.mrb[94].mxu0 }
 0x662   : > { %6733 = vst [vmem:[%s8533_s29 + $0xe0] sm:$0xff] %v7821_v47  ;;  %v7825_v2 = vadd.f32 %v6620_v10, %v6042_v42  ;;  %v6622_v37 = vpop.f32.mrb[95].mxu0  ;;  %v6084_v42 = vadd.f32 %v11407_v41, %v11065_v26  ;;  %v6090_v10 = vadd.f32 %v11017_v59, %v11065_v26  ;;  %v6098_v59 = vadd.f32 %v11025_v32, %v11061_v51 }
 0x663   : > { %6734 = vst [vmem:[%s8533_s29 + $0xe8] sm:$0xff] %v7823_v30  ;;  %v7827_v19 = vadd.f32 %v6622_v37, %v6044_v61  ;;  %v11408_v37 = vld [vmem:[#allocation5_spill] sm:$0xff] }
 0x664   : > { %6735 = vst [vmem:[%s8533_s29 + $0xf0] sm:$0xff] %v7825_v2 }
 0x665   : > { %6736 = vst [vmem:[%s8533_s29 + $0xf8] sm:$0xff] %v7827_v19  ;;  %v6092_v19 = vadd.f32 %v11408_v37, %v11061_v51 }
 0x667   : > { %v6626_v44 = vpop.f32.mrb[96].mxu0 }
 0x668   : > { %v7829_v22 = vadd.f32 %v6626_v44, %v6048_v46  ;;  %v6628_v29 = vpop.f32.mrb[97].mxu0  ;;  %v11409_v44 = vld [vmem:[#allocation6_spill] sm:$0xff] }
 0x669   : > { %v7831_v38 = vadd.f32 %v6628_v29, %v6050_v3  ;;  %v6630_v52 = vpop.f32.mrb[98].mxu0 }
 0x66a   : > { %6737 = vst [vmem:[%s8533_s29 + $0x100] sm:$0xff] %v7829_v22  ;;  %v7833_v23 = vadd.f32 %v6630_v52, %v6052_v60  ;;  %v6632_v13 = vpop.f32.mrb[99].mxu0  ;;  %v6094_v60 = vadd.f32 %v11409_v44, %v11065_v26  ;;  %v6100_v52 = vadd.f32 %v11027_v14, %v11065_v26  ;;  %v6108_v14 = vadd.f32 %v11035_v54, %v11061_v51 }
 0x66b   : > { %6738 = vst [vmem:[%s8533_s29 + $0x108] sm:$0xff] %v7831_v38  ;;  %v7835_v34 = vadd.f32 %v6632_v13, %v6054_v35  ;;  %v11410_v13 = vld [vmem:[#allocation9_spill] sm:$0xff] }
 0x66c   : > { %6739 = vst [vmem:[%s8533_s29 + $0x110] sm:$0xff] %v7833_v23 }
 0x66d   : > { %6740 = vst [vmem:[%s8533_s29 + $0x118] sm:$0xff] %v7835_v34  ;;  %v6102_v34 = vadd.f32 %v11410_v13, %v11061_v51 }
 0x66f   : > { %v6636_v11 = vpop.f32.mrb[100].mxu0 }
 0x670   : > { %v7837_v27 = vadd.f32 %v6636_v11, %v6058_v6  ;;  %v6638_v9 = vpop.f32.mrb[101].mxu0  ;;  %v11411_v11 = vld [vmem:[#allocation8_spill] sm:$0xff] }
 0x671   : > { %v7839_v45 = vadd.f32 %v6638_v9, %v6060_v0  ;;  %v6640_v55 = vpop.f32.mrb[102].mxu0 }
 0x672   : > { %6741 = vst [vmem:[%s8533_s29 + $0x120] sm:$0xff] %v7837_v27  ;;  %v7841_v24 = vadd.f32 %v6640_v55, %v6062_v18  ;;  %v6642_v7 = vpop.f32.mrb[103].mxu0  ;;  %v6104_v18 = vadd.f32 %v11411_v11, %v11065_v26  ;;  %v6110_v55 = vadd.f32 %v11037_v40, %v11065_v26  ;;  %v11414_v40 = vld [vmem:[#allocation12_spill] sm:$0xff] }
 0x673   : > { %6742 = vst [vmem:[%s8533_s29 + $0x128] sm:$0xff] %v7839_v45  ;;  %v7843_v12 = vadd.f32 %v6642_v7, %v6064_v21  ;;  %v11412_v7 = vld [vmem:[#allocation11_spill] sm:$0xff] }
 0x674   : > { %6743 = vst [vmem:[%s8533_s29 + $0x130] sm:$0xff] %v7841_v24 }
 0x675   : > { %6744 = vst [vmem:[%s8533_s29 + $0x138] sm:$0xff] %v7843_v12  ;;  %v6112_v12 = vadd.f32 %v11412_v7, %v11061_v51 }
 0x677   : > { %v6646_v56 = vpop.f32.mrb[104].mxu0 }
 0x678   : > { %v7845_v50 = vadd.f32 %v6646_v56, %v6068_v48  ;;  %v6648_v57 = vpop.f32.mrb[105].mxu0  ;;  %v11413_v56 = vld [vmem:[#allocation10_spill] sm:$0xff] }
 0x679   : > { %v7847_v53 = vadd.f32 %v6648_v57, %v6070_v43  ;;  %v6650_v62 = vpop.f32.mrb[106].mxu0 }
 0x67a   : > { %6745 = vst [vmem:[%s8533_s29 + $0x140] sm:$0xff] %v7845_v50  ;;  %v7849_v58 = vadd.f32 %v6650_v62, %v6072_v16  ;;  %v6652_v15 = vpop.f32.mrb[107].mxu0  ;;  %v6114_v16 = vadd.f32 %v11413_v56, %v11065_v26  ;;  %v11415_v62 = vld [vmem:[#allocation13_spill] sm:$0xff] }
 0x67b   : > { %6746 = vst [vmem:[%s8533_s29 + $0x148] sm:$0xff] %v7847_v53  ;;  %v7851_v33 = vadd.f32 %v6652_v15, %v6074_v8  ;;  %v6118_v53 = vadd.f32 %v11414_v40, %v11061_v51 }
 0x67c   : > { %6747 = vst [vmem:[%s8533_s29 + $0x150] sm:$0xff] %v7849_v58  ;;  %v6120_v58 = vadd.f32 %v11415_v62, %v11065_v26 }
 0x67d   : > { %6748 = vst [vmem:[%s8533_s29 + $0x158] sm:$0xff] %v7851_v33  ;;  %v11416_v33 = vld [vmem:[#allocation14_spill] sm:$0xff] }
 0x67f   : > { %v6656_v1 = vpop.f32.mrb[108].mxu0 }
 0x680   : > { %v7853_v49 = vadd.f32 %v6656_v1, %v6078_v36  ;;  %v6658_v39 = vpop.f32.mrb[109].mxu0  ;;  %v6122_v36 = vadd.f32 %v11416_v33, %v11061_v51 }
 0x681   : > { %v7855_v47 = vadd.f32 %v6658_v39, %v6080_v5  ;;  %v6660_v17 = vpop.f32.mrb[110].mxu0 }
 0x682   : > { %6749 = vst [vmem:[%s8533_s29 + $0x160] sm:$0xff] %v7853_v49  ;;  %v7857_v61 = vadd.f32 %v6660_v17, %v6082_v20  ;;  %v6662_v30 = vpop.f32.mrb[111].mxu0  ;;  %v6124_v20 = vadd.f32 %v11417_v31, %v11065_v26 }
 0x683   : > { %6750 = vst [vmem:[%s8533_s29 + $0x168] sm:$0xff] %v7855_v47  ;;  %v7859_v28 = vadd.f32 %v6662_v30, %v6084_v42 }
 0x684   : > { %6751 = vst [vmem:[%s8533_s29 + $0x170] sm:$0xff] %v7857_v61 }
 0x685   : > { %6752 = vst [vmem:[%s8533_s29 + $0x178] sm:$0xff] %v7859_v28 }
 0x687   : > { %v6666_v2 = vpop.f32.mrb[112].mxu0 }
 0x688   : > { %v7861_v46 = vadd.f32 %v6666_v2, %v6088_v63  ;;  %v6668_v3 = vpop.f32.mrb[113].mxu0 }
 0x689   : > { %v7863_v22 = vadd.f32 %v6668_v3, %v6090_v10  ;;  %v6670_v29 = vpop.f32.mrb[114].mxu0 }
 0x68a   : > { %6753 = vst [vmem:[%s8533_s29 + $0x180] sm:$0xff] %v7861_v46  ;;  %v7865_v35 = vadd.f32 %v6670_v29, %v6092_v19  ;;  %v6672_v38 = vpop.f32.mrb[115].mxu0 }
 0x68b   : > { %6754 = vst [vmem:[%s8533_s29 + $0x188] sm:$0xff] %v7863_v22  ;;  %v7867_v4 = vadd.f32 %v6672_v38, %v6094_v60 }
 0x68c   : > { %6755 = vst [vmem:[%s8533_s29 + $0x190] sm:$0xff] %v7865_v35 }
 0x68d   : > { %6756 = vst [vmem:[%s8533_s29 + $0x198] sm:$0xff] %v7867_v4 }
 0x68f   : > { %v6676_v23 = vpop.f32.mrb[116].mxu0 }
 0x690   : > { %v7869_v6 = vadd.f32 %v6676_v23, %v6098_v59  ;;  %v6678_v0 = vpop.f32.mrb[117].mxu0 }
 0x691   : > { %v7871_v27 = vadd.f32 %v6678_v0, %v6100_v52  ;;  %v6680_v9 = vpop.f32.mrb[118].mxu0 }
 0x692   : > { %6757 = vst [vmem:[%s8533_s29 + $0x1a0] sm:$0xff] %v7869_v6  ;;  %v7873_v21 = vadd.f32 %v6680_v9, %v6102_v34  ;;  %v6682_v45 = vpop.f32.mrb[119].mxu0 }
 0x693   : > { %6758 = vst [vmem:[%s8533_s29 + $0x1a8] sm:$0xff] %v7871_v27  ;;  %v7875_v32 = vadd.f32 %v6682_v45, %v6104_v18 }
 0x694   : > { %6759 = vst [vmem:[%s8533_s29 + $0x1b0] sm:$0xff] %v7873_v21 }
 0x695   : > { %6760 = vst [vmem:[%s8533_s29 + $0x1b8] sm:$0xff] %v7875_v32 }
 0x697   : > { %v6686_v24 = vpop.f32.mrb[120].mxu0 }
 0x698   : > { %v7877_v48 = vadd.f32 %v6686_v24, %v6108_v14  ;;  %v6688_v43 = vpop.f32.mrb[121].mxu0 }
 0x699   : > { %v7879_v50 = vadd.f32 %v6688_v43, %v6110_v55  ;;  %v6690_v57 = vpop.f32.mrb[122].mxu0 }
 0x69a   : > { %6761 = vst [vmem:[%s8533_s29 + $0x1c0] sm:$0xff] %v7877_v48  ;;  %v7881_v25 = vadd.f32 %v6690_v57, %v6112_v12  ;;  %v6692_v8 = vpop.f32.mrb[123].mxu0 }
 0x69b   : > { %6762 = vst [vmem:[%s8533_s29 + $0x1c8] sm:$0xff] %v7879_v50  ;;  %v7883_v54 = vadd.f32 %v6692_v8, %v6114_v16 }
 0x69c   : > { %6763 = vst [vmem:[%s8533_s29 + $0x1d0] sm:$0xff] %v7881_v25 }
 0x69d   : > { %6764 = vst [vmem:[%s8533_s29 + $0x1d8] sm:$0xff] %v7883_v54 }
 0x69f   : > { %v6696_v15 = vpop.f32.mrb[124].mxu0 }
 0x6a0   : > { %v7885_v5 = vadd.f32 %v6696_v15, %v6118_v53  ;;  %v6698_v1 = vpop.f32.mrb[125].mxu0 }
 0x6a1   : > { %v7887_v49 = vadd.f32 %v6698_v1, %v6120_v58  ;;  %v6700_v39 = vpop.f32.mrb[126].mxu0 }
 0x6a2   : > { %6765 = vst [vmem:[%s8533_s29 + $0x1e0] sm:$0xff] %v7885_v5  ;;  %v7889_v41 = vadd.f32 %v6700_v39, %v6122_v36  ;;  %v6702_v42 = vpop.f32.mrb[127].mxu0 }
 0x6a3   : > { %6766 = vst [vmem:[%s8533_s29 + $0x1e8] sm:$0xff] %v7887_v49  ;;  %v7891_v47 = vadd.f32 %v6702_v42, %v6124_v20 }
 0x6a4   : > { %6767 = vst [vmem:[%s8533_s29 + $0x1f0] sm:$0xff] %v7889_v41 }
 0x6a5   : > { %6768 = vst [vmem:[%s8533_s29 + $0x1f8] sm:$0xff] %v7891_v47 }
 0x6a6 PF: > { %s19_s30 = sadd.s32 1, %s8363_s30  }
 0x6a7   : > { %p16_p5 = scmp.ge.s32.totalorder %s19_s30, 4  }
 0x6a9   :  { %18 = sbr.rel (!%p16_p5) target bundleno = 1 (0x1), region = 107 }

</bundles_post_ra>
